<compile_context>
chip_gen: v6e
topology: v6e:2x2x1
jax: 0.10.0
libtpu: 0.0.40
codegen_flags: <defaults>
</compile_context>

<pallas_src>
import functools
import math

import jax
import jax.numpy as jnp
from jax.experimental import pallas as pl
from jax.experimental.pallas import tpu as pltpu


def _mlp_kernel(x_ref, w1_ref, b1_ref, wd_ref, bd_ref, w2_ref, b2_ref, m_ref,
                o_ref, *, W):
    """One group of B_TILE lane-concatenated images per grid step.

    x_ref:  (1, Cin, LHW)   bf16 input           (LHW = B_TILE * H * W)
    w1_ref: (Chid, Cin)     bf16 fc1 weight      b1_ref: (Chid, 1) f32
    wd_ref: (Chid, 9)       f32 depthwise taps   bd_ref: (Chid, 1) f32
    w2_ref: (Cout, Chid)    bf16 fc2 weight      b2_ref: (Cout, 1) f32
    m_ref:  (9, LHW)        f32 {0,1} zero-padding masks per tap (per image)
    o_ref:  (1, Cout, LHW)  f32 output (lane-dense store)
    """
    LHW = x_ref.shape[2]

    # ---- fc1: 1x1 conv == one MXU matmul (bf16 in, f32 accumulate) ----------
    x = x_ref[0]                                               # (Cin, LHW) bf16
    y1 = jnp.dot(w1_ref[...], x, preferred_element_type=jnp.float32)
    y1 = y1 + b1_ref[...]                                      # (Chid, LHW) f32

    # ---- 3x3 depthwise conv, stride 1, padding 1 ----------------------------
    # Center tap initializes the accumulator; the 8 shifted taps are XLU lane
    # rotations (pltpu.roll) + VPU MACs with compile-time zero-padding masks.
    acc = y1 * wd_ref[:, 4:5]                                  # center (0,0) tap
    for t in range(9):
        if t == 4:
            continue
        ddh, ddw = t // 3 - 1, t % 3 - 1
        off = ddh * W + ddw
        shifted = pltpu.roll(y1, (-off) % LHW, 1)              # XLU vrot
        acc = acc + (shifted * m_ref[t:t + 1, :]) * wd_ref[:, t:t + 1]
    z = acc + bd_ref[...]                                      # (Chid, LHW) f32

    # ---- GELU (exact / erf form, matching nn.GELU default) ------------------
    # erf via Abramowitz-Stegun 7.1.26 (|error| < 1.5e-7): EUP exp + EUP rcp
    # (approx) + VPU Horner polynomial.
    u = z * 0.7071067811865476
    a = jnp.abs(u)
    tt = pl.reciprocal(1.0 + 0.3275911 * a, approx=True)       # EUP slot
    poly = tt * (0.254829592 + tt * (-0.284496736 + tt * (1.421413741
                 + tt * (-1.453152027 + tt * 1.061405429))))
    erf_a = 1.0 - poly * jnp.exp(-a * a)                       # EUP exp
    erf_u = jnp.where(u >= 0.0, erf_a, -erf_a)
    h = 0.5 * z * (1.0 + erf_u)                                # (Chid, LHW) f32

    # ---- fc2: 1x1 conv == one MXU matmul; lane-dense output store -----------
    out = jnp.dot(w2_ref[...], h.astype(jnp.bfloat16),
                  preferred_element_type=jnp.float32)
    out = out + b2_ref[...]                                    # (Cout, LHW) f32
    o_ref[0] = out.astype(o_ref.dtype)


def _pick_b_tile(n):
    """Largest of {8,4,2,1} that divides N while keeping >= 2 grid steps
    (v7x has 2 TensorCores; core occupancy binds before VMEM here)."""
    for cand in (8, 4, 2):
        if n % cand == 0 and n // cand >= 2:
            return cand
    return 1


def mlp_forward(x, fc1_w, fc1_b, dw_w, dw_b, fc2_w, fc2_b, b_tile=None):
    """Fused SimVP Mlp forward.

    x:      (N, Cin, H, W) f32 NCHW (PyTorch convention)
    fc1_w:  (Chid, Cin, 1, 1)   fc1_b: (Chid,)
    dw_w:   (Chid, 1, 3, 3)     dw_b:  (Chid,)
    fc2_w:  (Cout, Chid, 1, 1)  fc2_b: (Cout,)
    returns (N, Cout, H, W) f32
    """
    N, Cin, H, W = x.shape
    Chid = fc1_w.shape[0]
    Cout = fc2_w.shape[0]
    HW = H * W
    assert dw_w.shape == (Chid, 1, 3, 3)

    if b_tile is None:
        b_tile = _pick_b_tile(N)
    assert N % b_tile == 0
    G = N // b_tile
    LHW = b_tile * HW

    # Channels-first, lane-concatenated layout.  For b_tile == 1 the transpose
    # is over a size-1 axis and is a pure reshape (zero cost), matching the
    # previously validated layout.  bf16 only for the MXU operands.
    x_g = (x.reshape(G, b_tile, Cin, HW)
            .transpose(0, 2, 1, 3)
            .reshape(G, Cin, LHW)
            .astype(jnp.bfloat16))
    w1 = fc1_w.reshape(Chid, Cin).astype(jnp.bfloat16)
    w2 = fc2_w.reshape(Cout, Chid).astype(jnp.bfloat16)
    wd = dw_w.reshape(Chid, 9).astype(jnp.float32)
    b1 = fc1_b.reshape(Chid, 1).astype(jnp.float32)
    bd = dw_b.reshape(Chid, 1).astype(jnp.float32)
    b2 = fc2_b.reshape(Cout, 1).astype(jnp.float32)

    # Compile-time zero-padding boundary masks for the 9 depthwise taps,
    # tiled per image so rolls never leak data across image boundaries.
    hh = jnp.arange(HW, dtype=jnp.int32) // W
    ww = jnp.arange(HW, dtype=jnp.int32) % W
    rows = []
    for t in range(9):
        ddh, ddw = t // 3 - 1, t % 3 - 1
        ok = ((hh + ddh >= 0) & (hh + ddh < H) &
              (ww + ddw >= 0) & (ww + ddw < W))
        rows.append(ok.astype(jnp.float32))
    masks = jnp.tile(jnp.stack(rows, axis=0), (1, b_tile))     # (9, LHW)

    # Advisory cost estimate so XLA can schedule this call against neighbors.
    flops = int(2 * N * HW * Chid * (Cin + Cout)               # 1x1 convs
                + N * HW * Chid * (2 * 9 + 9 + 20))            # dwconv + GELU
    transcendentals = int(2 * N * HW * Chid)                   # exp + rcp
    bytes_accessed = int(x_g.size * 2 + N * Cout * HW * 4
                         + G * (w1.size * 2 + w2.size * 2
                                + (wd.size + b1.size + bd.size + b2.size
                                   + masks.size) * 4))

    kernel = functools.partial(_mlp_kernel, W=W)

    out_g = pl.pallas_call(
        kernel,
        out_shape=jax.ShapeDtypeStruct((G, Cout, LHW), jnp.float32),
        grid_spec=pltpu.PrefetchScalarGridSpec(
            num_scalar_prefetch=0,
            grid=(G,),
            in_specs=[
                pl.BlockSpec((1, Cin, LHW), lambda g: (g, 0, 0)),
                pl.BlockSpec((Chid, Cin), lambda g: (0, 0)),
                pl.BlockSpec((Chid, 1), lambda g: (0, 0)),
                pl.BlockSpec((Chid, 9), lambda g: (0, 0)),
                pl.BlockSpec((Chid, 1), lambda g: (0, 0)),
                pl.BlockSpec((Cout, Chid), lambda g: (0, 0)),
                pl.BlockSpec((Cout, 1), lambda g: (0, 0)),
                pl.BlockSpec((9, LHW), lambda g: (0, 0)),
            ],
            out_specs=pl.BlockSpec((1, Cout, LHW), lambda g: (g, 0, 0)),
        ),
        compiler_params=pltpu.CompilerParams(
            dimension_semantics=("parallel",)),
        cost_estimate=pl.CostEstimate(
            flops=flops,
            transcendentals=transcendentals,
            bytes_accessed=bytes_accessed),
    )(x_g, w1, b1, wd, bd, w2, b2, masks)

    # Undo the lane concatenation (free reshapes for b_tile == 1).
    out = (out_g.reshape(G, Cout, b_tile, HW)
                .transpose(0, 2, 1, 3)
                .reshape(N, Cout, H, W))
    return out


def _reference(x, fc1_w, fc1_b, dw_w, dw_b, fc2_w, fc2_b):
    """Pure-JAX reference with the kernel's numerics contract
    (bf16-rounded matmul operands, f32 accumulation, exact-erf GELU)."""
    hp = jax.lax.Precision.HIGHEST
    f32 = jnp.float32
    xq = x.astype(jnp.bfloat16).astype(f32)
    w1q = fc1_w.astype(jnp.bfloat16).astype(f32)
    w2q = fc2_w.astype(jnp.bfloat16).astype(f32)

    y = jax.lax.conv_general_dilated(
        xq, w1q, (1, 1), ((0, 0), (0, 0)),
        dimension_numbers=("NCHW", "OIHW", "NCHW"), precision=hp)
    y = y + fc1_b[None, :, None, None]
    y = jax.lax.conv_general_dilated(
        y, dw_w, (1, 1), ((1, 1), (1, 1)),
        dimension_numbers=("NCHW", "OIHW", "NCHW"),
        feature_group_count=dw_w.shape[0], precision=hp)
    y = y + dw_b[None, :, None, None]
    y = jax.nn.gelu(y, approximate=False)
    yq = y.astype(jnp.bfloat16).astype(f32)
    y = jax.lax.conv_general_dilated(
        yq, w2q, (1, 1), ((0, 0), (0, 0)),
        dimension_numbers=("NCHW", "OIHW", "NCHW"), precision=hp)
    y = y + fc2_b[None, :, None, None]
    return y


if __name__ == "__main__":
    # Mlp(in_features=32, hidden_features=64, out_features=32), small spatial.
    N, Cin, H, W = 2, 32, 16, 16
    Chid, Cout = 64, 32

    key = jax.random.PRNGKey(0)
    kx, k1, k2, k3, kb1, kb2, kb3 = jax.random.split(key, 7)

    x = jax.random.normal(kx, (N, Cin, H, W), dtype=jnp.float32)

    # Conv weight init as in Mlp._init_weights: N(0, sqrt(2 / (kh*kw*Cout/groups))).
    fc1_w = jax.random.normal(k1, (Chid, Cin, 1, 1), jnp.float32) * math.sqrt(2.0 / Chid)
    dw_w = jax.random.normal(k2, (Chid, 1, 3, 3), jnp.float32) * math.sqrt(2.0 / 9.0)
    fc2_w = jax.random.normal(k3, (Cout, Chid, 1, 1), jnp.float32) * math.sqrt(2.0 / Cout)
    # _init_weights zeroes conv biases; use small non-zero ones so the bias
    # path is actually exercised by the check.
    fc1_b = 0.1 * jax.random.normal(kb1, (Chid,), jnp.float32)
    dw_b = 0.1 * jax.random.normal(kb2, (Chid,), jnp.float32)
    fc2_b = 0.1 * jax.random.normal(kb3, (Cout,), jnp.float32)

    y = mlp_forward(x, fc1_w, fc1_b, dw_w, dw_b, fc2_w, fc2_b)
    y = jax.block_until_ready(y)

    y_ref = _reference(x, fc1_w, fc1_b, dw_w, dw_b, fc2_w, fc2_b)
    assert y.shape == (N, Cout, H, W)
    # bf16 matmul operands (~1 bf16 ulp on the re-quantized fc2 input) plus the
    # approximate EUP reciprocal inside the GELU erf polynomial give a few e-4
    # per-element deviation; 1e-2 covers that while still catching real bugs
    # (wrong tap/mask/roll/weight errors are O(0.1-1)).
    err = float(jnp.max(jnp.abs(y - y_ref)))
    assert jnp.allclose(y, y_ref, atol=1e-2, rtol=1e-2), err

    print("KERNEL_OK")
</pallas_src>

<mosaic_0001>
module attributes {stable_mosaic.version = 11 : i64} {
  func.func @_mlp_kernel(%arg0: i32, %arg1: memref<1x32x256xbf16, #tpu.memory_space<vmem>>, %arg2: memref<64x32xbf16, #tpu.memory_space<vmem>>, %arg3: memref<64x1xf32, #tpu.memory_space<vmem>>, %arg4: memref<64x9xf32, #tpu.memory_space<vmem>>, %arg5: memref<64x1xf32, #tpu.memory_space<vmem>>, %arg6: memref<32x64xbf16, #tpu.memory_space<vmem>>, %arg7: memref<32x1xf32, #tpu.memory_space<vmem>>, %arg8: memref<9x256xf32, #tpu.memory_space<vmem>>, %arg9: memref<1x32x256xf32, #tpu.memory_space<vmem>>) attributes {dimension_semantics = [#tpu.dimension_semantics<parallel>], iteration_bounds = array<i64: 2>, scalar_prefetch = 0 : i64, scratch_operands = 0 : i64, tpu.core_type = #tpu.core_type<tc>, window_params = [{transform_indices = @transform_0, window_bounds = array<i64: 1, 32, 256>}, {pipeline_mode = #tpu.pipeline_mode<synchronous>, transform_indices = @transform_1, window_bounds = array<i64: 64, 32>}, {pipeline_mode = #tpu.pipeline_mode<synchronous>, transform_indices = @transform_2, window_bounds = array<i64: 64, 1>}, {pipeline_mode = #tpu.pipeline_mode<synchronous>, transform_indices = @transform_3, window_bounds = array<i64: 64, 9>}, {pipeline_mode = #tpu.pipeline_mode<synchronous>, transform_indices = @transform_4, window_bounds = array<i64: 64, 1>}, {pipeline_mode = #tpu.pipeline_mode<synchronous>, transform_indices = @transform_5, window_bounds = array<i64: 32, 64>}, {pipeline_mode = #tpu.pipeline_mode<synchronous>, transform_indices = @transform_6, window_bounds = array<i64: 32, 1>}, {pipeline_mode = #tpu.pipeline_mode<synchronous>, transform_indices = @transform_7, window_bounds = array<i64: 9, 256>}, {transform_indices = @transform_8, window_bounds = array<i64: 1, 32, 256>}]} {
    %c0 = arith.constant 0 : index
    %c0_0 = arith.constant 0 : index
    %c0_1 = arith.constant 0 : index
    %0 = vector.load %arg1[%c0, %c0_0, %c0_1] : memref<1x32x256xbf16, #tpu.memory_space<vmem>>, vector<1x32x256xbf16>
    %1 = vector.shape_cast %0 : vector<1x32x256xbf16> to vector<32x256xbf16>
    %c0_2 = arith.constant 0 : index
    %c0_3 = arith.constant 0 : index
    %2 = vector.load %arg2[%c0_2, %c0_3] : memref<64x32xbf16, #tpu.memory_space<vmem>>, vector<64x32xbf16>
    %cst = arith.constant dense<0.000000e+00> : vector<64x256xf32>
    %3 = tpu.matmul %2, %1, %cst {dimension_numbers = #tpu.dot_dimension_numbers<[1], [0], [0], [1], [0, 0, 1, 1], [], []>} : vector<64x32xbf16>, vector<32x256xbf16>, vector<64x256xf32> -> vector<64x256xf32>
    %c0_4 = arith.constant 0 : index
    %c0_5 = arith.constant 0 : index
    %4 = vector.load %arg3[%c0_4, %c0_5] : memref<64x1xf32, #tpu.memory_space<vmem>>, vector<64x1xf32>
    %5 = vector.broadcast %4 : vector<64x1xf32> to vector<64x256xf32>
    %6 = arith.addf %3, %5 : vector<64x256xf32>
    %c0_6 = arith.constant 0 : index
    %c4 = arith.constant 4 : index
    %7 = vector.load %arg4[%c0_6, %c4] : memref<64x9xf32, #tpu.memory_space<vmem>>, vector<64x1xf32>
    %8 = vector.broadcast %7 : vector<64x1xf32> to vector<64x256xf32>
    %9 = arith.mulf %6, %8 : vector<64x256xf32>
    %c17_i32 = arith.constant 17 : i32
    %10 = tpu.dynamic_rotate %6 by %c17_i32 dim 1 : vector<64x256xf32>, i32 -> vector<64x256xf32>
    %c0_7 = arith.constant 0 : index
    %c0_8 = arith.constant 0 : index
    %11 = vector.load %arg8[%c0_7, %c0_8] : memref<9x256xf32, #tpu.memory_space<vmem>>, vector<1x256xf32>
    %12 = vector.broadcast %11 : vector<1x256xf32> to vector<64x256xf32>
    %13 = arith.mulf %10, %12 : vector<64x256xf32>
    %c0_9 = arith.constant 0 : index
    %c0_10 = arith.constant 0 : index
    %14 = vector.load %arg4[%c0_9, %c0_10] : memref<64x9xf32, #tpu.memory_space<vmem>>, vector<64x1xf32>
    %15 = vector.broadcast %14 : vector<64x1xf32> to vector<64x256xf32>
    %16 = arith.mulf %13, %15 : vector<64x256xf32>
    %17 = arith.addf %9, %16 : vector<64x256xf32>
    %c16_i32 = arith.constant 16 : i32
    %18 = tpu.dynamic_rotate %6 by %c16_i32 dim 1 : vector<64x256xf32>, i32 -> vector<64x256xf32>
    %c1 = arith.constant 1 : index
    %c0_11 = arith.constant 0 : index
    %19 = vector.load %arg8[%c1, %c0_11] : memref<9x256xf32, #tpu.memory_space<vmem>>, vector<1x256xf32>
    %20 = vector.broadcast %19 : vector<1x256xf32> to vector<64x256xf32>
    %21 = arith.mulf %18, %20 : vector<64x256xf32>
    %c0_12 = arith.constant 0 : index
    %c1_13 = arith.constant 1 : index
    %22 = vector.load %arg4[%c0_12, %c1_13] : memref<64x9xf32, #tpu.memory_space<vmem>>, vector<64x1xf32>
    %23 = vector.broadcast %22 : vector<64x1xf32> to vector<64x256xf32>
    %24 = arith.mulf %21, %23 : vector<64x256xf32>
    %25 = arith.addf %17, %24 : vector<64x256xf32>
    %c15_i32 = arith.constant 15 : i32
    %26 = tpu.dynamic_rotate %6 by %c15_i32 dim 1 : vector<64x256xf32>, i32 -> vector<64x256xf32>
    %c2 = arith.constant 2 : index
    %c0_14 = arith.constant 0 : index
    %27 = vector.load %arg8[%c2, %c0_14] : memref<9x256xf32, #tpu.memory_space<vmem>>, vector<1x256xf32>
    %28 = vector.broadcast %27 : vector<1x256xf32> to vector<64x256xf32>
    %29 = arith.mulf %26, %28 : vector<64x256xf32>
    %c0_15 = arith.constant 0 : index
    %c2_16 = arith.constant 2 : index
    %30 = vector.load %arg4[%c0_15, %c2_16] : memref<64x9xf32, #tpu.memory_space<vmem>>, vector<64x1xf32>
    %31 = vector.broadcast %30 : vector<64x1xf32> to vector<64x256xf32>
    %32 = arith.mulf %29, %31 : vector<64x256xf32>
    %33 = arith.addf %25, %32 : vector<64x256xf32>
    %c1_i32 = arith.constant 1 : i32
    %34 = tpu.dynamic_rotate %6 by %c1_i32 dim 1 : vector<64x256xf32>, i32 -> vector<64x256xf32>
    %c3 = arith.constant 3 : index
    %c0_17 = arith.constant 0 : index
    %35 = vector.load %arg8[%c3, %c0_17] : memref<9x256xf32, #tpu.memory_space<vmem>>, vector<1x256xf32>
    %36 = vector.broadcast %35 : vector<1x256xf32> to vector<64x256xf32>
    %37 = arith.mulf %34, %36 : vector<64x256xf32>
    %c0_18 = arith.constant 0 : index
    %c3_19 = arith.constant 3 : index
    %38 = vector.load %arg4[%c0_18, %c3_19] : memref<64x9xf32, #tpu.memory_space<vmem>>, vector<64x1xf32>
    %39 = vector.broadcast %38 : vector<64x1xf32> to vector<64x256xf32>
    %40 = arith.mulf %37, %39 : vector<64x256xf32>
    %41 = arith.addf %33, %40 : vector<64x256xf32>
    %c255_i32 = arith.constant 255 : i32
    %42 = tpu.dynamic_rotate %6 by %c255_i32 dim 1 : vector<64x256xf32>, i32 -> vector<64x256xf32>
    %c5 = arith.constant 5 : index
    %c0_20 = arith.constant 0 : index
    %43 = vector.load %arg8[%c5, %c0_20] : memref<9x256xf32, #tpu.memory_space<vmem>>, vector<1x256xf32>
    %44 = vector.broadcast %43 : vector<1x256xf32> to vector<64x256xf32>
    %45 = arith.mulf %42, %44 : vector<64x256xf32>
    %c0_21 = arith.constant 0 : index
    %c5_22 = arith.constant 5 : index
    %46 = vector.load %arg4[%c0_21, %c5_22] : memref<64x9xf32, #tpu.memory_space<vmem>>, vector<64x1xf32>
    %47 = vector.broadcast %46 : vector<64x1xf32> to vector<64x256xf32>
    %48 = arith.mulf %45, %47 : vector<64x256xf32>
    %49 = arith.addf %41, %48 : vector<64x256xf32>
    %c241_i32 = arith.constant 241 : i32
    %50 = tpu.dynamic_rotate %6 by %c241_i32 dim 1 : vector<64x256xf32>, i32 -> vector<64x256xf32>
    %c6 = arith.constant 6 : index
    %c0_23 = arith.constant 0 : index
    %51 = vector.load %arg8[%c6, %c0_23] : memref<9x256xf32, #tpu.memory_space<vmem>>, vector<1x256xf32>
    %52 = vector.broadcast %51 : vector<1x256xf32> to vector<64x256xf32>
    %53 = arith.mulf %50, %52 : vector<64x256xf32>
    %c0_24 = arith.constant 0 : index
    %c6_25 = arith.constant 6 : index
    %54 = vector.load %arg4[%c0_24, %c6_25] : memref<64x9xf32, #tpu.memory_space<vmem>>, vector<64x1xf32>
    %55 = vector.broadcast %54 : vector<64x1xf32> to vector<64x256xf32>
    %56 = arith.mulf %53, %55 : vector<64x256xf32>
    %57 = arith.addf %49, %56 : vector<64x256xf32>
    %c240_i32 = arith.constant 240 : i32
    %58 = tpu.dynamic_rotate %6 by %c240_i32 dim 1 : vector<64x256xf32>, i32 -> vector<64x256xf32>
    %c7 = arith.constant 7 : index
    %c0_26 = arith.constant 0 : index
    %59 = vector.load %arg8[%c7, %c0_26] : memref<9x256xf32, #tpu.memory_space<vmem>>, vector<1x256xf32>
    %60 = vector.broadcast %59 : vector<1x256xf32> to vector<64x256xf32>
    %61 = arith.mulf %58, %60 : vector<64x256xf32>
    %c0_27 = arith.constant 0 : index
    %c7_28 = arith.constant 7 : index
    %62 = vector.load %arg4[%c0_27, %c7_28] : memref<64x9xf32, #tpu.memory_space<vmem>>, vector<64x1xf32>
    %63 = vector.broadcast %62 : vector<64x1xf32> to vector<64x256xf32>
    %64 = arith.mulf %61, %63 : vector<64x256xf32>
    %65 = arith.addf %57, %64 : vector<64x256xf32>
    %c239_i32 = arith.constant 239 : i32
    %66 = tpu.dynamic_rotate %6 by %c239_i32 dim 1 : vector<64x256xf32>, i32 -> vector<64x256xf32>
    %c8 = arith.constant 8 : index
    %c0_29 = arith.constant 0 : index
    %67 = vector.load %arg8[%c8, %c0_29] : memref<9x256xf32, #tpu.memory_space<vmem>>, vector<1x256xf32>
    %68 = vector.broadcast %67 : vector<1x256xf32> to vector<64x256xf32>
    %69 = arith.mulf %66, %68 : vector<64x256xf32>
    %c0_30 = arith.constant 0 : index
    %c8_31 = arith.constant 8 : index
    %70 = vector.load %arg4[%c0_30, %c8_31] : memref<64x9xf32, #tpu.memory_space<vmem>>, vector<64x1xf32>
    %71 = vector.broadcast %70 : vector<64x1xf32> to vector<64x256xf32>
    %72 = arith.mulf %69, %71 : vector<64x256xf32>
    %73 = arith.addf %65, %72 : vector<64x256xf32>
    %c0_32 = arith.constant 0 : index
    %c0_33 = arith.constant 0 : index
    %74 = vector.load %arg5[%c0_32, %c0_33] : memref<64x1xf32, #tpu.memory_space<vmem>>, vector<64x1xf32>
    %75 = vector.broadcast %74 : vector<64x1xf32> to vector<64x256xf32>
    %76 = arith.addf %73, %75 : vector<64x256xf32>
    %cst_34 = arith.constant 0.707106769 : f32
    %77 = vector.broadcast %cst_34 : f32 to vector<64x256xf32>
    %78 = arith.mulf %76, %77 : vector<64x256xf32>
    %79 = math.absf %78 : vector<64x256xf32>
    %cst_35 = arith.constant 0.327591091 : f32
    %80 = vector.broadcast %cst_35 : f32 to vector<64x256xf32>
    %81 = arith.mulf %80, %79 : vector<64x256xf32>
    %cst_36 = arith.constant 1.000000e+00 : f32
    %82 = vector.broadcast %cst_36 : f32 to vector<64x256xf32>
    %83 = arith.addf %82, %81 : vector<64x256xf32>
    %84 = tpu.reciprocal %83 {approx = true} : vector<64x256xf32> -> vector<64x256xf32>
    %cst_37 = arith.constant 1.06140542 : f32
    %85 = vector.broadcast %cst_37 : f32 to vector<64x256xf32>
    %86 = arith.mulf %84, %85 : vector<64x256xf32>
    %cst_38 = arith.constant -1.45315206 : f32
    %87 = vector.broadcast %cst_38 : f32 to vector<64x256xf32>
    %88 = arith.addf %87, %86 : vector<64x256xf32>
    %89 = arith.mulf %84, %88 : vector<64x256xf32>
    %cst_39 = arith.constant 1.42141378 : f32
    %90 = vector.broadcast %cst_39 : f32 to vector<64x256xf32>
    %91 = arith.addf %90, %89 : vector<64x256xf32>
    %92 = arith.mulf %84, %91 : vector<64x256xf32>
    %cst_40 = arith.constant -0.284496725 : f32
    %93 = vector.broadcast %cst_40 : f32 to vector<64x256xf32>
    %94 = arith.addf %93, %92 : vector<64x256xf32>
    %95 = arith.mulf %84, %94 : vector<64x256xf32>
    %cst_41 = arith.constant 0.254829586 : f32
    %96 = vector.broadcast %cst_41 : f32 to vector<64x256xf32>
    %97 = arith.addf %96, %95 : vector<64x256xf32>
    %98 = arith.mulf %84, %97 : vector<64x256xf32>
    %cst_42 = arith.constant 0.000000e+00 : f32
    %99 = vector.broadcast %cst_42 : f32 to vector<64x256xf32>
    %100 = arith.subf %99, %79 : vector<64x256xf32>
    %101 = arith.mulf %100, %79 : vector<64x256xf32>
    %102 = math.exp %101 : vector<64x256xf32>
    %103 = arith.mulf %98, %102 : vector<64x256xf32>
    %cst_43 = arith.constant 1.000000e+00 : f32
    %104 = vector.broadcast %cst_43 : f32 to vector<64x256xf32>
    %105 = arith.subf %104, %103 : vector<64x256xf32>
    %cst_44 = arith.constant 0.000000e+00 : f32
    %106 = vector.broadcast %cst_44 : f32 to vector<64x256xf32>
    %107 = arith.cmpf oge, %78, %106 : vector<64x256xf32>
    %cst_45 = arith.constant 0.000000e+00 : f32
    %108 = vector.broadcast %cst_45 : f32 to vector<64x256xf32>
    %109 = arith.subf %108, %105 : vector<64x256xf32>
    %110 = arith.select %107, %105, %109 : vector<64x256xi1>, vector<64x256xf32>
    %cst_46 = arith.constant 5.000000e-01 : f32
    %111 = vector.broadcast %cst_46 : f32 to vector<64x256xf32>
    %112 = arith.mulf %111, %76 : vector<64x256xf32>
    %cst_47 = arith.constant 1.000000e+00 : f32
    %113 = vector.broadcast %cst_47 : f32 to vector<64x256xf32>
    %114 = arith.addf %113, %110 : vector<64x256xf32>
    %115 = arith.mulf %112, %114 : vector<64x256xf32>
    %c0_48 = arith.constant 0 : index
    %c0_49 = arith.constant 0 : index
    %116 = vector.load %arg6[%c0_48, %c0_49] : memref<32x64xbf16, #tpu.memory_space<vmem>>, vector<32x64xbf16>
    %117 = arith.truncf %115 : vector<64x256xf32> to vector<64x256xbf16>
    %cst_50 = arith.constant dense<0.000000e+00> : vector<32x256xf32>
    %118 = tpu.matmul %116, %117, %cst_50 {dimension_numbers = #tpu.dot_dimension_numbers<[1], [0], [0], [1], [0, 0, 1, 1], [], []>} : vector<32x64xbf16>, vector<64x256xbf16>, vector<32x256xf32> -> vector<32x256xf32>
    %c0_51 = arith.constant 0 : index
    %c0_52 = arith.constant 0 : index
    %119 = vector.load %arg7[%c0_51, %c0_52] : memref<32x1xf32, #tpu.memory_space<vmem>>, vector<32x1xf32>
    %120 = vector.broadcast %119 : vector<32x1xf32> to vector<32x256xf32>
    %121 = arith.addf %118, %120 : vector<32x256xf32>
    %c0_53 = arith.constant 0 : index
    %c0_54 = arith.constant 0 : index
    %c0_55 = arith.constant 0 : index
    %122 = vector.load %arg9[%c0_53, %c0_54, %c0_55] : memref<1x32x256xf32, #tpu.memory_space<vmem>>, vector<1x32x256xf32>
    %123 = vector.shape_cast %122 : vector<1x32x256xf32> to vector<32x256xf32>
    %124 = vector.shape_cast %121 : vector<32x256xf32> to vector<1x32x256xf32>
    tpu.vector_store %arg9[%c0_53, %c0_54, %c0_55], %124 {strides = array<i32>} : memref<1x32x256xf32, #tpu.memory_space<vmem>>, vector<1x32x256xf32>,
    return
  }
  func.func @transform_0(%arg0: i32) -> (i32, i32, i32) {
    %c0_i32 = arith.constant 0 : i32
    %c0_i32_0 = arith.constant 0 : i32
    %c0_i32_1 = arith.constant 0 : i32
    return %arg0, %c0_i32, %c0_i32_0 : i32, i32, i32
  }
  func.func @transform_1(%arg0: i32) -> (i32, i32) {
    %c0_i32 = arith.constant 0 : i32
    %c0_i32_0 = arith.constant 0 : i32
    %c0_i32_1 = arith.constant 0 : i32
    return %c0_i32, %c0_i32_0 : i32, i32
  }
  func.func @transform_2(%arg0: i32) -> (i32, i32) {
    %c0_i32 = arith.constant 0 : i32
    %c0_i32_0 = arith.constant 0 : i32
    %c0_i32_1 = arith.constant 0 : i32
    return %c0_i32, %c0_i32_0 : i32, i32
  }
  func.func @transform_3(%arg0: i32) -> (i32, i32) {
    %c0_i32 = arith.constant 0 : i32
    %c0_i32_0 = arith.constant 0 : i32
    %c0_i32_1 = arith.constant 0 : i32
    return %c0_i32, %c0_i32_0 : i32, i32
  }
  func.func @transform_4(%arg0: i32) -> (i32, i32) {
    %c0_i32 = arith.constant 0 : i32
    %c0_i32_0 = arith.constant 0 : i32
    %c0_i32_1 = arith.constant 0 : i32
    return %c0_i32, %c0_i32_0 : i32, i32
  }
  func.func @transform_5(%arg0: i32) -> (i32, i32) {
    %c0_i32 = arith.constant 0 : i32
    %c0_i32_0 = arith.constant 0 : i32
    %c0_i32_1 = arith.constant 0 : i32
    return %c0_i32, %c0_i32_0 : i32, i32
  }
  func.func @transform_6(%arg0: i32) -> (i32, i32) {
    %c0_i32 = arith.constant 0 : i32
    %c0_i32_0 = arith.constant 0 : i32
    %c0_i32_1 = arith.constant 0 : i32
    return %c0_i32, %c0_i32_0 : i32, i32
  }
  func.func @transform_7(%arg0: i32) -> (i32, i32) {
    %c0_i32 = arith.constant 0 : i32
    %c0_i32_0 = arith.constant 0 : i32
    %c0_i32_1 = arith.constant 0 : i32
    return %c0_i32, %c0_i32_0 : i32, i32
  }
  func.func @transform_8(%arg0: i32) -> (i32, i32, i32) {
    %c0_i32 = arith.constant 0 : i32
    %c0_i32_0 = arith.constant 0 : i32
    %c0_i32_1 = arith.constant 0 : i32
    return %arg0, %c0_i32, %c0_i32_0 : i32, i32, i32
  }
}

</mosaic_0001>

<bundles_post_ra>
// kernel: tpu_custom_call.1
= control target key start
LH: loop header
LB: loop body
LE: loop exit
PB: predicated region body
PF: predicated region fallthrough
CT: control target
= control target key end

     0   :  { %13 = vsyncpa [#allocation3], 0  ;;  %s4836_s0 = inlined_call_operand.vmem [shape: bf16[2,32,256], index: 0, kind: input, shape index: {}]   ;;  %s4837_s1 = inlined_call_operand.vmem [shape: bf16[64,32], index: 1, kind: input, shape index: {}]   ;;  %s4838_s2 = inlined_call_operand.vmem [shape: f32[64,1], index: 2, kind: input, shape index: {}]   ;;  %s4839_s3 = inlined_call_operand.vmem [shape: f32[64,9], index: 3, kind: input, shape index: {}]   ;;  %s4840_s4 = inlined_call_operand.vmem [shape: f32[64,1], index: 4, kind: input, shape index: {}]   ;;  %s4841_s5 = inlined_call_operand.vmem [shape: bf16[32,64], index: 5, kind: input, shape index: {}]   ;;  %s4842_s6 = inlined_call_operand.vmem [shape: f32[32,1], index: 6, kind: input, shape index: {}]   ;;  %s4843_s7 = inlined_call_operand.vmem [shape: f32[9,256], index: 7, kind: input, shape index: {}]   ;;  %s4844_s8 = inlined_call_operand.hbm [shape: f32[2,32,256], index: 8, kind: output, shape index: {}]  }
   0x1   :  { %15 = vsyncpa [#allocation3 + $0x1], 0  ;;  %s2699_s27 = smov 0   ;;  %s2701_s28 = smov 0  }
   0x2   :  { %s2703_s29 = smov 0   ;;  %s2705_s30 = smov 0  }
   0x3 LB: > { %s2720_s9 = sadd.s32 4294967295, %s2633_s30   ;;  %s2362_s10 = sadd.s32 4294967294, %s2633_s30   ;;  %s2633_s30 = sphi %s2705_s30, %s5203_s30   ;;  %s2629_s29 = sphi %s2703_s29, %s5202_s29   ;;  %s2625_s28 = sphi %s2701_s28, %s5201_s28   ;;  %s2621_s27 = sphi %s2699_s27, %s5200_s27  }
   0x4   : > { %s2724_s11 = sadd.s32 1, %s2633_s30   ;;  %s201_s12 = sadd.s32 1, %s2629_s29 }
   0x5   : > { %s198_s13 = ssub.s32 %s2633_s30, %s2724_s11  ;;  %p211_p0 = scmp.ne.s32.totalorder %s2629_s29, %s2625_s28 }
   0x6   : > { %p199_p1 = scmp.eq.s32.totalorder %s198_s13, 0  ;;  %p212_p2 = scmp.eq.s32.totalorder %s2720_s9, 1 }
   0x7   : > { %p217_p3 = scmp.ne.s32.totalorder %s2625_s28, %s2621_s27  ;;  %p218_p4 = scmp.eq.s32.totalorder %s2362_s10, 1 }
   0x8   : > { %s2735_s14 = scalar_select %p199_p1, %s2629_s29, %s201_s12  }
   0x9   : > { %p2737_p5 = por %p212_p2, %p211_p0  ;;  %p2741_p6 = por %p218_p4, %p217_p3 }
   0xa   : > { %p2365_p7 = scmp.ge.s32.totalorder %s2633_s30, 1  ;;  %p265_p8 = scmp.lt.s32.totalorder %s2633_s30, 3 }
   0xc   : > { %p266_p9 = pnand %p2365_p7, %p265_p8 }
   0xe   : > { %269 = sbr.rel (%p266_p9) target bundleno = 1021 (0x3fd), region = 52 }
  0x13   : > { %p299_p10 = scmp.lt.s32.totalorder %s2720_s9, 1  ;;  %v4845_v0 = vmov 0   ;;  %v2636_v1 = vmov 4   ;;  %v2755_v2 = vld [vmem:[%s4839_s3] sm:$0xff]  ;;  %v2764_v3 = vld [vmem:[%s4839_s3 + $0x18] sm:$0xff]  ;;  %v319_v8 = vld [vmem:[%s4838_s2 + $0x10] sm:$0xff] }
  0x14   : > { %450 = vmatprep.mubr.bf16.mxu0 %v4845_v0  ;;  %2456 = vset.pattern.permute.xlu1 %v4845_v0  ;;  %v2773_v9 = vld [vmem:[%s4839_s3 + $0x28] sm:$0xff]  ;;  %v320_v10 = vld [vmem:[%s4838_s2 + $0x18] sm:$0xff]  ;;  %v2500_v11 = vld [vmem:[%s4837_s1] sm:$0xff]   ;;  %vm405_vm0 = vcmask 261120   ;;  %v2637_v26 = vmov 1   ;;  %v2638_v27 = vmov 2  }
  0x15   : > { %s300_s17 = scalar_select %p299_p10, %s2720_s9, 1  ;;  %2257 = vmatprep.mubr.bf16.mxu1 %v4845_v0  ;;  %2457 = vset.pattern.permute.xlu0 %v2636_v1  ;;  %v2785_v12 = vld [vmem:[%s4839_s3 + $0x38] sm:$0xff]  ;;  %v322_v13 = vld [vmem:[%s4838_s2 + $0x28] sm:$0xff]  ;;  %v317_v14 = vld [vmem:[%s4838_s2] sm:$0xff]  ;;  %v4853_v28 = vmov 3   ;;  %v4849_v29 = vmov 5  }
  0x16   : > { %501 = vperm.xlu0 %2457, %v2755_v2   ;;  %337 = vperm.xlu1 %2456, %v319_v8   ;;  %v324_v15 = vld [vmem:[%s4838_s2 + $0x38] sm:$0xff]  ;;  %v2501_v16 = vld [vmem:[%s4837_s1 + $0x8] sm:$0xff]   ;;  %v321_v19 = vld [vmem:[%s4838_s2 + $0x20] sm:$0xff]  ;;  %v4851_v30 = vmov 6   ;;  %s2643_s24 = smov 17   ;;  %s2644_s25 = smov 1  }
  0x17   : > { %s2397_s18 = sshll.u32 %s300_s17, 5  ;;  %v318_v17 = vld [vmem:[%s4838_s2 + $0x8] sm:$0xff]  ;;  %v2502_v20 = vld [vmem:[%s4837_s1 + $0x10] sm:$0xff]   ;;  %v2834_v23 = vld [vmem:[%s4839_s3 + $0x20] sm:$0xff]  ;;  %s2645_s26 = smov 15   ;;  %v4847_v54 = vmov 7  }
  0x18   : > { %s303_s23 = scalar_lea.vmem %s4836_s0, %s2397_s18  ;;  %v2811_v18 = vld [vmem:[%s4839_s3 + $0x8] sm:$0xff]  ;;  %v2823_v21 = vld [vmem:[%s4839_s3 + $0x10] sm:$0xff]  ;;  %v2503_v24 = vld [vmem:[%s4837_s1 + $0x18] sm:$0xff]   ;;  %s2647_s10 = smov 127  }
  0x19   : > { %v2494_v4 = vld [vmem:[%s303_s23 + $0x14] ss:$8 sps:$4 sm:$0xff]   ;;  %v2496_v5 = vld [vmem:[%s303_s23 + $0x10] ss:$8 sps:$4 sm:$0xff]   ;;  %v2497_v6 = vld [vmem:[%s303_s23 + $0x4] ss:$8 sps:$4 sm:$0xff]  }
  0x1a   : > { %430 = vmatprep.subr.bf16.mxu0 %v2494_v4  ;;  %v2499_v7 = vld [vmem:[%s303_s23] ss:$8 sps:$4 sm:$0xff]   ;;  %516 = vperm.xlu0 %2457, %v2764_v3   ;;  %v323_v22 = vld [vmem:[%s4838_s2 + $0x30] sm:$0xff]  ;;  %s2642_s23 = smov 16   ;;  %s2648_s12 = smov 113  }
  0x1b   : > { %431 = vmatpush1.bf16.msra.mxu0 %v2496_v5  ;;  %342 = vperm.xlu1 %2456, %v320_v10   ;;  %v2844_v25 = vld [vmem:[%s4839_s3 + $0x30] sm:$0xff]  ;;  %s2649_s13 = smov 112   ;;  %s2650_s17 = smov 111  }
  0x1c   : > { %432 = vmatprep.subr.bf16.mxu0 %v2497_v6  ;;  %s2398_s22 = sshll.u32 %s2720_s9, 10  ;;  %s2652_s18 = smov [#allocation2]  }
  0x1d   : > { %s2577_s19 = sshll.u32 %s2652_s18, 4  ;;  %s2578_s19 = int_to_ptr.vmem [resolvable:$false] %s2577_s19 }
  0x1e   : > { %526 = vperm.xlu0 %2457, %v2773_v9   ;;  %s2579_s20 = scalar_lea.vmem %s2578_s19, 2048 }
  0x1f   : > { %433 = vmatpush1.bf16.msra.mxu0 %v2499_v7  ;;  %352 = vperm.xlu1 %2456, %v322_v13  }
  0x22   : > { %2377 = vmatmul.mubr.msk.bf16.vlgmr.msra.gmra.mxu0 %vm405_vm0, %v2500_v11  ;;  %536 = vperm.xlu0 %2457, %v2785_v12  }
  0x23   : > { %460 = vmatprep.mubr.bf16.mxu0 %v4845_v0  ;;  %362 = vperm.xlu1 %2456, %v324_v15  }
  0x26   : > { %2459 = vset.pattern.permute.xlu0 %v4845_v0 }
  0x27   : > { %327 = vperm.xlu0 %2459, %v317_v14   ;;  %2458 = vset.pattern.permute.xlu1 %v2636_v1 }
  0x28   : > { %506 = vperm.xlu1 %2458, %v2811_v18  }
  0x2a   : > { %2378 = vmatmul.mubr.msk.bf16.gmra.mxu0 %vm405_vm0, %v2501_v16 }
  0x2b   : > { %470 = vmatprep.mubr.bf16.mxu0 %v4845_v0  ;;  %332 = vperm.xlu0 %2459, %v318_v17  }
  0x2c   : > { %511 = vperm.xlu1 %2458, %v2823_v21  }
  0x2f   : > { %347 = vperm.xlu0 %2459, %v321_v19  }
  0x30   : > { %521 = vperm.xlu1 %2458, %v2834_v23  }
  0x32   : > { %2379 = vmatmul.mubr.msk.bf16.gmra.mxu0 %vm405_vm0, %v2502_v20 }
  0x33   : > { %480 = vmatprep.mubr.bf16.mxu0 %v4845_v0  ;;  %357 = vperm.xlu0 %2459, %v323_v22  }
  0x34   : > { %531 = vperm.xlu1 %2458, %v2844_v25  }
  0x37   : > { %639 = vperm.xlu0 %2459, %v2811_v18  }
  0x38   : > { %2460 = vset.pattern.permute.xlu1 %v4845_v0 }
  0x39   : > { %635 = vperm.xlu1 %2460, %v2755_v2  }
  0x3a   : > { %2380 = vmatmul.mubr.msk.bf16.gmra.mxu0 %vm405_vm0, %v2503_v24 }
  0x3b   : > { %651 = vperm.xlu0 %2459, %v2834_v23  }
  0x3d   : > { %643 = vperm.xlu1 %2460, %v2823_v21  }
  0x3f   : > { %659 = vperm.xlu0 %2459, %v2844_v25  }
  0x41   : > { %647 = vperm.xlu1 %2460, %v2764_v3  }
  0x43   : > { %2461 = vset.pattern.permute.xlu0 %v2637_v26 }
  0x44   : > { %777 = vperm.xlu0 %2461, %v2755_v2  }
  0x45   : > { %655 = vperm.xlu1 %2460, %v2773_v9  }
  0x48   : > { %789 = vperm.xlu0 %2461, %v2764_v3  }
  0x49   : > { %663 = vperm.xlu1 %2460, %v2785_v12  }
  0x4c   : > { %797 = vperm.xlu0 %2461, %v2773_v9  }
  0x4d   : > { %2462 = vset.pattern.permute.xlu1 %v2637_v26 }
  0x4e   : > { %781 = vperm.xlu1 %2462, %v2811_v18  }
  0x50   : > { %805 = vperm.xlu0 %2461, %v2785_v12  }
  0x52   : > { %785 = vperm.xlu1 %2462, %v2823_v21  }
  0x54   : > { %2464 = vset.pattern.permute.xlu0 %v2638_v27 }
  0x55   : > { %923 = vperm.xlu0 %2464, %v2811_v18  }
  0x56   : > { %793 = vperm.xlu1 %2462, %v2834_v23  }
  0x59   : > { %935 = vperm.xlu0 %2464, %v2834_v23  }
  0x5a   : > { %801 = vperm.xlu1 %2462, %v2844_v25  }
  0x5d   : > { %943 = vperm.xlu0 %2464, %v2844_v25  }
  0x5e   : > { %2463 = vset.pattern.permute.xlu1 %v2638_v27 }
  0x5f   : > { %919 = vperm.xlu1 %2463, %v2755_v2  }
  0x61   : > { %2465 = vset.pattern.permute.xlu0 %v4853_v28 }
  0x62   : > { %1085 = vperm.xlu0 %2465, %v2844_v25  }
  0x63   : > { %927 = vperm.xlu1 %2463, %v2823_v21  }
  0x67   : > { %931 = vperm.xlu1 %2463, %v2764_v3  }
  0x6b   : > { %939 = vperm.xlu1 %2463, %v2773_v9  }
  0x6f   : > { %947 = vperm.xlu1 %2463, %v2785_v12  }
  0x73   : > { %2466 = vset.pattern.permute.xlu1 %v4853_v28 }
  0x74   : > { %1089 = vperm.xlu1 %2466, %v2785_v12  }
  0x78   : > { %2467 = vset.pattern.permute.xlu1 %v4849_v29 }
  0x79   : > { %1227 = vperm.xlu1 %2467, %v2844_v25  }
  0x7d   : > { %2468 = vset.pattern.permute.xlu1 %v4853_v28 }
  0x7e   : > { %1077 = vperm.xlu1 %2468, %v2834_v23  }
  0x82   : > { %1081 = vperm.xlu1 %2468, %v2773_v9  }
  0x86   : > { %2469 = vset.pattern.permute.xlu1 %v4851_v30 }
  0x87   : > { %1373 = vperm.xlu1 %2469, %v2785_v12  }
  0x8b   : > { %2470 = vset.pattern.permute.xlu1 %v4849_v29 }
  0x8c   : > { %1219 = vperm.xlu1 %2470, %v2834_v23  }
  0x90   : > { %2471 = vset.pattern.permute.xlu1 %v4847_v54 }
  0x91   : > { %v338_v31 = vpop.permute.xlu1 %337  ;;  %v2891_v35 = vpop.permute.xlu0 %501 }
  0x92   : > { %4971 = vst [vmem:[#allocation5_spill] sm:$0xff] %v2891_v35  ;;  %v5029_v35 = vmov 6  }
  0x95   : > { %v2895_v37 = vpop.permute.xlu0 %516 }
  0x96   : > { %v2885_v32 = vpop.permute.xlu1 %342  ;;  %4973 = vst [vmem:[#allocation7_spill] sm:$0xff] %v2895_v37  ;;  %v5062_v37 = vmov 8  }
  0x99   : > { %v2899_v39 = vpop.permute.xlu0 %526 }
  0x9a   : > { %v2887_v33 = vpop.permute.xlu1 %352 }
  0x9d   : > { %v2903_v41 = vpop.permute.xlu0 %536 }
  0x9e   : > { %v2889_v34 = vpop.permute.xlu1 %362 }
  0xa2   : > { %v328_v43 = vpop.permute.xlu0 %327 }
  0xa3   : > { %v2893_v36 = vpop.permute.xlu1 %506 }
  0xa4   : > { %4972 = vst [vmem:[#allocation6_spill] sm:$0xff] %v2893_v36 }
  0xa6   : > { %v333_v51 = vpop.permute.xlu0 %332 }
  0xa7   : > { %v2897_v38 = vpop.permute.xlu1 %511 }
  0xa8   : > { %4974 = vst [vmem:[#allocation8_spill] sm:$0xff] %v2897_v38 }
  0xaa   : > { %v348_v5 = vpop.permute.xlu0 %347 }
  0xab   : > { %v2901_v40 = vpop.permute.xlu1 %521 }
  0xac   : > { %4975 = vst [vmem:[#allocation9_spill] sm:$0xff] %v2901_v40 }
  0xae   : > { %v358_v10 = vpop.permute.xlu0 %357 }
  0xaf   : > { %v2905_v42 = vpop.permute.xlu1 %531 }
  0xb0   : > { %4976 = vst [vmem:[#allocation10_spill] sm:$0xff] %v2905_v42 }
  0xb2   : > { %v2996_v14 = vpop.permute.xlu0 %639 }
  0xb3   : > { %4986 = vst [vmem:[#allocation20_spill] sm:$0xff] %v2996_v14 }
  0xb4   : > { %v2909_v46 = vpop.permute.xlu1 %635 }
  0xb5   : > { %4977 = vst [vmem:[#allocation11_spill] sm:$0xff] %v2909_v46 }
  0xb6   : > { %v3006_v19 = vpop.permute.xlu0 %651 }
  0xb7   : > { %4988 = vst [vmem:[#allocation22_spill] sm:$0xff] %v3006_v19 }
  0xb8   : > { %v2919_v48 = vpop.permute.xlu1 %643 }
  0xb9   : > { %4978 = vst [vmem:[#allocation12_spill] sm:$0xff] %v2919_v48 }
  0xba   : > { %v3018_v24 = vpop.permute.xlu0 %659 }
  0xbb   : > { %4990 = vst [vmem:[#allocation24_spill] sm:$0xff] %v3018_v24 }
  0xbc   : > { %v2929_v53 = vpop.permute.xlu1 %647 }
  0xbd   : > { %4981 = vst [vmem:[#allocation15_spill] sm:$0xff] %v2929_v53 }
  0xc0   : > { %v2940_v56 = vpop.permute.xlu1 %655 }
  0xc4   : > { %v2948_v58 = vpop.permute.xlu1 %663 }
  0xc9   : > { %v2956_v61 = vpop.permute.xlu1 %781 }
  0xca   : > { %4982 = vst [vmem:[#allocation16_spill] sm:$0xff] %v2956_v61 }
  0xcd   : > { %v2966_v63 = vpop.permute.xlu1 %785 }
  0xce   : > { %4983 = vst [vmem:[#allocation17_spill] sm:$0xff] %v2966_v63 }
  0xd1   : > { %v2977_v7 = vpop.permute.xlu1 %793 }
  0xd2   : > { %4984 = vst [vmem:[#allocation18_spill] sm:$0xff] %v2977_v7 }
  0xd5   : > { %v2987_v11 = vpop.permute.xlu1 %801 }
  0xd6   : > { %4985 = vst [vmem:[#allocation19_spill] sm:$0xff] %v2987_v11 }
  0xda   : > { %v2998_v15 = vpop.permute.xlu1 %919 }
  0xdb   : > { %4987 = vst [vmem:[#allocation21_spill] sm:$0xff] %v2998_v15 }
  0xde   : > { %v3012_v20 = vpop.permute.xlu1 %927 }
  0xdf   : > { %4989 = vst [vmem:[#allocation23_spill] sm:$0xff] %v3012_v20 }
  0xe2   : > { %v452_v44 = vpop.f32.mrf.mxu0  ;;  %v3022_v27 = vpop.permute.xlu1 %931 }
  0xe3   : > { %v2907_v45 = vadd.f32 %v452_v44, %v328_v43  ;;  %4992 = vst [vmem:[#allocation26_spill] sm:$0xff] %v3022_v27 }
  0xe4   : > { %v454_v47 = vpop.f32.mrf.mxu0 }
  0xe5   : > { %698 = vrot.lane.b32.xlu0 %v2907_v45, %s2642_s23  ;;  %555 = vrot.lane.b32.xlu1 %v2907_v45, %s2643_s24  ;;  %v2921_v49 = vadd.f32 %v454_v47, %v328_v43  ;;  %v3031_v43 = vpop.permute.xlu0 %777 }
  0xe6   : > { %v456_v50 = vpop.f32.mrf.mxu0  ;;  %4993 = vst [vmem:[#allocation27_spill] sm:$0xff] %v3031_v43  ;;  %v3037_v44 = vpop.permute.xlu1 %939 }
  0xe7   : > { %4979 = vst [vmem:[#allocation13_spill] sm:$0xff] %v2921_v49  ;;  %v2927_v52 = vadd.f32 %v456_v50, %v333_v51  ;;  %4994 = vst [vmem:[#allocation28_spill] sm:$0xff] %v3037_v44 }
  0xe8   : > { %v458_v55 = vpop.f32.mrf.mxu0 }
  0xe9   : > { %982 = vrot.lane.b32.xlu0 %v2907_v45, %s2644_s25  ;;  %840 = vrot.lane.b32.xlu1 %v2907_v45, %s2645_s26  ;;  %4980 = vst [vmem:[#allocation14_spill] sm:$0xff] %v2927_v52  ;;  %v2942_v57 = vadd.f32 %v458_v55, %v333_v51  ;;  %v3043_v50 = vpop.permute.xlu0 %789 }
  0xea   : > { %v462_v59 = vpop.f32.mrf.mxu0  ;;  %4995 = vst [vmem:[#allocation29_spill] sm:$0xff] %v3043_v50  ;;  %v3048_v55 = vpop.permute.xlu1 %947 }
  0xeb   : > { %v2954_v60 = vadd.f32 %v462_v59, %v338_v31 }
  0xec   : > { %v464_v62 = vpop.f32.mrf.mxu0 }
  0xed   : > { %714 = vrot.lane.b32.xlu0 %v2921_v49, %s2642_s23  ;;  %571 = vrot.lane.b32.xlu1 %v2921_v49, %s2643_s24  ;;  %v2968_v1 = vadd.f32 %v464_v62, %v338_v31  ;;  %v3056_v62 = vpop.permute.xlu0 %797 }
  0xee   : > { %v466_v4 = vpop.f32.mrf.mxu0  ;;  %4996 = vst [vmem:[#allocation30_spill] sm:$0xff] %v3056_v62 }
  0xef   : > { %v2975_v6 = vadd.f32 %v466_v4, %v2885_v32  ;;  %v3054_v59 = vpop.permute.xlu1 %1089 }
  0xf0   : > { %v468_v8 = vpop.f32.mrf.mxu0 }
  0xf1   : > { %557 = vrot.lane.b32.xlu0 %v2927_v52, %s2643_s24  ;;  %856 = vrot.lane.b32.xlu1 %v2921_v49, %s2645_s26  ;;  %v2990_v13 = vadd.f32 %v468_v8, %v2885_v32 }
  0xf2   : > { %v472_v16 = vpop.f32.mrf.mxu0 }
  0xf3   : > { %v3004_v17 = vadd.f32 %v472_v16, %v348_v5 }
  0xf4   : > { %v474_v22 = vpop.f32.mrf.mxu0  ;;  %v3066_v4 = vpop.permute.xlu1 %1227 }
  0xf5   : > { %842 = vrot.lane.b32.xlu0 %v2927_v52, %s2645_s26  ;;  %700 = vrot.lane.b32.xlu1 %v2927_v52, %s2642_s23  ;;  %v3020_v26 = vadd.f32 %v474_v22, %v348_v5  ;;  %4997 = vst [vmem:[#allocation31_spill] sm:$0xff] %v3066_v4  ;;  %v3068_v5 = vpop.permute.xlu0 %805 }
  0xf6   : > { %v476_v31 = vpop.f32.mrf.mxu0 }
  0xf7   : > { %4991 = vst [vmem:[#allocation25_spill] sm:$0xff] %v3020_v26  ;;  %v3029_v32 = vadd.f32 %v476_v31, %v2887_v33 }
  0xf8   : > { %v478_v47 = vpop.f32.mrf.mxu0 }
  0xf9   : > { %573 = vrot.lane.b32.xlu0 %v2942_v57, %s2643_s24  ;;  %984 = vrot.lane.b32.xlu1 %v2927_v52, %s2644_s25  ;;  %v3046_v51 = vadd.f32 %v478_v47, %v2887_v33  ;;  %v3076_v16 = vpop.permute.xlu1 %1077  ;;  %v3078_v22 = vpop.permute.xlu0 %923 }
  0xfa   : > { %v482_v33 = vpop.f32.mrf.mxu0  ;;  %4999 = vst [vmem:[#allocation33_spill] sm:$0xff] %v3076_v16  ;;  %5000 = vst [vmem:[#allocation34_spill] sm:$0xff] %v3078_v22 }
  0xfb   : > { %v3070_v8 = vadd.f32 %v482_v33, %v358_v10 }
  0xfc   : > { %v484_v31 = vpop.f32.mrf.mxu0 }
  0xfd   : > { %858 = vrot.lane.b32.xlu0 %v2942_v57, %s2645_s26  ;;  %716 = vrot.lane.b32.xlu1 %v2942_v57, %s2642_s23  ;;  %4998 = vst [vmem:[#allocation32_spill] sm:$0xff] %v3070_v8  ;;  %v3084_v47 = vadd.f32 %v484_v31, %v358_v10  ;;  %v3090_v33 = vpop.permute.xlu1 %1081  ;;  %v3092_v0 = vpop.permute.xlu0 %935 }
  0xfe   : > { %5002 = vst [vmem:[#allocation36_spill] sm:$0xff] %v3090_v33  ;;  %5003 = vst [vmem:[#allocation37_spill] sm:$0xff] %v3092_v0  ;;  %v486_v54 = vpop.f32.mrf.mxu0  ;;  %v5046_v0 = vmov 7   ;;  %v2381_v33 = vld [vmem:[%s4843_s7 + $0x1] ss:$8 sm:$0x3] }
  0xff   : > { %5001 = vst [vmem:[#allocation35_spill] sm:$0xff] %v3084_v47  ;;  %v3099_v10 = vadd.f32 %v486_v54, %v2889_v34 }
 0x100   : > { %v488_v28 = vpop.f32.mrf.mxu0 }
 0x101   : > { %702 = vrot.lane.b32.xlu0 %v2954_v60, %s2642_s23  ;;  %559 = vrot.lane.b32.xlu1 %v2954_v60, %s2643_s24  ;;  %v3103_v29 = vpop.permute.xlu0 %943  ;;  %v3122_v22 = vadd.f32 %v488_v28, %v2889_v34 }
 0x102   : > { %v3101_v31 = vpop.permute.xlu1 %1373  ;;  %5005 = vst [vmem:[#allocation39_spill] sm:$0xff] %v3103_v29 }
 0x103   : > { %5004 = vst [vmem:[#allocation38_spill] sm:$0xff] %v3101_v31 }
 0x105   : > { %986 = vrot.lane.b32.xlu0 %v2954_v60, %s2644_s25  ;;  %844 = vrot.lane.b32.xlu1 %v2954_v60, %s2645_s26  ;;  %v3115_v54 = vpop.permute.xlu0 %1085 }
 0x106   : > { %5007 = vst [vmem:[#allocation41_spill] sm:$0xff] %v3115_v54 }
 0x107   : > { %v3113_v30 = vpop.permute.xlu1 %1219 }
 0x108   : > { %5006 = vst [vmem:[#allocation40_spill] sm:$0xff] %v3113_v30 }
 0x109   : > { %718 = vrot.lane.b32.xlu0 %v2968_v1, %s2642_s23  ;;  %575 = vrot.lane.b32.xlu1 %v2968_v1, %s2643_s24 }
 0x10d   : > { %561 = vrot.lane.b32.xlu0 %v2975_v6, %s2643_s24  ;;  %860 = vrot.lane.b32.xlu1 %v2968_v1, %s2645_s26 }
 0x111   : > { %846 = vrot.lane.b32.xlu0 %v2975_v6, %s2645_s26  ;;  %704 = vrot.lane.b32.xlu1 %v2975_v6, %s2642_s23 }
 0x115   : > { %577 = vrot.lane.b32.xlu0 %v2990_v13, %s2643_s24  ;;  %988 = vrot.lane.b32.xlu1 %v2975_v6, %s2644_s25 }
 0x119   : > { %862 = vrot.lane.b32.xlu0 %v2990_v13, %s2645_s26  ;;  %720 = vrot.lane.b32.xlu1 %v2990_v13, %s2642_s23 }
 0x11d   : > { %706 = vrot.lane.b32.xlu0 %v3004_v17, %s2642_s23  ;;  %563 = vrot.lane.b32.xlu1 %v3004_v17, %s2643_s24 }
 0x121   : > { %990 = vrot.lane.b32.xlu0 %v3004_v17, %s2644_s25  ;;  %848 = vrot.lane.b32.xlu1 %v3004_v17, %s2645_s26 }
 0x125   : > { %722 = vrot.lane.b32.xlu0 %v3020_v26, %s2642_s23  ;;  %579 = vrot.lane.b32.xlu1 %v3020_v26, %s2643_s24 }
 0x129   : > { %565 = vrot.lane.b32.xlu0 %v3029_v32, %s2643_s24  ;;  %864 = vrot.lane.b32.xlu1 %v3020_v26, %s2645_s26 }
 0x12d   : > { %850 = vrot.lane.b32.xlu0 %v3029_v32, %s2645_s26  ;;  %1006 = vrot.lane.b32.xlu1 %v3020_v26, %s2644_s25 }
 0x131   : > { %581 = vrot.lane.b32.xlu0 %v3046_v51, %s2643_s24  ;;  %708 = vrot.lane.b32.xlu1 %v3029_v32, %s2642_s23 }
 0x135   : > { %866 = vrot.lane.b32.xlu0 %v3046_v51, %s2645_s26  ;;  %992 = vrot.lane.b32.xlu1 %v3029_v32, %s2644_s25 }
 0x139   : > { %1008 = vrot.lane.b32.xlu0 %v3046_v51, %s2644_s25  ;;  %724 = vrot.lane.b32.xlu1 %v3046_v51, %s2642_s23 }
 0x13d   : > { %710 = vrot.lane.b32.xlu0 %v3070_v8, %s2642_s23  ;;  %567 = vrot.lane.b32.xlu1 %v3070_v8, %s2643_s24 }
 0x141   : > { %1136 = vrot.lane.b32.xlu0 %v3070_v8, %s2647_s10  ;;  %852 = vrot.lane.b32.xlu1 %v3070_v8, %s2645_s26 }
 0x145   : > { %726 = vrot.lane.b32.xlu0 %v3084_v47, %s2642_s23  ;;  %994 = vrot.lane.b32.xlu1 %v3070_v8, %s2644_s25 }
 0x149   : > { %1152 = vrot.lane.b32.xlu0 %v3084_v47, %s2647_s10  ;;  %1278 = vrot.lane.b32.xlu1 %v3070_v8, %s2648_s12 }
 0x14d   : > { %569 = vrot.lane.b32.xlu0 %v3099_v10, %s2643_s24  ;;  %583 = vrot.lane.b32.xlu1 %v3084_v47, %s2643_s24 }
 0x151   : > { %854 = vrot.lane.b32.xlu0 %v3099_v10, %s2645_s26  ;;  %868 = vrot.lane.b32.xlu1 %v3084_v47, %s2645_s26 }
 0x155   : > { %996 = vrot.lane.b32.xlu0 %v3099_v10, %s2644_s25  ;;  %1010 = vrot.lane.b32.xlu1 %v3084_v47, %s2644_s25 }
 0x157   : > { %v3124_v61 = vpop.permute.xlu0 %698  ;;  %v3126_v14 = vpop.permute.xlu1 %555 }
 0x158   : > { %5008 = vst [vmem:[#allocation42_spill] sm:$0xff] %v3124_v61  ;;  %5009 = vst [vmem:[#allocation43_spill] sm:$0xff] %v3126_v14  ;;  %v4890_v61 = vmov 8  }
 0x159   : > { %585 = vrot.lane.b32.xlu0 %v3122_v22, %s2643_s24  ;;  %712 = vrot.lane.b32.xlu1 %v3099_v10, %s2642_s23 }
 0x15b   : > { %v3132_v36 = vpop.permute.xlu0 %982  ;;  %v3134_v20 = vpop.permute.xlu1 %840 }
 0x15c   : > { %5010 = vst [vmem:[#allocation44_spill] sm:$0xff] %v3132_v36  ;;  %5011 = vst [vmem:[#allocation45_spill] sm:$0xff] %v3134_v20 }
 0x15d   : > { %870 = vrot.lane.b32.xlu0 %v3122_v22, %s2645_s26  ;;  %1138 = vrot.lane.b32.xlu1 %v3099_v10, %s2647_s10  ;;  %s4789_s26 = scalar_lea.hbm %s4844_s8, %s2398_s22 }
 0x15f   : > { %v3140_v28 = vpop.permute.xlu0 %714  ;;  %v3142_v34 = vpop.permute.xlu1 %571 }
 0x160   : > { %5012 = vst [vmem:[#allocation46_spill] sm:$0xff] %v3140_v28  ;;  %5013 = vst [vmem:[#allocation47_spill] sm:$0xff] %v3142_v34 }
 0x161   : > { %1012 = vrot.lane.b32.xlu0 %v3122_v22, %s2644_s25  ;;  %728 = vrot.lane.b32.xlu1 %v3122_v22, %s2642_s23 }
 0x163   : > { %v3148_v63 = vpop.permute.xlu0 %557  ;;  %v3150_v36 = vpop.permute.xlu1 %856 }
 0x164   : > { %5014 = vst [vmem:[#allocation48_spill] sm:$0xff] %v3148_v63  ;;  %5015 = vst [vmem:[#allocation49_spill] sm:$0xff] %v3150_v36 }
 0x165   : > { %1294 = vrot.lane.b32.xlu0 %v3084_v47, %s2648_s12  ;;  %1154 = vrot.lane.b32.xlu1 %v3122_v22, %s2647_s10 }
 0x167   : > { %v3156_v38 = vpop.permute.xlu0 %842  ;;  %v3158_v48 = vpop.permute.xlu1 %700 }
 0x168   : > { %5016 = vst [vmem:[#allocation50_spill] sm:$0xff] %v3156_v38  ;;  %5017 = vst [vmem:[#allocation51_spill] sm:$0xff] %v3158_v48 }
 0x169   : > { %1073 = vperm.xlu0 %2465, %v2764_v3   ;;  %1280 = vrot.lane.b32.xlu1 %v3099_v10, %s2648_s12 }
 0x16b   : > { %v3163_v15 = vpop.permute.xlu0 %573  ;;  %v3165_v63 = vpop.permute.xlu1 %984 }
 0x16c   : > { %5018 = vst [vmem:[#allocation52_spill] sm:$0xff] %v3163_v15  ;;  %5019 = vst [vmem:[#allocation53_spill] sm:$0xff] %v3165_v63  ;;  %v5024_v63 = vmov 3  }
 0x16d   : > { %1148 = vrot.lane.b32.xlu0 %v3020_v26, %s2647_s10  ;;  %1296 = vrot.lane.b32.xlu1 %v3122_v22, %s2648_s12 }
 0x16f   : > { %v3171_v43 = vpop.permute.xlu0 %858  ;;  %v3173_v38 = vpop.permute.xlu1 %716 }
 0x170   : > { %5020 = vst [vmem:[#allocation54_spill] sm:$0xff] %v3171_v43  ;;  %5021 = vst [vmem:[#allocation55_spill] sm:$0xff] %v3173_v38 }
 0x171   : > { %1422 = vrot.lane.b32.xlu0 %v3099_v10, %s2649_s13  ;;  %1515 = vperm.xlu1 %2471, %v2785_v12  }
 0x173   : > { %v3178_v48 = vpop.permute.xlu0 %702  ;;  %v3180_v15 = vpop.permute.xlu1 %559 }
 0x174   : > { %5022 = vst [vmem:[#allocation56_spill] sm:$0xff] %v3178_v48  ;;  %5023 = vst [vmem:[#allocation57_spill] sm:$0xff] %v3180_v15 }
 0x175   : > { %1438 = vrot.lane.b32.xlu0 %v3122_v22, %s2649_s13  ;;  %2472 = vset.pattern.permute.xlu1 %v5024_v63 }
 0x176   : > { %1069 = vperm.xlu1 %2472, %v2823_v21  }
 0x177   : > { %v3186_v43 = vpop.permute.xlu0 %986  ;;  %v3188_v38 = vpop.permute.xlu1 %844 }
 0x178   : > { %5025 = vst [vmem:[#allocation58_spill] sm:$0xff] %v3186_v43  ;;  %5026 = vst [vmem:[#allocation59_spill] sm:$0xff] %v3188_v38 }
 0x179   : > { %1276 = vrot.lane.b32.xlu0 %v3029_v32, %s2648_s12 }
 0x17a   : > { %1132 = vrot.lane.b32.xlu1 %v3004_v17, %s2647_s10 }
 0x17b   : > { %v3194_v48 = vpop.permute.xlu0 %718  ;;  %v3196_v15 = vpop.permute.xlu1 %575  ;;  %2473 = vset.pattern.permute.xlu1 %v5029_v35 }
 0x17c   : > { %5027 = vst [vmem:[#allocation60_spill] sm:$0xff] %v3194_v48  ;;  %5028 = vst [vmem:[#allocation61_spill] sm:$0xff] %v3196_v15 }
 0x17d   : > { %1292 = vrot.lane.b32.xlu0 %v3046_v51, %s2648_s12 }
 0x17e   : > { %1134 = vrot.lane.b32.xlu1 %v3029_v32, %s2647_s10 }
 0x17f   : > { %v3203_v43 = vpop.permute.xlu0 %561  ;;  %v3205_v38 = vpop.permute.xlu1 %860 }
 0x180   : > { %5030 = vst [vmem:[#allocation62_spill] sm:$0xff] %v3205_v38  ;;  %v5034_v38 = vmov 5  }
 0x181   : > { %1578 = vrot.lane.b32.xlu0 %v3084_v47, %s2650_s17 }
 0x182   : > { %1150 = vrot.lane.b32.xlu1 %v3046_v51, %s2647_s10 }
 0x183   : > { %v3211_v48 = vpop.permute.xlu0 %846  ;;  %v3213_v15 = vpop.permute.xlu1 %704 }
 0x184   : > { %5031 = vst [vmem:[#allocation63_spill] sm:$0xff] %v3211_v48  ;;  %5032 = vst [vmem:[#allocation64_spill] sm:$0xff] %v3213_v15  ;;  %v553_v15 = vmul.f32 %v2903_v41, %v3099_v10 }
 0x185   : > { %1061 = vperm.xlu0 %2465, %v2755_v2  }
 0x186   : > { %1365 = vperm.xlu1 %2473, %v2773_v9  }
 0x187   : > { %v3217_v36 = vpop.permute.xlu0 %577  ;;  %v3219_v20 = vpop.permute.xlu1 %988 }
 0x188   : > { %5033 = vst [vmem:[#allocation65_spill] sm:$0xff] %v3219_v20 }
 0x189   : > { %2477 = vset.pattern.permute.xlu0 %v5034_v38 }
 0x18a   : > { %1231 = vperm.xlu0 %2477, %v2785_v12   ;;  %1420 = vrot.lane.b32.xlu1 %v3070_v8, %s2649_s13 }
 0x18b   : > { %v3225_v46 = vpop.permute.xlu0 %862  ;;  %v3227_v28 = vpop.permute.xlu1 %720  ;;  %2474 = vset.pattern.permute.xlu1 %v4890_v61 }
 0x18c   : > { %5035 = vst [vmem:[#allocation66_spill] sm:$0xff] %v3225_v46  ;;  %5036 = vst [vmem:[#allocation67_spill] sm:$0xff] %v3227_v28 }
 0x18e   : > { %1223 = vperm.xlu0 %2477, %v2773_v9   ;;  %1436 = vrot.lane.b32.xlu1 %v3084_v47, %s2649_s13 }
 0x18f   : > { %v3233_v14 = vpop.permute.xlu0 %706  ;;  %v3235_v34 = vpop.permute.xlu1 %563 }
 0x190   : > { %5037 = vst [vmem:[#allocation68_spill] sm:$0xff] %v3233_v14  ;;  %5038 = vst [vmem:[#allocation69_spill] sm:$0xff] %v3235_v34  ;;  %v2382_v34 = vld [vmem:[%s4843_s7 + $0x2] ss:$8 sm:$0x3] }
 0x192   : > { %1211 = vperm.xlu0 %2477, %v2823_v21   ;;  %1653 = vperm.xlu1 %2474, %v2844_v25  }
 0x193   : > { %v3239_v4 = vpop.permute.xlu0 %990  ;;  %v3241_v54 = vpop.permute.xlu1 %848 }
 0x194   : > { %5039 = vst [vmem:[#allocation70_spill] sm:$0xff] %v3239_v4  ;;  %5040 = vst [vmem:[#allocation71_spill] sm:$0xff] %v3241_v54 }
 0x196   : > { %1130 = vrot.lane.b32.xlu0 %v2975_v6, %s2647_s10  ;;  %1002 = vrot.lane.b32.xlu1 %v2968_v1, %s2644_s25 }
 0x197   : > { %v3247_v61 = vpop.permute.xlu0 %722  ;;  %v3249_v29 = vpop.permute.xlu1 %579  ;;  %2475 = vset.pattern.permute.xlu1 %v5034_v38 }
 0x198   : > { %5041 = vst [vmem:[#allocation72_spill] sm:$0xff] %v3247_v61  ;;  %5042 = vst [vmem:[#allocation73_spill] sm:$0xff] %v3249_v29 }
 0x19a   : > { %1146 = vrot.lane.b32.xlu0 %v2990_v13, %s2647_s10  ;;  %1004 = vrot.lane.b32.xlu1 %v2990_v13, %s2644_s25 }
 0x19b   : > { %v3256_v11 = vpop.permute.xlu0 %565  ;;  %v3258_v47 = vpop.permute.xlu1 %864 }
 0x19c   : > { %5043 = vst [vmem:[#allocation74_spill] sm:$0xff] %v3258_v47 }
 0x19e   : > { %1432 = vrot.lane.b32.xlu0 %v3020_v26, %s2649_s13  ;;  %1215 = vperm.xlu1 %2475, %v2764_v3  }
 0x19f   : > { %v3263_v42 = vpop.permute.xlu0 %850  ;;  %v3265_v24 = vpop.permute.xlu1 %1006 }
 0x1a0   : > { %5044 = vst [vmem:[#allocation75_spill] sm:$0xff] %v3263_v42  ;;  %5045 = vst [vmem:[#allocation76_spill] sm:$0xff] %v3265_v24 }
 0x1a2   : > { %1203 = vperm.xlu0 %2477, %v2755_v2   ;;  %1274 = vrot.lane.b32.xlu1 %v3004_v17, %s2648_s12 }
 0x1a3   : > { %v3270_v30 = vpop.permute.xlu0 %581  ;;  %v3272_v16 = vpop.permute.xlu1 %708  ;;  %2476 = vset.pattern.permute.xlu1 %v5046_v0 }
 0x1a6   : > { %2482 = vset.pattern.permute.xlu0 %v5029_v35  ;;  %1290 = vrot.lane.b32.xlu1 %v3020_v26, %s2648_s12 }
 0x1a7   : > { %1369 = vperm.xlu0 %2482, %v2844_v25   ;;  %v3279_v4 = vpop.permute.xlu0 %866  ;;  %v3281_v24 = vpop.permute.xlu1 %992 }
 0x1a8   : > { %5047 = vst [vmem:[#allocation77_spill] sm:$0xff] %v3281_v24 }
 0x1aa   : > { %1503 = vperm.xlu1 %2476, %v2834_v23  }
 0x1ab   : > { %1361 = vperm.xlu0 %2482, %v2834_v23   ;;  %v3285_v20 = vpop.permute.xlu0 %1008  ;;  %v3287_v7 = vpop.permute.xlu1 %724 }
 0x1ac   : > { %5048 = vst [vmem:[#allocation78_spill] sm:$0xff] %v3285_v20 }
 0x1ae   : > { %1562 = vrot.lane.b32.xlu1 %v3070_v8, %s2650_s17 }
 0x1af   : > { %v3291_v54 = vpop.permute.xlu0 %710  ;;  %v3293_v47 = vpop.permute.xlu1 %567  ;;  %1357 = vperm.xlu0 %2482, %v2764_v3   ;;  %2478 = vset.pattern.permute.xlu1 %v5024_v63 }
 0x1b0   : > { %5049 = vst [vmem:[#allocation79_spill] sm:$0xff] %v3291_v54  ;;  %5050 = vst [vmem:[#allocation80_spill] sm:$0xff] %v3293_v47 }
 0x1b2   : > { %1564 = vrot.lane.b32.xlu1 %v3099_v10, %s2650_s17 }
 0x1b3   : > { %v3299_v27 = vpop.permute.xlu0 %1136  ;;  %v3301_v40 = vpop.permute.xlu1 %852  ;;  %1272 = vrot.lane.b32.xlu0 %v2975_v6, %s2648_s12 }
 0x1b4   : > { %5051 = vst [vmem:[#allocation81_spill] sm:$0xff] %v3299_v27  ;;  %5052 = vst [vmem:[#allocation82_spill] sm:$0xff] %v3301_v40 }
 0x1b6   : > { %1580 = vrot.lane.b32.xlu1 %v3122_v22, %s2650_s17 }
 0x1b7   : > { %v3307_v8 = vpop.permute.xlu0 %726  ;;  %v3309_v54 = vpop.permute.xlu1 %994  ;;  %1288 = vrot.lane.b32.xlu0 %v2990_v13, %s2648_s12 }
 0x1b8   : > { %5053 = vst [vmem:[#allocation83_spill] sm:$0xff] %v3307_v8  ;;  %5054 = vst [vmem:[#allocation84_spill] sm:$0xff] %v3309_v54  ;;  %v587_v54 = vlaneseq }
 0x1ba   : > { %1065 = vperm.xlu1 %2478, %v2811_v18  }
 0x1bb   : > { %v3314_v63 = vpop.permute.xlu0 %1152  ;;  %v3316_v27 = vpop.permute.xlu1 %1278  ;;  %1574 = vrot.lane.b32.xlu0 %v3020_v26, %s2650_s17  ;;  %v3333_v26 = vand.u32 127, %v587_v54 }
 0x1bc   : > { %5055 = vst [vmem:[#allocation85_spill] sm:$0xff] %v3314_v63  ;;  %5056 = vst [vmem:[#allocation86_spill] sm:$0xff] %v3316_v27  ;;  %v609_v27 = vshrl.u32 %v587_v54, 7 }
 0x1bd   : > { %vm589_vm1 = vcmp.lt.s32.totalorder %v3333_v26, 17  ;;  %vm730_vm2 = vcmp.lt.s32.totalorder %v3333_v26, 16  ;;  %vm872_vm3 = vcmp.lt.s32.totalorder %v3333_v26, 15  ;;  %vm1014_vm4 = vcmp.lt.s32.totalorder %v3333_v26, 1 }
 0x1be   : > { %1128 = vrot.lane.b32.xlu1 %v2954_v60, %s2647_s10  ;;  %v3339_v50 = vsub.s32 0, %v609_v27  ;;  %v3341_v14 = vsub.s32 1, %v609_v27  ;;  %vm1440_vm5 = vcmp.lt.s32.totalorder %v3333_v26, 112  ;;  %vm1298_vm6 = vcmp.lt.s32.totalorder %v3333_v26, 113 }
 0x1bf   : > { %v570_v40 = vpop.permute.xlu0 %569  ;;  %v3322_v47 = vpop.permute.xlu1 %583  ;;  %1124 = vrot.lane.b32.xlu0 %v2907_v45, %s2647_s10  ;;  %2479 = vset.pattern.permute.xlu1 %v5029_v35  ;;  %vm1156_vm7 = vcmp.lt.s32.totalorder %v3333_v26, 127  ;;  %vm1582_vm8 = vcmp.lt.s32.totalorder %v3333_v26, 111 }
 0x1c0   : > { %5057 = vst [vmem:[#allocation87_spill] sm:$0xff] %v3322_v47  ;;  %5060 = vst [vmem:[#allocation90_spill] sm:$0xff] %v3339_v50  ;;  %v3379_v44 = vrot.slane %v2381_v33, %v3341_v14  ;;  %v3390_v52 = vrot.slane %v2382_v34, %v3341_v14 }
 0x1c1   : > { %5061 = vst [vmem:[#allocation91_spill] sm:$0xff] %v3341_v14 }
 0x1c2   : > { %1144 = vrot.lane.b32.xlu1 %v2968_v1, %s2647_s10 }
 0x1c3   : > { %v855_v63 = vpop.permute.xlu0 %854  ;;  %v3329_v8 = vpop.permute.xlu1 %868  ;;  %1140 = vrot.lane.b32.xlu0 %v2921_v49, %s2647_s10 }
 0x1c4   : > { %5058 = vst [vmem:[#allocation88_spill] sm:$0xff] %v3329_v8  ;;  %v606_v8 = vld [vmem:[%s4843_s7] ss:$8 sm:$0x3] }
 0x1c5   : > { %v3356_v53 = vrot.slane %v606_v8, %v3339_v50  ;;  %v3359_v31 = vrot.slane %v606_v8, %v3341_v14 }
 0x1c6   : > { %1353 = vperm.xlu1 %2479, %v2823_v21  }
 0x1c7   : > { %v997_v47 = vpop.permute.xlu0 %996  ;;  %v3336_v19 = vpop.permute.xlu1 %1010  ;;  %1345 = vperm.xlu0 %2482, %v2755_v2  }
 0x1c8   : > { %5059 = vst [vmem:[#allocation89_spill] sm:$0xff] %v3336_v19 }
 0x1ca   : > { %1416 = vrot.lane.b32.xlu1 %v3004_v17, %s2649_s13 }
 0x1cb   : > { %v586_v54 = vpop.permute.xlu0 %585  ;;  %v713_v61 = vpop.permute.xlu1 %712  ;;  %2485 = vset.pattern.permute.xlu0 %v5046_v0  ;;  %2480 = vset.pattern.permute.xlu1 %v5062_v37 }
 0x1cc   : > { %v597_v19 = vsel %vm589_vm1, %v570_v40, %v586_v54  ;;  %v605_v27 = vsel %vm589_vm1, %v586_v54, %v570_v40  ;;  %1511 = vperm.xlu0 %2485, %v2844_v25   ;;  %v3376_v25 = vrot.slane %v2381_v33, %v3339_v50 }
 0x1cd   : > { %v632_v40 = vmul.f32 %v3356_v53, %v605_v27  ;;  %v633_v54 = vmul.f32 %v3359_v31, %v597_v19  ;;  %v2383_v27 = vld [vmem:[%s4843_s7 + $0x3] ss:$8 sm:$0x3]  ;;  %v3387_v19 = vrot.slane %v2382_v34, %v3339_v50 }
 0x1ce   : > { %1418 = vrot.lane.b32.xlu1 %v3029_v32, %s2649_s13  ;;  %v3404_v34 = vrot.slane %v2383_v27, %v3339_v50  ;;  %v3407_v10 = vrot.slane %v2383_v27, %v3341_v14 }
 0x1cf   : > { %v871_v29 = vpop.permute.xlu0 %870  ;;  %v3372_v8 = vpop.permute.xlu1 %1138  ;;  %v680_v33 = vmul.f32 %v2948_v58, %v632_v40  ;;  %v681_v28 = vmul.f32 %v2948_v58, %v633_v54  ;;  %v554_v58 = vmul.f32 %v2903_v41, %v3122_v22 }
 0x1d0   : > { %5063 = vst [vmem:[#allocation92_spill] sm:$0xff] %v3372_v8  ;;  %1507 = vperm.xlu0 %2485, %v2773_v9   ;;  %v880_v8 = vsel %vm872_vm3, %v855_v63, %v871_v29  ;;  %v888_v48 = vsel %vm872_vm3, %v871_v29, %v855_v63  ;;  %5064 = vst [vmem:[#allocation93_spill] sm:$0xff] %v3404_v34 }
 0x1d1   : > { %5065 = vst [vmem:[#allocation94_spill] sm:$0xff] %v3407_v10  ;;  %v916_v27 = vmul.f32 %v3387_v19, %v888_v48  ;;  %v917_v20 = vmul.f32 %v3390_v52, %v880_v8  ;;  %v696_v62 = vadd.f32 %v680_v33, %v553_v15  ;;  %v697_v42 = vadd.f32 %v681_v28, %v554_v58  ;;  %v1698_v48 = vld [vmem:[%s4840_s4 + $0x30] sm:$0xff] }
 0x1d2   : > { %1434 = vrot.lane.b32.xlu1 %v3046_v51, %s2649_s13  ;;  %v5066_v8 = vmov 0  }
 0x1d3   : > { %v1013_v46 = vpop.permute.xlu0 %1012  ;;  %v729_v40 = vpop.permute.xlu1 %728  ;;  %v964_v15 = vmul.f32 %v3048_v55, %v916_v27 }
 0x1d4   : > { %v1022_v54 = vsel %vm1014_vm4, %v997_v47, %v1013_v46  ;;  %v1030_v29 = vsel %vm1014_vm4, %v1013_v46, %v997_v47  ;;  %v738_v63 = vsel %vm730_vm2, %v713_v61, %v729_v40  ;;  %v746_v24 = vsel %vm730_vm2, %v729_v40, %v713_v61  ;;  %1499 = vperm.xlu0 %2485, %v2764_v3  }
 0x1d5   : > { %v774_v41 = vmul.f32 %v3376_v25, %v746_v24  ;;  %v775_v22 = vmul.f32 %v3379_v44, %v738_v63  ;;  %v1058_v46 = vmul.f32 %v3404_v34, %v1030_v29  ;;  %v1059_v47 = vmul.f32 %v3407_v10, %v1022_v54 }
 0x1d6   : > { %1649 = vperm.xlu1 %2480, %v2773_v9   ;;  %v965_v24 = vmul.f32 %v3048_v55, %v917_v20 }
 0x1d7   : > { %v822_v61 = vmul.f32 %v3068_v5, %v774_v41  ;;  %v823_v40 = vmul.f32 %v3068_v5, %v775_v22  ;;  %v1106_v33 = vmul.f32 %v3054_v59, %v1058_v46  ;;  %v1107_v58 = vmul.f32 %v3054_v59, %v1059_v47  ;;  %v3439_v29 = vpop.permute.xlu1 %1154  ;;  %v3447_v20 = vpop.permute.xlu0 %1294 }
 0x1d8   : > { %1414 = vrot.lane.b32.xlu0 %v2975_v6, %s2649_s13  ;;  %5067 = vst [vmem:[#allocation95_spill] sm:$0xff] %v3447_v20  ;;  %v603_v47 = vsel %vm589_vm1, %v3270_v30, %v3256_v11 }
 0x1d9   : > { %v838_v9 = vadd.f32 %v822_v61, %v696_v62  ;;  %v839_v28 = vadd.f32 %v823_v40, %v697_v42  ;;  %v628_v40 = vmul.f32 %v3356_v53, %v603_v47 }
 0x1da   : > { %2481 = vset.pattern.permute.xlu1 %v5066_v8 }
 0x1db   : > { %1732 = vperm.xlu1 %2481, %v1698_v48   ;;  %v980_v5 = vadd.f32 %v964_v15, %v838_v9  ;;  %v981_v54 = vadd.f32 %v965_v24, %v839_v28  ;;  %v3454_v42 = vpop.permute.xlu1 %1280  ;;  %v744_v15 = vsel %vm730_vm2, %v3287_v7, %v3272_v16 }
 0x1dc   : > { %1430 = vrot.lane.b32.xlu0 %v2990_v13, %s2649_s13  ;;  %v770_v9 = vmul.f32 %v3376_v25, %v744_v15 }
 0x1dd   : > { %v3443_v63 = vadd.f32 %v1106_v33, %v980_v5  ;;  %v3445_v27 = vadd.f32 %v1107_v58, %v981_v54  ;;  %v550_v33 = vmul.f32 %v2899_v39, %v3046_v51  ;;  %v676_v58 = vmul.f32 %v2940_v56, %v628_v40  ;;  %v2386_v54 = vld [vmem:[%s4843_s7 + $0x7] ss:$8 sm:$0x3] }
 0x1df   : > { %998 = vrot.lane.b32.xlu1 %v2921_v49, %s2644_s25  ;;  %v3465_v62 = vpop.permute.xlu1 %1296 }
 0x1e0   : > { %1266 = vrot.lane.b32.xlu0 %v2907_v45, %s2648_s12  ;;  %2483 = vset.pattern.permute.xlu1 %v5034_v38 }
 0x1e3   : > { %1000 = vrot.lane.b32.xlu1 %v2942_v57, %s2644_s25 }
 0x1e4   : > { %v3458_v55 = vpop.permute.xlu0 %1073  ;;  %1282 = vrot.lane.b32.xlu0 %v2921_v49, %s2648_s12 }
 0x1e5   : > { %5068 = vst [vmem:[#allocation96_spill] sm:$0xff] %v3458_v55  ;;  %v5089_v55 = vld [vmem:[#allocation36_spill] sm:$0xff] }
 0x1e7   : > { %1207 = vperm.xlu1 %2483, %v2811_v18  }
 0x1e8   : > { %v3463_v59 = vpop.permute.xlu0 %1148  ;;  %1487 = vperm.xlu0 %2485, %v2755_v2  }
 0x1e9   : > { %5069 = vst [vmem:[#allocation97_spill] sm:$0xff] %v3463_v59  ;;  %v5088_v59 = vld [vmem:[#allocation69_spill] sm:$0xff] }
 0x1eb   : > { %1270 = vrot.lane.b32.xlu1 %v2954_v60, %s2648_s12 }
 0x1ec   : > { %v1423_v38 = vpop.permute.xlu0 %1422  ;;  %2489 = vset.pattern.permute.xlu0 %v5062_v37  ;;  %v3471_v41 = vpop.permute.xlu1 %1515  ;;  %2484 = vset.pattern.permute.xlu1 %v5046_v0  ;;  %v5084_v0 = vld [vmem:[#allocation64_spill] sm:$0xff] }
 0x1ed   : > { %1657 = vperm.xlu0 %2489, %v2785_v12   ;;  %v595_v12 = vsel %vm589_vm1, %v3256_v11, %v3270_v30  ;;  %v2384_v11 = vld [vmem:[%s4843_s7 + $0x5] ss:$8 sm:$0x3] }
 0x1ee   : > { %v629_v48 = vmul.f32 %v3359_v31, %v595_v12  ;;  %v5074_v12 = vld [vmem:[#allocation75_spill] sm:$0xff] }
 0x1ef   : > { %1286 = vrot.lane.b32.xlu1 %v2968_v1, %s2648_s12  ;;  %v878_v47 = vsel %vm872_vm3, %v5074_v12, %v3279_v4 }
 0x1f0   : > { %v1439_v18 = vpop.permute.xlu0 %1438  ;;  %v677_v5 = vmul.f32 %v2940_v56, %v629_v48  ;;  %v3552_v56 = vrot.slane %v2384_v11, %v3339_v50  ;;  %v5076_v48 = vld [vmem:[#allocation30_spill] sm:$0xff] }
 0x1f1   : > { %v3480_v2 = vsel %vm1440_vm5, %v1423_v38, %v1439_v18  ;;  %v3484_v22 = vsel %vm1440_vm5, %v1439_v18, %v1423_v38  ;;  %1645 = vperm.xlu0 %2489, %v2834_v23   ;;  %v3487_v46 = vpop.permute.xlu1 %1069  ;;  %v736_v23 = vsel %vm730_vm2, %v3272_v16, %v3287_v7  ;;  %v3555_v18 = vrot.slane %v2384_v11, %v3341_v14 }
 0x1f2   : > { %5070 = vst [vmem:[#allocation98_spill] sm:$0xff] %v3487_v46  ;;  %v771_v7 = vmul.f32 %v3379_v44, %v736_v23  ;;  %5072 = vst [vmem:[#allocation100_spill] sm:$0xff] %v3552_v56  ;;  %v818_v23 = vmul.f32 %v5076_v48, %v770_v9  ;;  %v3578_v11 = vrot.slane %v2386_v54, %v3339_v50  ;;  %v5077_v46 = vld [vmem:[#allocation78_spill] sm:$0xff] }
 0x1f3   : > { %1495 = vperm.xlu1 %2484, %v2823_v21   ;;  %v549_v21 = vmul.f32 %v2899_v39, %v3029_v32  ;;  %v601_v39 = vsel %vm589_vm1, %v3217_v36, %v3203_v43  ;;  %5073 = vst [vmem:[#allocation101_spill] sm:$0xff] %v3555_v18 }
 0x1f4   : > { %v1277_v61 = vpop.permute.xlu0 %1276  ;;  %v819_v15 = vmul.f32 %v5076_v48, %v771_v7  ;;  %v913_v48 = vmul.f32 %v3390_v52, %v878_v47 }
 0x1f5   : > { %1641 = vperm.xlu0 %2489, %v2764_v3   ;;  %v3509_v30 = vpop.permute.xlu1 %1132  ;;  %v2385_v3 = vld [vmem:[%s4843_s7 + $0x6] ss:$8 sm:$0x3] }
 0x1f6   : > { %5071 = vst [vmem:[#allocation99_spill] sm:$0xff] %v3509_v30  ;;  %v3566_v40 = vrot.slane %v2385_v3, %v3339_v50  ;;  %v5078_v50 = vld [vmem:[#allocation77_spill] sm:$0xff] }
 0x1f7   : > { %1558 = vrot.lane.b32.xlu1 %v3004_v17, %s2650_s17  ;;  %v5087_v30 = vld [vmem:[#allocation73_spill] sm:$0xff] }
 0x1f8   : > { %v1293_v24 = vpop.permute.xlu0 %1292  ;;  %2486 = vset.pattern.permute.xlu1 %v5029_v35  ;;  %v593_v35 = vsel %vm589_vm1, %v3203_v43, %v3217_v36  ;;  %v3569_v36 = vrot.slane %v2385_v3, %v3341_v14 }
 0x1f9   : > { %v3526_v16 = vsel %vm1298_vm6, %v1277_v61, %v1293_v24  ;;  %v3530_v28 = vsel %vm1298_vm6, %v1293_v24, %v1277_v61  ;;  %1556 = vrot.lane.b32.xlu0 %v2975_v6, %s2650_s17  ;;  %v1135_v38 = vpop.permute.xlu1 %1134  ;;  %v886_v61 = vsel %vm872_vm3, %v3279_v4, %v5074_v12  ;;  %v3581_v4 = vrot.slane %v2386_v54, %v3341_v14 }
 0x1fa   : > { %v3584_v24 = vmul.f32 %v3356_v53, %v601_v39  ;;  %v3587_v3 = vmul.f32 %v3359_v31, %v593_v35  ;;  %v692_v12 = vadd.f32 %v676_v58, %v549_v21  ;;  %v912_v7 = vmul.f32 %v3387_v19, %v886_v61  ;;  %v5079_v21 = vld [vmem:[#allocation66_spill] sm:$0xff] }
 0x1fb   : > { %1560 = vrot.lane.b32.xlu1 %v3029_v32, %s2650_s17  ;;  %v693_v32 = vadd.f32 %v677_v5, %v550_v33  ;;  %v1020_v54 = vsel %vm1014_vm4, %v5078_v50, %v5077_v46  ;;  %v1028_v35 = vsel %vm1014_vm4, %v5077_v46, %v5078_v50  ;;  %v5080_v33 = vld [vmem:[#allocation63_spill] sm:$0xff]  ;;  %v1306_v39 = vsel %vm1298_vm6, %v3454_v42, %v3465_v62 }
 0x1fc   : > { %v3573_v43 = vpop.permute.xlu0 %1578  ;;  %v3605_v58 = vsel %vm872_vm3, %v5080_v33, %v5079_v21  ;;  %v3611_v5 = vsel %vm872_vm3, %v5079_v21, %v5080_v33  ;;  %v1314_v50 = vsel %vm1298_vm6, %v3465_v62, %v3454_v42  ;;  %v834_v47 = vadd.f32 %v818_v23, %v692_v12  ;;  %v5082_v21 = vld [vmem:[#allocation92_spill] sm:$0xff] }
 0x1fd   : > { %5075 = vst [vmem:[#allocation75_spill] sm:$0xff] %v3573_v43  ;;  %1572 = vrot.lane.b32.xlu0 %v2990_v13, %s2650_s17  ;;  %v1151_v9 = vpop.permute.xlu1 %1150  ;;  %v835_v61 = vadd.f32 %v819_v15, %v693_v32  ;;  %v1164_v33 = vsel %vm1156_vm7, %v5082_v21, %v3439_v29  ;;  %v1172_v14 = vsel %vm1156_vm7, %v3439_v29, %v5082_v21  ;;  %v5083_v43 = vld [vmem:[#allocation67_spill] sm:$0xff]  ;;  %v5085_v15 = vld [vmem:[#allocation14_spill] sm:$0xff]  ;;  %v5086_v32 = vld [vmem:[#allocation28_spill] sm:$0xff] }
 0x1fe   : > { %v734_v42 = vsel %vm730_vm2, %v5084_v0, %v5083_v43  ;;  %v1054_v62 = vmul.f32 %v3404_v34, %v1028_v35  ;;  %v1055_v23 = vmul.f32 %v3407_v10, %v1020_v54  ;;  %v960_v29 = vmul.f32 %v5086_v32, %v912_v7 }
 0x1ff   : > { %1576 = vrot.lane.b32.xlu1 %v3046_v51, %s2650_s17  ;;  %v742_v51 = vsel %vm730_vm2, %v5083_v43, %v5084_v0  ;;  %v961_v21 = vmul.f32 %v5086_v32, %v913_v48  ;;  %v1343_v20 = vmul.f32 %v3569_v36, %v1314_v50  ;;  %v594_v0 = vsel %vm589_vm1, %v5088_v59, %v5087_v30 }
 0x200   : > { %v3623_v46 = vpop.permute.xlu0 %1061  ;;  %v602_v43 = vsel %vm589_vm1, %v5087_v30, %v5088_v59  ;;  %v1200_v7 = vmul.f32 %v3552_v56, %v1164_v33  ;;  %v1201_v48 = vmul.f32 %v3555_v18, %v1172_v14  ;;  %v1162_v54 = vsel %vm1156_vm7, %v1135_v38, %v1151_v9  ;;  %v5090_v14 = vld [vmem:[#allocation38_spill] sm:$0xff] }
 0x201   : > { %5081 = vst [vmem:[#allocation30_spill] sm:$0xff] %v3623_v46  ;;  %1410 = vrot.lane.b32.xlu0 %v5085_v15, %s2649_s13  ;;  %v1366_v12 = vpop.permute.xlu1 %1365  ;;  %v1342_v46 = vmul.f32 %v3566_v40, %v1306_v39  ;;  %v1170_v35 = vsel %vm1156_vm7, %v1151_v9, %v1135_v38  ;;  %v976_v50 = vadd.f32 %v960_v29, %v834_v47 }
 0x202   : > { %v977_v32 = vadd.f32 %v961_v21, %v835_v61  ;;  %v1102_v10 = vmul.f32 %v5089_v55, %v1054_v62  ;;  %v1103_v59 = vmul.f32 %v5089_v55, %v1055_v23  ;;  %v1391_v49 = vmul.f32 %v5090_v14, %v1343_v20 }
 0x203   : > { %1126 = vrot.lane.b32.xlu1 %v5085_v15, %s2647_s10  ;;  %v1390_v34 = vmul.f32 %v5090_v14, %v1342_v46  ;;  %v1484_v38 = vmul.f32 %v3578_v11, %v3480_v2  ;;  %v1485_v9 = vmul.f32 %v3581_v4, %v3484_v22  ;;  %v1196_v61 = vmul.f32 %v3552_v56, %v1162_v54 }
 0x204   : > { %v1197_v62 = vmul.f32 %v3555_v18, %v1170_v35  ;;  %v1338_v20 = vmul.f32 %v3566_v40, %v3526_v16  ;;  %v1339_v2 = vmul.f32 %v3569_v36, %v3530_v28  ;;  %v1118_v23 = vadd.f32 %v1102_v10, %v976_v50  ;;  %v1699_v50 = vld [vmem:[%s4840_s4 + $0x38] sm:$0xff] }
 0x205   : > { %v1232_v39 = vpop.permute.xlu0 %1231  ;;  %1426 = vrot.lane.b32.xlu0 %v2942_v57, %s2649_s13  ;;  %v3669_v15 = vpop.permute.xlu1 %1420  ;;  %v1119_v22 = vadd.f32 %v1103_v59, %v977_v32  ;;  %v766_v16 = vmul.f32 %v3376_v25, %v742_v51  ;;  %v767_v28 = vmul.f32 %v3379_v44, %v734_v42  ;;  %v1532_v10 = vmul.f32 %v3471_v41, %v1484_v38 }
 0x206   : > { %v1248_v30 = vmul.f32 %v1232_v39, %v1200_v7  ;;  %v1249_v33 = vmul.f32 %v1232_v39, %v1201_v48  ;;  %v1387_v54 = vmul.f32 %v1366_v12, %v1339_v2  ;;  %v626_v32 = vmul.f32 %v3356_v53, %v602_v43 }
 0x207   : > { %1142 = vrot.lane.b32.xlu1 %v2942_v57, %s2647_s10  ;;  %v627_v51 = vmul.f32 %v3359_v31, %v594_v0  ;;  %v5094_v0 = vld [vmem:[#allocation7_spill] sm:$0xff]  ;;  %s296_s10 = sand.u32 1, %s2625_s28  }
 0x208   : > { %v1264_v47 = vadd.f32 %v1248_v30, %v3443_v63  ;;  %v1265_v55 = vadd.f32 %v1249_v33, %v3445_v27  ;;  %v3690_v27 = vld [vmem:[%s4839_s3 + $0x8] sm:$0xff]  ;;  %s2366_s25 = sshll.u32 %s296_s10, 6  ;;  %s4795_s9 = scalar_lea.sflag [#allocation3], %s296_s10 }
 0x209   : > { %v1224_v46 = vpop.permute.xlu0 %1223  ;;  %1633 = vperm.xlu0 %2489, %v3690_v27   ;;  %v3693_v48 = vpop.permute.xlu1 %1436  ;;  %s298_s21 = scalar_lea.vmem [#allocation2], %s2366_s25 }
 0x20a   : > { %v1406_v29 = vadd.f32 %v1390_v34, %v1264_v47  ;;  %v1407_v63 = vadd.f32 %v1391_v49, %v1265_v55  ;;  %v1244_v21 = vmul.f32 %v1224_v46, %v1196_v61  ;;  %v1245_v7 = vmul.f32 %v1224_v46, %v1197_v62  ;;  %v5095_v55 = vld [vmem:[#allocation72_spill] sm:$0xff]  ;;  %v5098_v46 = vld [vmem:[#allocation22_spill] sm:$0xff] }
 0x20b   : > { %v1533_v34 = vmul.f32 %v3471_v41, %v1485_v9  ;;  %v1386_v49 = vmul.f32 %v1366_v12, %v1338_v20  ;;  %1349 = vperm.xlu1 %2486, %v3690_v27   ;;  %v5093_v41 = vld [vmem:[#allocation15_spill] sm:$0xff]  ;;  %v545_v9 = vmul.f32 %v5094_v0, %v2975_v6  ;;  %v546_v47 = vmul.f32 %v5094_v0, %v2990_v13  ;;  %v5096_v61 = vld [vmem:[#allocation68_spill] sm:$0xff]  ;;  %v5097_v20 = vld [vmem:[#allocation29_spill] sm:$0xff] }
 0x20c   : > { %v1260_v35 = vadd.f32 %v1244_v21, %v1118_v23  ;;  %v1261_v39 = vadd.f32 %v1245_v7, %v1119_v22  ;;  %v3707_v42 = vadd.f32 %v1532_v10, %v1406_v29  ;;  %v672_v12 = vmul.f32 %v5093_v41, %v3584_v24  ;;  %v5100_v10 = vld [vmem:[#allocation25_spill] sm:$0xff] }
 0x20d   : > { %v3705_v59 = vpop.permute.xlu0 %1211  ;;  %v3709_v30 = vadd.f32 %v1533_v34, %v1407_v63  ;;  %v673_v33 = vmul.f32 %v5093_v41, %v3587_v3  ;;  %2492 = vset.pattern.permute.xlu0 %v5066_v8  ;;  %v3720_v43 = vpop.permute.xlu1 %1653  ;;  %v735_v24 = vsel %vm730_vm2, %v5096_v61, %v5095_v55  ;;  %v743_v3 = vsel %vm730_vm2, %v5095_v55, %v5096_v61  ;;  %v5102_v41 = vld [vmem:[#allocation74_spill] sm:$0xff] }
 0x20e   : > { %5091 = vst [vmem:[#allocation78_spill] sm:$0xff] %v3707_v42  ;;  %v3715_v14 = vadd.f32 %v1386_v49, %v1260_v35  ;;  %v3717_v38 = vadd.f32 %v1387_v54, %v1261_v39  ;;  %1737 = vperm.xlu0 %2492, %v1699_v50   ;;  %v908_v62 = vmul.f32 %v3387_v19, %v3611_v5  ;;  %v5101_v49 = vld [vmem:[#allocation26_spill] sm:$0xff] }
 0x20f   : > { %5092 = vst [vmem:[#allocation77_spill] sm:$0xff] %v3709_v30  ;;  %v909_v6 = vmul.f32 %v3390_v52, %v3605_v58  ;;  %v814_v2 = vmul.f32 %v5097_v20, %v766_v16  ;;  %v815_v13 = vmul.f32 %v5097_v20, %v767_v28  ;;  %1412 = vrot.lane.b32.xlu1 %v2954_v60, %s2649_s13  ;;  %v5099_v16 = vld [vmem:[#allocation9_spill] sm:$0xff] }
 0x210   : > { %v674_v23 = vmul.f32 %v5098_v46, %v626_v32  ;;  %v675_v22 = vmul.f32 %v5098_v46, %v627_v51  ;;  %2487 = vset.pattern.permute.xlu1 %v5062_v37  ;;  %v688_v63 = vadd.f32 %v672_v12, %v545_v9  ;;  %v689_v21 = vadd.f32 %v673_v33, %v546_v47  ;;  %v5103_v12 = vld [vmem:[#allocation71_spill] sm:$0xff]  ;;  %v5104_v9 = vld [vmem:[#allocation18_spill] sm:$0xff]  ;;  %v5105_v20 = vld [vmem:[#allocation65_spill] sm:$0xff] }
 0x211   : > { %v1131_v29 = vpop.permute.xlu0 %1130  ;;  %v768_v5 = vmul.f32 %v3376_v25, %v743_v3  ;;  %v769_v58 = vmul.f32 %v3379_v44, %v735_v24  ;;  %v3747_v7 = vpop.permute.xlu1 %1002  ;;  %v547_v28 = vmul.f32 %v5099_v16, %v3004_v17  ;;  %v548_v34 = vmul.f32 %v5099_v16, %v5100_v10  ;;  %v5106_v46 = vld [vmem:[#allocation13_spill] sm:$0xff] }
 0x212   : > { %1550 = vrot.lane.b32.xlu0 %v2907_v45, %s2650_s17  ;;  %v956_v54 = vmul.f32 %v5101_v49, %v908_v62  ;;  %v957_v35 = vmul.f32 %v5101_v49, %v909_v6  ;;  %v830_v39 = vadd.f32 %v814_v2, %v688_v63  ;;  %v831_v50 = vadd.f32 %v815_v13, %v689_v21  ;;  %v5108_v21 = vld [vmem:[#allocation94_spill] sm:$0xff]  ;;  %v1692_v16 = vld [vmem:[%s4840_s4] sm:$0xff] }
 0x213   : > { %1428 = vrot.lane.b32.xlu1 %v2968_v1, %s2649_s13  ;;  %v690_v32 = vadd.f32 %v674_v23, %v547_v28  ;;  %v691_v51 = vadd.f32 %v675_v22, %v548_v34  ;;  %v877_v17 = vsel %vm872_vm3, %v5103_v12, %v5102_v41  ;;  %v885_v33 = vsel %vm872_vm3, %v5102_v41, %v5103_v12  ;;  %v5109_v12 = vld [vmem:[#allocation76_spill] sm:$0xff] }
 0x214   : > { %v816_v47 = vmul.f32 %v5104_v9, %v768_v5  ;;  %v817_v55 = vmul.f32 %v5104_v9, %v769_v58  ;;  %v910_v23 = vmul.f32 %v3387_v19, %v885_v33  ;;  %v911_v22 = vmul.f32 %v3390_v52, %v877_v17  ;;  %v2571_v58 = vld [vmem:[%s4839_s3 + $0x10] sm:$0xff]  ;;  %v5110_v17 = vld [vmem:[#allocation70_spill] sm:$0xff]  ;;  %v5111_v9 = vld [vmem:[#allocation96_spill] sm:$0xff] }
 0x215   : > { %v1147_v0 = vpop.permute.xlu0 %1146  ;;  %v1005_v3 = vpop.permute.xlu1 %1004  ;;  %v972_v49 = vadd.f32 %v956_v54, %v830_v39  ;;  %v973_v41 = vadd.f32 %v957_v35, %v831_v50  ;;  %v1019_v33 = vsel %vm1014_vm4, %v5110_v17, %v5109_v12  ;;  %v1696_v54 = vld [vmem:[%s4840_s4 + $0x20] sm:$0xff]  ;;  %v5113_v39 = vld [vmem:[#allocation99_spill] sm:$0xff] }
 0x216   : > { %v1160_v61 = vsel %vm1156_vm7, %v1131_v29, %v1147_v0  ;;  %v1168_v24 = vsel %vm1156_vm7, %v1147_v0, %v1131_v29  ;;  %v1018_v2 = vsel %vm1014_vm4, %v5105_v20, %v1005_v3  ;;  %v1026_v13 = vsel %vm1014_vm4, %v1005_v3, %v5105_v20  ;;  %1566 = vrot.lane.b32.xlu0 %v5106_v46, %s2650_s17  ;;  %v5107_v29 = vld [vmem:[#allocation93_spill] sm:$0xff] }
 0x217   : > { %v1192_v62 = vmul.f32 %v3552_v56, %v1160_v61  ;;  %v1193_v6 = vmul.f32 %v3555_v18, %v1168_v24  ;;  %v1050_v63 = vmul.f32 %v5107_v29, %v1026_v13  ;;  %v1051_v5 = vmul.f32 %v5108_v21, %v1018_v2  ;;  %1637 = vperm.xlu1 %2487, %v2571_v58   ;;  %v5112_v35 = vld [vmem:[#allocation97_spill] sm:$0xff] }
 0x218   : > { %v832_v28 = vadd.f32 %v816_v47, %v690_v32  ;;  %v833_v10 = vadd.f32 %v817_v55, %v691_v51  ;;  %v1027_v0 = vsel %vm1014_vm4, %v5109_v12, %v5110_v17  ;;  %v1161_v50 = vsel %vm1156_vm7, %v5113_v39, %v5112_v35  ;;  %v5114_v3 = vld [vmem:[#allocation37_spill] sm:$0xff]  ;;  %v5115_v17 = vld [vmem:[#allocation95_spill] sm:$0xff] }
 0x219   : > { %v3793_v34 = vpop.permute.xlu0 %1432  ;;  %v1098_v61 = vmul.f32 %v5111_v9, %v1050_v63  ;;  %v1099_v24 = vmul.f32 %v5111_v9, %v1051_v5  ;;  %v1216_v32 = vpop.permute.xlu1 %1215  ;;  %v1169_v51 = vsel %vm1156_vm7, %v5112_v35, %v5113_v39  ;;  %v958_v20 = vmul.f32 %v5114_v3, %v910_v23  ;;  %v2185_v5 = vld [vmem:[%s4842_s6 + $0x8] sm:$0xff] }
 0x21a   : > { %v1240_v47 = vmul.f32 %v1216_v32, %v1192_v62  ;;  %v1241_v55 = vmul.f32 %v1216_v32, %v1193_v6  ;;  %1702 = vperm.xlu0 %2492, %v1692_v16   ;;  %v959_v2 = vmul.f32 %v5114_v3, %v911_v22  ;;  %v1052_v58 = vmul.f32 %v5107_v29, %v1027_v0  ;;  %v5116_v62 = vld [vmem:[#allocation86_spill] sm:$0xff] }
 0x21b   : > { %v1114_v13 = vadd.f32 %v1098_v61, %v972_v49  ;;  %v1115_v63 = vadd.f32 %v1099_v24, %v973_v41  ;;  %2488 = vset.pattern.permute.xlu1 %v5066_v8  ;;  %v1053_v12 = vmul.f32 %v5108_v21, %v1019_v33  ;;  %v1305_v6 = vsel %vm1298_vm6, %v5116_v62, %v5115_v17  ;;  %v1697_v9 = vld [vmem:[%s4840_s4 + $0x28] sm:$0xff]  ;;  %v2187_v61 = vld [vmem:[%s4842_s6 + $0x18] sm:$0xff]  ;;  %v5117_v24 = vld [vmem:[#allocation33_spill] sm:$0xff] }
 0x21c   : > { %v1313_v23 = vsel %vm1298_vm6, %v5115_v17, %v5116_v62  ;;  %1722 = vperm.xlu1 %2488, %v1696_v54   ;;  %v1194_v16 = vmul.f32 %v3552_v56, %v1161_v50  ;;  %v1195_v49 = vmul.f32 %v3555_v18, %v1169_v51  ;;  %v1100_v32 = vmul.f32 %v5117_v24, %v1052_v58 }
 0x21d   : > { %v3832_v22 = vpop.permute.xlu0 %1203  ;;  %v3836_v41 = vadd.f32 %v1240_v47, %v1114_v13  ;;  %v3838_v33 = vadd.f32 %v1241_v55, %v1115_v63  ;;  %v1275_v0 = vpop.permute.xlu1 %1274  ;;  %v1101_v54 = vmul.f32 %v5117_v24, %v1053_v12  ;;  %v1340_v35 = vmul.f32 %v3566_v40, %v1305_v6  ;;  %v5118_v47 = vld [vmem:[#allocation40_spill] sm:$0xff] }
 0x21e   : > { %2195 = vperm.xlu0 %2492, %v2185_v5   ;;  %v1341_v39 = vmul.f32 %v3569_v36, %v1313_v23  ;;  %v974_v50 = vadd.f32 %v958_v20, %v832_v28  ;;  %v975_v51 = vadd.f32 %v959_v2, %v833_v10  ;;  %v1242_v55 = vmul.f32 %v5118_v47, %v1194_v16  ;;  %v5119_v20 = vld [vmem:[#allocation14_spill] sm:$0xff] }
 0x21f   : > { %v1243_v3 = vmul.f32 %v5118_v47, %v1195_v49  ;;  %v5120_v16 = vmov 7   ;;  %v5123_v47 = vld [vmem:[#allocation75_spill] sm:$0xff] }
 0x220   : > { %1727 = vperm.xlu1 %2488, %v1697_v9   ;;  %v1116_v2 = vadd.f32 %v1100_v32, %v974_v50  ;;  %v1117_v62 = vadd.f32 %v1101_v54, %v975_v51  ;;  %v5121_v54 = vld [vmem:[#allocation87_spill] sm:$0xff] }
 0x221   : > { %v1291_v13 = vpop.permute.xlu1 %1290 }
 0x222   : > { %v1370_v63 = vpop.permute.xlu0 %1369  ;;  %v1303_v5 = vsel %vm1298_vm6, %v1275_v0, %v1291_v13  ;;  %v1311_v58 = vsel %vm1298_vm6, %v1291_v13, %v1275_v0  ;;  %2205 = vperm.xlu0 %2492, %v2187_v61   ;;  %v1258_v49 = vadd.f32 %v1242_v55, %v1116_v2  ;;  %v1259_v0 = vadd.f32 %v1243_v3, %v1117_v62  ;;  %v5125_v2 = vld [vmem:[#allocation79_spill] sm:$0xff] }
 0x223   : > { %v3856_v12 = vmul.f32 %v1370_v63, %v1340_v35  ;;  %v3858_v17 = vmul.f32 %v1370_v63, %v1341_v39  ;;  %v1336_v28 = vmul.f32 %v3566_v40, %v1303_v5  ;;  %v1337_v10 = vmul.f32 %v3569_v36, %v1311_v58  ;;  %v5122_v39 = vld [vmem:[#allocation80_spill] sm:$0xff] }
 0x224   : > { %1268 = vrot.lane.b32.xlu1 %v5119_v20, %s2648_s12  ;;  %v596_v50 = vsel %vm589_vm1, %v5122_v39, %v5121_v54  ;;  %v604_v51 = vsel %vm589_vm1, %v5121_v54, %v5122_v39 }
 0x225   : > { %v3864_v6 = vpop.permute.xlu1 %1503  ;;  %2490 = vset.pattern.permute.xlu1 %v5120_v16  ;;  %v630_v63 = vmul.f32 %v3356_v53, %v604_v51  ;;  %v631_v5 = vmul.f32 %v3359_v31, %v596_v50 }
 0x226   : > { %v1362_v23 = vpop.permute.xlu0 %1361 }
 0x227   : > { %v1384_v9 = vmul.f32 %v1362_v23, %v1336_v28  ;;  %v1385_v24 = vmul.f32 %v1362_v23, %v1337_v10  ;;  %v5124_v10 = vld [vmem:[#allocation83_spill] sm:$0xff] }
 0x228   : > { %1284 = vrot.lane.b32.xlu1 %v2942_v57, %s2648_s12  ;;  %v737_v62 = vsel %vm730_vm2, %v5125_v2, %v5124_v10  ;;  %v745_v23 = vsel %vm730_vm2, %v5124_v10, %v5125_v2 }
 0x229   : > { %v3868_v61 = vadd.f32 %v1384_v9, %v1258_v49  ;;  %v3870_v35 = vadd.f32 %v1385_v24, %v1259_v0  ;;  %v1563_v32 = vpop.permute.xlu1 %1562  ;;  %v5127_v9 = vld [vmem:[#allocation88_spill] sm:$0xff]  ;;  %v5128_v24 = vld [vmem:[#allocation82_spill] sm:$0xff] }
 0x22a   : > { %v3885_v55 = vsel %vm1582_vm8, %v1563_v32, %v5123_v47  ;;  %v3890_v3 = vsel %vm1582_vm8, %v5123_v47, %v1563_v32  ;;  %v1358_v13 = vpop.permute.xlu0 %1357  ;;  %v879_v32 = vsel %vm872_vm3, %v5128_v24, %v5127_v9  ;;  %v887_v54 = vsel %vm872_vm3, %v5127_v9, %v5128_v24  ;;  %v5132_v47 = vld [vmem:[#allocation10_spill] sm:$0xff] }
 0x22b   : > { %v772_v9 = vmul.f32 %v3376_v25, %v745_v23  ;;  %v773_v24 = vmul.f32 %v3379_v44, %v737_v62 }
 0x22c   : > { %1491 = vperm.xlu1 %2490, %v3690_v27   ;;  %v5126_v27 = vld [vmem:[#allocation24_spill] sm:$0xff] }
 0x22d   : > { %v1565_v58 = vpop.permute.xlu1 %1564  ;;  %v678_v16 = vmul.f32 %v5126_v27, %v630_v63  ;;  %v679_v49 = vmul.f32 %v5126_v27, %v631_v5  ;;  %v5133_v5 = vld [vmem:[#allocation35_spill] sm:$0xff] }
 0x22e   : > { %v1273_v28 = vpop.permute.xlu0 %1272  ;;  %v552_v10 = vmul.f32 %v5132_v47, %v5133_v5  ;;  %v915_v5 = vmul.f32 %v3390_v52, %v879_v32 }
 0x230   : > { %1554 = vrot.lane.b32.xlu1 %v2954_v60, %s2650_s17  ;;  %v695_v30 = vadd.f32 %v679_v49, %v552_v10  ;;  %v5137_v49 = vld [vmem:[#allocation19_spill] sm:$0xff] }
 0x231   : > { %v1581_v0 = vpop.permute.xlu1 %1580  ;;  %2491 = vset.pattern.permute.xlu1 %v5062_v37  ;;  %v5131_v37 = vld [vmem:[#allocation32_spill] sm:$0xff]  ;;  %v821_v32 = vmul.f32 %v5137_v49, %v773_v24 }
 0x232   : > { %v3918_v39 = vsel %vm1582_vm8, %v1565_v58, %v1581_v0  ;;  %v3922_v50 = vsel %vm1582_vm8, %v1581_v0, %v1565_v58  ;;  %v1289_v51 = vpop.permute.xlu0 %1288  ;;  %v551_v63 = vmul.f32 %v5132_v47, %v5131_v37  ;;  %v914_v47 = vmul.f32 %v3387_v19, %v887_v54 }
 0x233   : > { %5129 = vst [vmem:[#allocation66_spill] sm:$0xff] %v3918_v39  ;;  %5130 = vst [vmem:[#allocation63_spill] sm:$0xff] %v3922_v50  ;;  %v1302_v2 = vsel %vm1298_vm6, %v1273_v28, %v1289_v51  ;;  %v1310_v27 = vsel %vm1298_vm6, %v1289_v51, %v1273_v28  ;;  %v5134_v28 = vld [vmem:[#allocation89_spill] sm:$0xff]  ;;  %v5135_v51 = vld [vmem:[#allocation84_spill] sm:$0xff]  ;;  %v820_v54 = vmul.f32 %v5137_v49, %v772_v9 }
 0x234   : > { %v1334_v58 = vmul.f32 %v3566_v40, %v1302_v2  ;;  %v1335_v0 = vmul.f32 %v3569_v36, %v1310_v27  ;;  %1570 = vrot.lane.b32.xlu1 %v2968_v1, %s2650_s17  ;;  %v694_v37 = vadd.f32 %v678_v16, %v551_v63  ;;  %v1021_v62 = vsel %vm1014_vm4, %v5135_v51, %v5134_v28  ;;  %v5138_v50 = vld [vmem:[#allocation85_spill] sm:$0xff] }
 0x235   : > { %v3940_v42 = vpop.permute.xlu1 %1065  ;;  %v1029_v23 = vsel %vm1014_vm4, %v5134_v28, %v5135_v51  ;;  %v5139_v39 = vld [vmem:[#allocation81_spill] sm:$0xff]  ;;  %v5140_v28 = vld [vmem:[#allocation39_spill] sm:$0xff] }
 0x236   : > { %v1382_v2 = vmul.f32 %v1358_v13, %v1334_v58  ;;  %v1383_v27 = vmul.f32 %v1358_v13, %v1335_v0  ;;  %v3950_v16 = vpop.permute.xlu0 %1574  ;;  %v1163_v13 = vsel %vm1156_vm7, %v5139_v39, %v5138_v50  ;;  %v1171_v9 = vsel %vm1156_vm7, %v5138_v50, %v5139_v39  ;;  %v5141_v39 = vld [vmem:[#allocation41_spill] sm:$0xff] }
 0x237   : > { %5136 = vst [vmem:[#allocation92_spill] sm:$0xff] %v3950_v16  ;;  %v1056_v24 = vmul.f32 %v5107_v29, %v1029_v23  ;;  %v837_v0 = vadd.f32 %v821_v32, %v695_v30  ;;  %v962_v51 = vmul.f32 %v5140_v28, %v914_v47  ;;  %v1198_v49 = vmul.f32 %v3552_v56, %v1163_v13  ;;  %v2387_v30 = vld [vmem:[%s4843_s7 + $0x10] ss:$8 sm:$0x3] }
 0x238   : > { %v3955_v63 = vadd.f32 %v1382_v2, %v3836_v41  ;;  %v3958_v10 = vadd.f32 %v1383_v27, %v3838_v33  ;;  %1408 = vrot.lane.b32.xlu1 %v2907_v45, %s2649_s13  ;;  %v1057_v41 = vmul.f32 %v5108_v21, %v1021_v62  ;;  %v836_v33 = vadd.f32 %v820_v54, %v694_v37 }
 0x239   : > { %v1129_v58 = vpop.permute.xlu1 %1128  ;;  %v963_v2 = vmul.f32 %v5140_v28, %v915_v5  ;;  %v1199_v16 = vmul.f32 %v3555_v18, %v1171_v9  ;;  %v1104_v50 = vmul.f32 %v5141_v39, %v1056_v24  ;;  %v5142_v28 = vld [vmem:[#allocation90_spill] sm:$0xff] }
 0x23a   : > { %v1125_v27 = vpop.permute.xlu0 %1124  ;;  %v1105_v23 = vmul.f32 %v5141_v39, %v1057_v41  ;;  %v978_v47 = vadd.f32 %v962_v51, %v836_v33  ;;  %v3994_v33 = vrot.slane %v2387_v30, %v5142_v28  ;;  %v2572_v39 = vld [vmem:[%s4839_s3] sm:$0xff]  ;;  %v5148_v28 = vld [vmem:[#allocation43_spill] sm:$0xff] }
 0x23b   : > { %v979_v62 = vadd.f32 %v963_v2, %v837_v0  ;;  %v5143_v0 = vld [vmem:[#allocation91_spill] sm:$0xff] }
 0x23c   : > { %1424 = vrot.lane.b32.xlu1 %v5106_v46, %s2649_s13  ;;  %v3997_v51 = vrot.slane %v2387_v30, %v5143_v0  ;;  %v1447_v30 = vsel %vm1440_vm5, %v3669_v15, %v3693_v48 }
 0x23d   : > { %v1145_v37 = vpop.permute.xlu1 %1144 }
 0x23e   : > { %v1159_v5 = vsel %vm1156_vm7, %v1129_v58, %v1145_v37  ;;  %v1167_v54 = vsel %vm1156_vm7, %v1145_v37, %v1129_v58  ;;  %v1141_v32 = vpop.permute.xlu0 %1140  ;;  %v1120_v37 = vadd.f32 %v1104_v50, %v978_v47  ;;  %v1694_v47 = vld [vmem:[%s4840_s4 + $0x10] sm:$0xff] }
 0x23f   : > { %v1190_v13 = vmul.f32 %v3552_v56, %v1159_v5  ;;  %v1191_v9 = vmul.f32 %v3555_v18, %v1167_v54  ;;  %v1157_v24 = vsel %vm1156_vm7, %v1125_v27, %v1141_v32  ;;  %v1165_v41 = vsel %vm1156_vm7, %v1141_v32, %v1125_v27 }
 0x240   : > { %v1186_v2 = vmul.f32 %v3552_v56, %v1157_v24  ;;  %v1187_v58 = vmul.f32 %v3555_v18, %v1165_v41  ;;  %1629 = vperm.xlu1 %2491, %v2572_v39   ;;  %v1121_v5 = vadd.f32 %v1105_v23, %v979_v62  ;;  %v1455_v24 = vsel %vm1440_vm5, %v3693_v48, %v3669_v15  ;;  %v5146_v62 = vld [vmem:[#allocation31_spill] sm:$0xff] }
 0x241   : > { %v4005_v54 = vmul.f32 %v3705_v59, %v1190_v13  ;;  %v4008_v27 = vmul.f32 %v3705_v59, %v1191_v9  ;;  %v4010_v32 = vpop.permute.xlu1 %1353  ;;  %v1246_v13 = vmul.f32 %v5146_v62, %v1198_v49  ;;  %v1247_v9 = vmul.f32 %v5146_v62, %v1199_v16  ;;  %v5147_v41 = vld [vmem:[#allocation47_spill] sm:$0xff] }
 0x242   : > { %5145 = vst [vmem:[#allocation64_spill] sm:$0xff] %v4010_v32  ;;  %v4021_v50 = vmul.f32 %v3832_v22, %v1186_v2  ;;  %v4024_v23 = vmul.f32 %v3832_v22, %v1187_v58  ;;  %v4026_v59 = vpop.permute.xlu0 %1345  ;;  %v590_v15 = vsel %vm589_vm1, %v5148_v28, %v5147_v41  ;;  %v598_v48 = vsel %vm589_vm1, %v5147_v41, %v5148_v28 }
 0x243   : > { %5144 = vst [vmem:[#allocation67_spill] sm:$0xff] %v4008_v27  ;;  %v1262_v22 = vadd.f32 %v1246_v13, %v1120_v37  ;;  %v1263_v0 = vadd.f32 %v1247_v9, %v1121_v5  ;;  %v1482_v49 = vmul.f32 %v3578_v11, %v1447_v30  ;;  %v1483_v16 = vmul.f32 %v3581_v4, %v1455_v24  ;;  %v1695_v5 = vld [vmem:[%s4840_s4 + $0x18] sm:$0xff]  ;;  %v5149_v30 = vld [vmem:[#allocation42_spill] sm:$0xff] }
 0x244   : > { %2493 = vset.pattern.permute.xlu1 %v5066_v8  ;;  %v1624_v58 = vmul.f32 %v3994_v33, %v3885_v55  ;;  %v1625_v39 = vmul.f32 %v3997_v51, %v3890_v3  ;;  %v5150_v24 = vld [vmem:[#allocation46_spill] sm:$0xff]  ;;  %v619_v8 = vmul.f32 %v3359_v31, %v590_v15 }
 0x245   : > { %1712 = vperm.xlu1 %2493, %v1694_v47   ;;  %v1417_v2 = vpop.permute.xlu1 %1416  ;;  %v739_v55 = vsel %vm730_vm2, %v5150_v24, %v5149_v30  ;;  %v1404_v9 = vadd.f32 %v3856_v12, %v1262_v22  ;;  %v1405_v41 = vadd.f32 %v3858_v17, %v1263_v0 }
 0x246   : > { %v1445_v62 = vsel %vm1440_vm5, %v1417_v2, %v3793_v34  ;;  %v1453_v37 = vsel %vm1440_vm5, %v3793_v34, %v1417_v2  ;;  %v618_v2 = vmul.f32 %v3356_v53, %v598_v48 }
 0x247   : > { %v1478_v47 = vmul.f32 %v3578_v11, %v1445_v62  ;;  %v1479_v3 = vmul.f32 %v3581_v4, %v1453_v37  ;;  %v1512_v13 = vpop.permute.xlu0 %1511  ;;  %v1672_v62 = vmul.f32 %v3720_v43, %v1624_v58  ;;  %v1673_v37 = vmul.f32 %v3720_v43, %v1625_v39 }
 0x248   : > { %v1530_v28 = vmul.f32 %v1512_v13, %v1482_v49  ;;  %v1531_v34 = vmul.f32 %v1512_v13, %v1483_v16  ;;  %v760_v43 = vmul.f32 %v3376_v25, %v739_v55  ;;  %v5151_v49 = vld [vmem:[#allocation11_spill] sm:$0xff] }
 0x249   : > { %v1526_v18 = vmul.f32 %v3864_v6, %v1478_v47  ;;  %v1527_v56 = vmul.f32 %v3864_v6, %v1479_v3  ;;  %1717 = vperm.xlu1 %2493, %v1695_v5   ;;  %v1419_v32 = vpop.permute.xlu1 %1418  ;;  %v731_v6 = vsel %vm730_vm2, %v5149_v30, %v5150_v24  ;;  %v666_v16 = vmul.f32 %v5151_v49, %v618_v2  ;;  %v5154_v5 = vld [vmem:[#allocation5_spill] sm:$0xff] }
 0x24a   : > { %v1546_v27 = vadd.f32 %v1530_v28, %v1404_v9  ;;  %v1547_v12 = vadd.f32 %v1531_v34, %v1405_v41  ;;  %v539_v30 = vmul.f32 %v5154_v5, %v2907_v45  ;;  %v761_v3 = vmul.f32 %v3379_v44, %v731_v6  ;;  %v5155_v9 = vld [vmem:[#allocation61_spill] sm:$0xff] }
 0x24b   : > { %v1508_v22 = vpop.permute.xlu0 %1507  ;;  %v4072_v17 = vadd.f32 %v1526_v18, %v3868_v61  ;;  %v4075_v48 = vadd.f32 %v1527_v56, %v3870_v35  ;;  %v667_v56 = vmul.f32 %v5151_v49, %v619_v8  ;;  %v5152_v61 = vld [vmem:[#allocation45_spill] sm:$0xff]  ;;  %v540_v13 = vmul.f32 %v5154_v5, %v5106_v46  ;;  %v5157_v46 = vld [vmem:[#allocation27_spill] sm:$0xff] }
 0x24c   : > { %v4077_v15 = vadd.f32 %v1672_v62, %v1546_v27  ;;  %v4079_v0 = vadd.f32 %v1673_v37, %v1547_v12  ;;  %v5153_v35 = vld [vmem:[#allocation49_spill] sm:$0xff]  ;;  %v682_v28 = vadd.f32 %v666_v16, %v539_v30  ;;  %v808_v12 = vmul.f32 %v5157_v46, %v760_v43 }
 0x24d   : > { %1552 = vrot.lane.b32.xlu1 %v5119_v20, %s2650_s17  ;;  %v1435_v18 = vpop.permute.xlu1 %1434  ;;  %v881_v27 = vsel %vm872_vm3, %v5153_v35, %v5152_v61  ;;  %v873_v24 = vsel %vm872_vm3, %v5152_v61, %v5153_v35  ;;  %v683_v6 = vadd.f32 %v667_v56, %v540_v13  ;;  %v809_v43 = vmul.f32 %v5157_v46, %v761_v3  ;;  %v5158_v56 = vld [vmem:[#allocation56_spill] sm:$0xff]  ;;  %v5160_v30 = vld [vmem:[#allocation21_spill] sm:$0xff] }
 0x24e   : > { %v1446_v58 = vsel %vm1440_vm5, %v1419_v32, %v1435_v18  ;;  %v1454_v39 = vsel %vm1440_vm5, %v1435_v18, %v1419_v32  ;;  %v5156_v32 = vld [vmem:[#allocation57_spill] sm:$0xff]  ;;  %v902_v34 = vmul.f32 %v3387_v19, %v881_v27  ;;  %v903_v49 = vmul.f32 %v3390_v52, %v873_v24  ;;  %v1693_v18 = vld [vmem:[%s4840_s4 + $0x8] sm:$0xff] }
 0x24f   : > { %v1480_v8 = vmul.f32 %v3578_v11, %v1446_v58  ;;  %v1481_v55 = vmul.f32 %v3581_v4, %v1454_v39  ;;  %v1500_v47 = vpop.permute.xlu0 %1499  ;;  %v592_v45 = vsel %vm589_vm1, %v5156_v32, %v5155_v9  ;;  %v600_v41 = vsel %vm589_vm1, %v5155_v9, %v5156_v32  ;;  %v5159_v58 = vld [vmem:[#allocation60_spill] sm:$0xff] }
 0x250   : > { %v622_v16 = vmul.f32 %v3356_v53, %v600_v41  ;;  %v623_v61 = vmul.f32 %v3359_v31, %v592_v45  ;;  %v741_v39 = vsel %vm730_vm2, %v5159_v58, %v5158_v56  ;;  %v824_v5 = vadd.f32 %v808_v12, %v682_v28  ;;  %v5161_v9 = vld [vmem:[#allocation12_spill] sm:$0xff] }
 0x251   : > { %v1528_v2 = vmul.f32 %v1508_v22, %v1480_v8  ;;  %v1529_v62 = vmul.f32 %v1508_v22, %v1481_v55  ;;  %1568 = vrot.lane.b32.xlu1 %v2942_v57, %s2650_s17  ;;  %v4120_v37 = vpop.permute.xlu1 %1649  ;;  %v950_v24 = vmul.f32 %v5160_v30, %v902_v34  ;;  %v825_v8 = vadd.f32 %v809_v43, %v683_v6  ;;  %s2300_s17 = sshll.u32 %s298_s21, 4  ;;  %s4791_s17 = int_to_ptr.vmem [resolvable:$true] %s2300_s17 }
 0x252   : > { %v951_v3 = vmul.f32 %v5160_v30, %v903_v49  ;;  %v764_v13 = vmul.f32 %v3376_v25, %v741_v39  ;;  %v670_v32 = vmul.f32 %v5161_v9, %v622_v16  ;;  %v671_v45 = vmul.f32 %v5161_v9, %v623_v61  ;;  %v5163_v49 = vld [vmem:[#allocation62_spill] sm:$0xff]  ;;  %v5166_v9 = vld [vmem:[#allocation44_spill] sm:$0xff]  ;;  %s2573_s13 = scalar_lea.vmem %s4791_s17, 1024  ;;  %p2580_p0 = scmp.lt.s32.totalorder %s4791_s17, %s2578_s19 }
 0x253   : > { %v1415_v35 = vpop.permute.xlu0 %1414  ;;  %v4130_v22 = vadd.f32 %v1528_v2, %v3715_v14  ;;  %v4133_v27 = vadd.f32 %v1529_v62, %v3717_v38  ;;  %v733_v14 = vsel %vm730_vm2, %v5158_v56, %v5159_v58  ;;  %v2184_v38 = vld [vmem:[%s4842_s6] sm:$0xff]  ;;  %v5162_v2 = vld [vmem:[#allocation8_spill] sm:$0xff]  ;;  %v966_v46 = vadd.f32 %v950_v24, %v824_v5  ;;  %p2574_p11 = scmp.ne.s32.totalorder %s4791_s17, %s2573_s13  ;;  %p2581_p1 = scmp.lt.s32.totalorder %s2579_s20, %s2573_s13 }
 0x254   : > { %v543_v62 = vmul.f32 %v5162_v2, %v2954_v60  ;;  %v765_v12 = vmul.f32 %v3379_v44, %v733_v14  ;;  %v544_v6 = vmul.f32 %v5162_v2, %v2968_v1  ;;  %v2186_v1 = vld [vmem:[%s4842_s6 + $0x10] sm:$0xff]  ;;  %v967_v56 = vadd.f32 %v951_v3, %v825_v8  ;;  %v5165_v58 = vld [vmem:[#allocation17_spill] sm:$0xff]  ;;  %v5167_v3 = vld [vmem:[#allocation58_spill] sm:$0xff] }
 0x255   : > { %1707 = vperm.xlu1 %2493, %v1693_v18   ;;  %v5164_v18 = vld [vmem:[#allocation59_spill] sm:$0xff]  ;;  %v812_v39 = vmul.f32 %v5165_v58, %v764_v13  ;;  %v1025_v13 = vsel %vm1014_vm4, %v3747_v7, %v5167_v3  ;;  %p2575_p12 = pnand %p2574_p11, %p2737_p5  ;;  %p2582_p2 = por %p2581_p1, %p2580_p0 }
 0x256   : > { %v1733_v55 = vpop.permute.xlu1 %1732  ;;  %v875_v16 = vsel %vm872_vm3, %v5164_v18, %v5163_v49  ;;  %v883_v61 = vsel %vm872_vm3, %v5163_v49, %v5164_v18  ;;  %v686_v5 = vadd.f32 %v670_v32, %v543_v62  ;;  %v687_v30 = vadd.f32 %v671_v45, %v544_v6 }
 0x257   : > { %v1431_v41 = vpop.permute.xlu0 %1430  ;;  %v906_v2 = vmul.f32 %v3387_v19, %v883_v61  ;;  %v907_v8 = vmul.f32 %v3390_v52, %v875_v16  ;;  %v1017_v18 = vsel %vm1014_vm4, %v5167_v3, %v3747_v7  ;;  %v4201_v16 = vadd.f32 %v1733_v55, %v4077_v15  ;;  %p2576_p13 = pneg %p2575_p12 }
 0x258   : > { %v1444_v28 = vsel %vm1440_vm5, %v1415_v35, %v1431_v41  ;;  %v1452_v34 = vsel %vm1440_vm5, %v1431_v41, %v1415_v35  ;;  %v828_v6 = vadd.f32 %v812_v39, %v686_v5  ;;  %v1048_v15 = vmul.f32 %v5107_v29, %v1025_v13  ;;  %v5171_v13 = vld [vmem:[#allocation98_spill] sm:$0xff] }
 0x259   : > { %2190 = vperm.xlu1 %2493, %v2184_v38   ;;  %v1476_v35 = vmul.f32 %v3578_v11, %v1444_v28  ;;  %v1477_v60 = vmul.f32 %v3581_v4, %v1452_v34  ;;  %v813_v34 = vmul.f32 %v5165_v58, %v765_v12  ;;  %v5170_v58 = vld [vmem:[#allocation23_spill] sm:$0xff]  ;;  %p2583_p3 = pnand %p2582_p2, %p2576_p13 }
 0x25a   : > { %v999_v43 = vpop.permute.xlu1 %998  ;;  %v954_v39 = vmul.f32 %v5170_v58, %v906_v2  ;;  %v955_v7 = vmul.f32 %v5170_v58, %v907_v8 }
 0x25b   : > { %v1267_v24 = vpop.permute.xlu0 %1266  ;;  %v1524_v14 = vmul.f32 %v1500_v47, %v1476_v35  ;;  %v1525_v38 = vmul.f32 %v1500_v47, %v1477_v60  ;;  %v1015_v41 = vsel %vm1014_vm4, %v5166_v9, %v999_v43  ;;  %v1023_v28 = vsel %vm1014_vm4, %v999_v43, %v5166_v9  ;;  %v5168_v35 = vld [vmem:[#allocation30_spill] sm:$0xff] }
 0x25c   : > { %v1044_v47 = vmul.f32 %v5107_v29, %v1023_v28  ;;  %v1045_v32 = vmul.f32 %v5108_v21, %v1015_v41  ;;  %v829_v49 = vadd.f32 %v813_v34, %v687_v30  ;;  %v1049_v30 = vmul.f32 %v5108_v21, %v1017_v18 }
 0x25d   : > { %2200 = vperm.xlu1 %2493, %v2186_v1   ;;  %v4191_v62 = vadd.f32 %v1524_v14, %v3955_v63  ;;  %v4194_v12 = vadd.f32 %v1525_v38, %v3958_v10  ;;  %v5169_v63 = vld [vmem:[#allocation53_spill] sm:$0xff]  ;;  %v4220_v28 = vadd.f32 %v1733_v55, %v4079_v0 }
 0x25e   : > { %v1001_v45 = vpop.permute.xlu1 %1000  ;;  %v1092_v60 = vmul.f32 %v5168_v35, %v1044_v47  ;;  %v1093_v43 = vmul.f32 %v5168_v35, %v1045_v32  ;;  %v1096_v47 = vmul.f32 %v5171_v13, %v1048_v15 }
 0x25f   : > { %v1283_v61 = vpop.permute.xlu0 %1282  ;;  %v1016_v10 = vsel %vm1014_vm4, %v5169_v63, %v1001_v45  ;;  %v1024_v1 = vsel %vm1014_vm4, %v1001_v45, %v5169_v63  ;;  %v5172_v45 = vld [vmem:[#allocation66_spill] sm:$0xff] }
 0x260   : > { %v1046_v5 = vmul.f32 %v5107_v29, %v1024_v1  ;;  %v1108_v14 = vadd.f32 %v1092_v60, %v966_v46  ;;  %v1109_v38 = vadd.f32 %v1093_v43, %v967_v56  ;;  %v1047_v9 = vmul.f32 %v5108_v21, %v1016_v10 }
 0x261   : > { %v1299_v2 = vsel %vm1298_vm6, %v1267_v24, %v1283_v61  ;;  %v1307_v29 = vsel %vm1298_vm6, %v1283_v61, %v1267_v24  ;;  %v4232_v46 = vmul.f32 0.70710677, %v4201_v16  ;;  %v1097_v24 = vmul.f32 %v5171_v13, %v1049_v30  ;;  %v5173_v61 = vld [vmem:[#allocation63_spill] sm:$0xff] }
 0x262   : > { %v4217_v41 = vpop.permute.xlu1 %1207  ;;  %v4223_v34 = vmul.f32 %v3940_v42, %v1046_v5  ;;  %v4235_v21 = vmul.f32 %v3940_v42, %v1047_v9  ;;  %v1250_v0 = vadd.f32 %v4021_v50, %v1108_v14  ;;  %v1251_v55 = vadd.f32 %v4024_v23, %v1109_v38  ;;  %v5176_v13 = vld [vmem:[#allocation67_spill] sm:$0xff] }
 0x263   : > { %v4229_v8 = vpop.permute.xlu0 %1487  ;;  %v1328_v56 = vmul.f32 %v3566_v40, %v1299_v2  ;;  %v1329_v3 = vmul.f32 %v3569_v36, %v1307_v29  ;;  %v1626_v18 = vmul.f32 %v3994_v33, %v5172_v45  ;;  %v1627_v42 = vmul.f32 %v3997_v51, %v5173_v61 }
 0x264   : > { %v970_v23 = vadd.f32 %v954_v39, %v828_v6  ;;  %v971_v60 = vadd.f32 %v955_v7, %v829_v49  ;;  %v4250_v43 = vmul.f32 0.70710677, %v4220_v28  ;;  %v4253_v63 = vand.u32 2147483647, %v4232_v46  ;;  %v5174_v49 = vld [vmem:[#allocation78_spill] sm:$0xff]  ;;  %v5175_v7 = vld [vmem:[#allocation77_spill] sm:$0xff] }
 0x265   : > { %v1376_v35 = vmul.f32 %v4026_v59, %v1328_v56  ;;  %v1377_v50 = vmul.f32 %v4026_v59, %v1329_v3  ;;  %vm2088_vm9 = vcmp.ge.f32.partialorder %v4232_v46, 0.0 }
 0x266   : > { %v1271_v32 = vpop.permute.xlu1 %1270  ;;  %v1112_v30 = vadd.f32 %v1096_v47, %v970_v23  ;;  %v1113_v14 = vadd.f32 %v1097_v24, %v971_v60  ;;  %v4270_v2 = vand.u32 2147483647, %v4250_v43  ;;  %v1800_v29 = vmul.f32 0.3275911, %v4253_v63  ;;  %v5177_v24 = vld [vmem:[#allocation64_spill] sm:$0xff] }
 0x267   : > { %v4255_v1 = vadd.f32 %v1376_v35, %v1250_v0  ;;  %v4257_v58 = vadd.f32 %v1377_v50, %v1251_v55  ;;  %v5178_v60 = vld [vmem:[#allocation52_spill] sm:$0xff]  ;;  %vm2089_vm10 = vcmp.ge.f32.partialorder %v4250_v43, 0.0 }
 0x268   : > { %v1658_v10 = vpop.permute.xlu0 %1657  ;;  %v1254_v3 = vadd.f32 %v4005_v54, %v1112_v30  ;;  %v1255_v47 = vadd.f32 %v5176_v13, %v1113_v14  ;;  %v1801_v61 = vmul.f32 0.3275911, %v4270_v2  ;;  %v5180_v30 = vld [vmem:[#allocation55_spill] sm:$0xff] }
 0x269   : > { %v1674_v15 = vmul.f32 %v1658_v10, %v1626_v18  ;;  %v1675_v5 = vmul.f32 %v1658_v10, %v1627_v42  ;;  %v1816_v42 = vadd.f32 1.0, %v1800_v29  ;;  %v5179_v10 = vld [vmem:[#allocation48_spill] sm:$0xff]  ;;  %v5181_v14 = vld [vmem:[#allocation51_spill] sm:$0xff] }
 0x26a   : > { %v1287_v38 = vpop.permute.xlu1 %1286  ;;  %v591_v54 = vsel %vm589_vm1, %v5179_v10, %v5178_v60  ;;  %v1817_v29 = vadd.f32 1.0, %v1801_v61 }
 0x26b   : > { %v1301_v59 = vsel %vm1298_vm6, %v1271_v32, %v1287_v38  ;;  %v1309_v6 = vsel %vm1298_vm6, %v1287_v38, %v1271_v32  ;;  %v4264_v39 = vadd.f32 %v1674_v15, %v5174_v49  ;;  %v4267_v9 = vadd.f32 %v1675_v5, %v5175_v7 }
 0x26c   : > { %v1332_v0 = vmul.f32 %v3566_v40, %v1301_v59  ;;  %v1333_v55 = vmul.f32 %v3569_v36, %v1309_v6  ;;  %v1646_v56 = vpop.permute.xlu0 %1645  ;;  %v599_v15 = vsel %vm589_vm1, %v5178_v60, %v5179_v10  ;;  %v732_v38 = vsel %vm730_vm2, %v5181_v14, %v5180_v30  ;;  %v5182_v6 = vld [vmem:[#allocation92_spill] sm:$0xff]  ;;  %v5183_v60 = vld [vmem:[#allocation6_spill] sm:$0xff] }
 0x26d   : > { %v740_v59 = vsel %vm730_vm2, %v5180_v30, %v5181_v14  ;;  %2506 = vrcp.f32 %v1816_v42  ;;  %v620_v13 = vmul.f32 %v3356_v53, %v599_v15  ;;  %v541_v10 = vmul.f32 %v5183_v60, %v5119_v20  ;;  %v5185_v20 = vld [vmem:[#allocation54_spill] sm:$0xff] }
 0x26e   : > { %v1380_v32 = vmul.f32 %v5177_v24, %v1332_v0  ;;  %v1381_v45 = vmul.f32 %v5177_v24, %v1333_v55  ;;  %v4279_v18 = vpop.permute.xlu1 %1495  ;;  %v762_v30 = vmul.f32 %v3376_v25, %v740_v59  ;;  %v763_v61 = vmul.f32 %v3379_v44, %v732_v38 }
 0x26f   : > { %v542_v42 = vmul.f32 %v5183_v60, %v2942_v57  ;;  %2508 = vrcp.f32 %v1817_v29  ;;  %v5186_v57 = vld [vmem:[#allocation50_spill] sm:$0xff] }
 0x270   : > { %v4282_v35 = vadd.f32 %v1380_v32, %v1254_v3  ;;  %v4284_v50 = vadd.f32 %v1381_v45, %v1255_v47  ;;  %v1642_v23 = vpop.permute.xlu0 %1641  ;;  %v621_v47 = vmul.f32 %v3359_v31, %v591_v54  ;;  %v5184_v31 = vld [vmem:[#allocation20_spill] sm:$0xff]  ;;  %v874_v15 = vsel %vm872_vm3, %v5186_v57, %v5185_v20 }
 0x272   : > { %v1559_v5 = vpop.permute.xlu1 %1558  ;;  %v669_v54 = vmul.f32 %v5184_v31, %v621_v47 }
 0x273   : > { %v1587_v49 = vsel %vm1582_vm8, %v1559_v5, %v5182_v6  ;;  %v1595_v7 = vsel %vm1582_vm8, %v5182_v6, %v1559_v5  ;;  %v5187_v6 = vld [vmem:[#allocation16_spill] sm:$0xff] }
 0x274   : > { %v1620_v0 = vmul.f32 %v3994_v33, %v1587_v49  ;;  %v1621_v55 = vmul.f32 %v3997_v51, %v1595_v7  ;;  %v1557_v3 = vpop.permute.xlu0 %1556  ;;  %v810_v49 = vmul.f32 %v5187_v6, %v762_v30  ;;  %v811_v7 = vmul.f32 %v5187_v6, %v763_v61 }
 0x275   : > { %v685_v60 = vadd.f32 %v669_v54, %v542_v42  ;;  %v905_v30 = vmul.f32 %v3390_v52, %v874_v15  ;;  %v5188_v42 = vld [vmem:[#allocation34_spill] sm:$0xff] }
 0x276   : > { %v1668_v24 = vmul.f32 %v1646_v56, %v1620_v0  ;;  %v1669_v32 = vmul.f32 %v1646_v56, %v1621_v55  ;;  %v1561_v45 = vpop.permute.xlu1 %1560  ;;  %v668_v56 = vmul.f32 %v5184_v31, %v620_v13 }
 0x278   : > { %v1573_v5 = vpop.permute.xlu0 %1572  ;;  %v4319_v14 = vadd.f32 %v1668_v24, %v4072_v17  ;;  %v4322_v53 = vadd.f32 %v1669_v32, %v4075_v48  ;;  %v882_v17 = vsel %vm872_vm3, %v5185_v20, %v5186_v57  ;;  %v684_v32 = vadd.f32 %v668_v56, %v541_v10 }
 0x279   : > { %v1586_v25 = vsel %vm1582_vm8, %v1557_v3, %v1573_v5  ;;  %v1594_v44 = vsel %vm1582_vm8, %v1573_v5, %v1557_v3  ;;  %v904_v5 = vmul.f32 %v3387_v19, %v882_v17  ;;  %v827_v20 = vadd.f32 %v811_v7, %v685_v60 }
 0x27a   : > { %v1618_v48 = vmul.f32 %v3994_v33, %v1586_v25  ;;  %v1619_v38 = vmul.f32 %v3997_v51, %v1594_v44  ;;  %v1577_v59 = vpop.permute.xlu1 %1576  ;;  %v826_v44 = vadd.f32 %v810_v49, %v684_v32  ;;  %v4364_v52 = vpop.eup %2506  ;;  %v953_v56 = vmul.f32 %v5188_v42, %v905_v30 }
 0x27b   : > { %v1588_v29 = vsel %vm1582_vm8, %v1561_v45, %v1577_v59  ;;  %v1596_v0 = vsel %vm1582_vm8, %v1577_v59, %v1561_v45  ;;  %v5190_v59 = vld [vmem:[#allocation101_spill] sm:$0xff]  ;;  %v1848_v7 = vmul.f32 1.0614054, %v4364_v52 }
 0x27c   : > { %v1666_v55 = vmul.f32 %v1642_v23, %v1618_v48  ;;  %v1667_v3 = vmul.f32 %v1642_v23, %v1619_v38  ;;  %v1622_v13 = vmul.f32 %v3994_v33, %v1588_v29  ;;  %v1623_v47 = vmul.f32 %v3997_v51, %v1596_v0  ;;  %v1411_v24 = vpop.permute.xlu0 %1410  ;;  %v5189_v48 = vld [vmem:[#allocation100_spill] sm:$0xff]  ;;  %v4385_v29 = vpop.eup %2508 }
 0x27d   : > { %v969_v17 = vadd.f32 %v953_v56, %v827_v20  ;;  %v1849_v60 = vmul.f32 1.0614054, %v4385_v29 }
 0x27e   : > { %v1670_v61 = vmul.f32 %v4120_v37, %v1622_v13  ;;  %v1671_v31 = vmul.f32 %v4120_v37, %v1623_v47  ;;  %v1127_v25 = vpop.permute.xlu1 %1126  ;;  %v4353_v45 = vadd.f32 %v1666_v55, %v4191_v62  ;;  %v4356_v23 = vadd.f32 %v1667_v3, %v4194_v12 }
 0x27f   : > { %v952_v37 = vmul.f32 %v5188_v42, %v904_v5  ;;  %v1111_v55 = vadd.f32 %v4235_v21, %v969_v17  ;;  %v1864_v5 = vadd.f32 -1.4531521, %v1848_v7  ;;  %v1992_v17 = vsub.f32 0.0, %v4253_v63 }
 0x280   : > { %v1427_v57 = vpop.permute.xlu0 %1426  ;;  %v4359_v10 = vadd.f32 %v1670_v61, %v4130_v22  ;;  %v4362_v19 = vadd.f32 %v1671_v31, %v4133_v27 }
 0x281   : > { %v4369_v62 = vsel %vm1440_vm5, %v1411_v24, %v1427_v57  ;;  %v4373_v12 = vsel %vm1440_vm5, %v1427_v57, %v1411_v24  ;;  %v968_v22 = vadd.f32 %v952_v37, %v826_v44  ;;  %v1880_v44 = vmul.f32 %v4364_v52, %v1864_v5 }
 0x282   : > { %v1143_v54 = vpop.permute.xlu1 %1142  ;;  %v2008_v5 = vmul.f32 %v1992_v17, %v4253_v63 }
 0x283   : > { %v1158_v27 = vsel %vm1156_vm7, %v1127_v25, %v1143_v54  ;;  %v1166_v15 = vsel %vm1156_vm7, %v1143_v54, %v1127_v25  ;;  %v1110_v0 = vadd.f32 %v4223_v34, %v968_v22  ;;  %v1865_v25 = vadd.f32 -1.4531521, %v1849_v60 }
 0x284   : > { %v1188_v38 = vmul.f32 %v5189_v48, %v1158_v27  ;;  %v1189_v6 = vmul.f32 %v5190_v59, %v1166_v15  ;;  %v4382_v49 = vpop.permute.xlu0 %1633  ;;  %v1896_v22 = vadd.f32 1.4214138, %v1880_v44 }
 0x285   : > { %5191 = vst [vmem:[#allocation28_spill] sm:$0xff] %v4382_v49  ;;  %v1881_v54 = vmul.f32 %v4385_v29, %v1865_v25 }
 0x286   : > { %v1236_v3 = vmul.f32 %v4217_v41, %v1188_v38  ;;  %v1237_v13 = vmul.f32 %v4217_v41, %v1189_v6  ;;  %v4391_v47 = vpop.permute.xlu1 %1349 }
 0x288   : > { %v4393_v24 = vadd.f32 %v1236_v3, %v1110_v0  ;;  %v4395_v32 = vadd.f32 %v1237_v13, %v1111_v55  ;;  %v1897_v0 = vadd.f32 1.4214138, %v1881_v54  ;;  %v1912_v55 = vmul.f32 %v4364_v52, %v1896_v22 }
 0x289   : > { %v1738_v30 = vpop.permute.xlu0 %1737  ;;  %v1993_v3 = vsub.f32 0.0, %v4270_v2 }
 0x28a   : > { %v4399_v61 = vadd.f32 %v1738_v30, %v4264_v39  ;;  %v4402_v34 = vadd.f32 %v1738_v30, %v4267_v9  ;;  %v1413_v21 = vpop.permute.xlu1 %1412  ;;  %v1913_v25 = vmul.f32 %v4385_v29, %v1897_v0  ;;  %v1928_v44 = vadd.f32 -0.28449672, %v1912_v55 }
 0x28c   : > { %v4405_v31 = vmul.f32 0.70710677, %v4399_v61  ;;  %v4408_v41 = vmul.f32 0.70710677, %v4402_v34 }
 0x28e   : > { %v4412_v20 = vand.u32 2147483647, %v4405_v31  ;;  %v4415_v57 = vand.u32 2147483647, %v4408_v41  ;;  %v1429_v39 = vpop.permute.xlu1 %1428  ;;  %vm2090_vm11 = vcmp.ge.f32.partialorder %v4405_v31, 0.0  ;;  %vm2091_vm12 = vcmp.ge.f32.partialorder %v4408_v41, 0.0 }
 0x28f   : > { %v1443_v9 = vsel %vm1440_vm5, %v1413_v21, %v1429_v39  ;;  %v1451_v42 = vsel %vm1440_vm5, %v1429_v39, %v1413_v21  ;;  %v2009_v39 = vmul.f32 %v1993_v3, %v4270_v2 }
 0x290   : > { %v1802_v37 = vmul.f32 0.3275911, %v4412_v20  ;;  %v1803_v56 = vmul.f32 0.3275911, %v4415_v57  ;;  %v1474_v27 = vmul.f32 %v3578_v11, %v1443_v9  ;;  %v1475_v15 = vmul.f32 %v3581_v4, %v1451_v42 }
 0x291   : > { %v1994_v3 = vsub.f32 0.0, %v4412_v20 }
 0x292   : > { %v1818_v48 = vadd.f32 1.0, %v1802_v37  ;;  %v1819_v38 = vadd.f32 1.0, %v1803_v56  ;;  %v4427_v59 = vpop.permute.xlu1 %1637  ;;  %v1522_v6 = vmul.f32 %v4279_v18, %v1474_v27  ;;  %v1523_v7 = vmul.f32 %v4279_v18, %v1475_v15 }
 0x293   : > { %v1944_v37 = vmul.f32 %v4364_v52, %v1928_v44  ;;  %v2038_v56 = vmul.f32 1.442695, %v2009_v39  ;;  %v2010_v49 = vmul.f32 %v1994_v3, %v4412_v20 }
 0x294   : > { %2510 = vrcp.f32 %v1818_v48  ;;  %v4434_v13 = vadd.f32 %v1522_v6, %v4282_v35  ;;  %v4437_v60 = vadd.f32 %v1523_v7, %v4284_v50  ;;  %v2036_v35 = vmul.f32 1.442695, %v2008_v5 }
 0x295   : > { %2512 = vrcp.f32 %v1819_v38  ;;  %v1995_v5 = vsub.f32 0.0, %v4415_v57 }
 0x296   : > { %2514 = vpow2.f32 %v2036_v35 }
 0x297   : > { %v1723_v30 = vpop.permute.xlu1 %1722  ;;  %2516 = vpow2.f32 %v2038_v56 }
 0x298   : > { %v4441_v21 = vadd.f32 %v1723_v30, %v4319_v14  ;;  %v4444_v18 = vadd.f32 %v1723_v30, %v4322_v53  ;;  %v1929_v53 = vadd.f32 -0.28449672, %v1913_v25 }
 0x29a   : > { %5192 = vst [vmem:[#allocation73_spill] sm:$0xff] %v4441_v21  ;;  %5193 = vst [vmem:[#allocation69_spill] sm:$0xff] %v4444_v18  ;;  %v4449_v9 = vmul.f32 0.70710677, %v4441_v21  ;;  %v4452_v50 = vmul.f32 0.70710677, %v4444_v18  ;;  %v1945_v7 = vmul.f32 %v4385_v29, %v1929_v53 }
 0x29b   : > { %v1728_v63 = vpop.permute.xlu1 %1727 }
 0x29c   : > { %v1780_v42 = vand.u32 2147483647, %v4449_v9  ;;  %v4456_v14 = vand.u32 2147483647, %v4452_v50  ;;  %v4460_v54 = vadd.f32 %v1728_v63, %v4359_v10  ;;  %v4463_v2 = vadd.f32 %v1728_v63, %v4362_v19 }
 0x29d   : > { %v1960_v10 = vadd.f32 0.2548296, %v1944_v37  ;;  %v1961_v37 = vadd.f32 0.2548296, %v1945_v7  ;;  %v1551_v7 = vpop.permute.xlu0 %1550  ;;  %vm2084_vm13 = vcmp.ge.f32.partialorder %v4449_v9, 0.0  ;;  %vm2085_vm14 = vcmp.ge.f32.partialorder %v4452_v50, 0.0 }
 0x29e   : > { %5194 = vst [vmem:[#allocation36_spill] sm:$0xff] %v4463_v2  ;;  %v1796_v22 = vmul.f32 0.3275911, %v1780_v42  ;;  %v1797_v27 = vmul.f32 0.3275911, %v4456_v14 }
 0x29f   : > { %v4467_v15 = vmul.f32 0.70710677, %v4460_v54  ;;  %v4470_v17 = vmul.f32 0.70710677, %v4463_v2  ;;  %v1269_v48 = vpop.permute.xlu1 %1268  ;;  %v1976_v56 = vmul.f32 %v4364_v52, %v1960_v10  ;;  %v1988_v52 = vsub.f32 0.0, %v1780_v42 }
 0x2a0   : > { %v1812_v38 = vadd.f32 1.0, %v1796_v22  ;;  %v1813_v6 = vadd.f32 1.0, %v1797_v27  ;;  %v1472_v22 = vmul.f32 %v3578_v11, %v4369_v62  ;;  %v1473_v27 = vmul.f32 %v3581_v4, %v4373_v12 }
 0x2a1   : > { %v4473_v0 = vpop.eup %2510  ;;  %v1782_v19 = vand.u32 2147483647, %v4467_v15  ;;  %v1783_v55 = vand.u32 2147483647, %v4470_v17  ;;  %vm2086_vm15 = vcmp.ge.f32.partialorder %v4467_v15, 0.0  ;;  %vm2087_vm0 = vcmp.ge.f32.partialorder %v4470_v17, 0.0 }
 0x2a2   : > { %2518 = vrcp.f32 %v1812_v38  ;;  %v4479_v30 = vpop.eup %2512  ;;  %v1850_v35 = vmul.f32 1.0614054, %v4473_v0 }
 0x2a3   : > { %2520 = vrcp.f32 %v1813_v6  ;;  %v1798_v25 = vmul.f32 0.3275911, %v1782_v19  ;;  %v1799_v44 = vmul.f32 0.3275911, %v1783_v55  ;;  %v1285_v39 = vpop.permute.xlu1 %1284  ;;  %v1851_v2 = vmul.f32 1.0614054, %v4479_v30 }
 0x2a4   : > { %v1300_v63 = vsel %vm1298_vm6, %v1269_v48, %v1285_v39  ;;  %v1308_v53 = vsel %vm1298_vm6, %v1285_v39, %v1269_v48  ;;  %v2011_v48 = vmul.f32 %v1995_v5, %v4415_v57  ;;  %v1866_v62 = vadd.f32 -1.4531521, %v1850_v35 }
 0x2a5   : > { %v1814_v38 = vadd.f32 1.0, %v1798_v25  ;;  %v1815_v6 = vadd.f32 1.0, %v1799_v44  ;;  %v1330_v21 = vmul.f32 %v3566_v40, %v1300_v63  ;;  %v1331_v18 = vmul.f32 %v3569_v36, %v1308_v53  ;;  %v2515_v53 = vpop.eup %2514 }
 0x2a6   : > { %v1989_v39 = vsub.f32 0.0, %v4456_v14  ;;  %v1990_v3 = vsub.f32 0.0, %v1782_v19  ;;  %v1867_v36 = vadd.f32 -1.4531521, %v1851_v2  ;;  %v1991_v44 = vsub.f32 0.0, %v1783_v55 }
 0x2a7   : > { %2522 = vrcp.f32 %v1814_v38  ;;  %v1492_v10 = vpop.permute.xlu1 %1491  ;;  %v1378_v12 = vmul.f32 %v4391_v47, %v1330_v21  ;;  %v1379_v20 = vmul.f32 %v4391_v47, %v1331_v18  ;;  %v1882_v5 = vmul.f32 %v4473_v0, %v1866_v62 }
 0x2a8   : > { %2524 = vrcp.f32 %v1815_v6  ;;  %v1520_v40 = vmul.f32 %v1492_v10, %v1472_v22  ;;  %v1521_v25 = vmul.f32 %v1492_v10, %v1473_v27  ;;  %v2004_v35 = vmul.f32 %v1988_v52, %v1780_v42  ;;  %v2517_v10 = vpop.eup %2516 }
 0x2a9   : > { %v1394_v63 = vadd.f32 %v1378_v12, %v4393_v24  ;;  %v1395_v57 = vadd.f32 %v1379_v20, %v4395_v32  ;;  %v1883_v6 = vmul.f32 %v4479_v30, %v1867_v36  ;;  %v1977_v21 = vmul.f32 %v4385_v29, %v1961_v37  ;;  %v1567_v32 = vpop.permute.xlu0 %1566 }
 0x2aa   : > { %v2005_v47 = vmul.f32 %v1989_v39, %v4456_v14  ;;  %v4511_v22 = vmul.f32 %v2515_v53, %v1976_v56  ;;  %v2040_v24 = vmul.f32 1.442695, %v2010_v49  ;;  %v2006_v27 = vmul.f32 %v1990_v3, %v1782_v19 }
 0x2ab   : > { %v4502_v38 = vpop.permute.xlu1 %1554  ;;  %v4507_v18 = vadd.f32 %v1520_v40, %v1394_v63  ;;  %v4509_v2 = vadd.f32 %v1521_v25, %v1395_v57  ;;  %v2042_v62 = vmul.f32 1.442695, %v2011_v48  ;;  %v2007_v42 = vmul.f32 %v1991_v44, %v1783_v55 }
 0x2ac   : > { %v1898_v52 = vadd.f32 1.4214138, %v1882_v5  ;;  %v2028_v20 = vmul.f32 1.442695, %v2004_v35  ;;  %v1899_v29 = vadd.f32 1.4214138, %v1883_v6  ;;  %v4515_v37 = vmul.f32 %v2517_v10, %v1977_v21 }
 0x2ad   : > { %v1583_v56 = vsel %vm1582_vm8, %v1551_v7, %v1567_v32  ;;  %v2030_v39 = vmul.f32 1.442695, %v2005_v47  ;;  %v2072_v19 = vsub.f32 1.0, %v4511_v22  ;;  %2526 = vpow2.f32 %v2040_v24 }
 0x2ae   : > { %v1591_v55 = vsel %vm1582_vm8, %v1567_v32, %v1551_v7  ;;  %v2032_v3 = vmul.f32 1.442695, %v2006_v27  ;;  %2528 = vpow2.f32 %v2042_v62  ;;  %v2034_v25 = vmul.f32 1.442695, %v2007_v42 }
 0x2af   : > { %v4513_v12 = vpop.eup %2518  ;;  %v1571_v36 = vpop.permute.xlu1 %1570  ;;  %v1914_v44 = vmul.f32 %v4473_v0, %v1898_v52  ;;  %2530 = vpow2.f32 %v2028_v20  ;;  %v1915_v5 = vmul.f32 %v4479_v30, %v1899_v29  ;;  %v2073_v53 = vsub.f32 1.0, %v4515_v37 }
 0x2b0   : > { %v4517_v14 = vpop.eup %2520  ;;  %v1844_v49 = vmul.f32 1.0614054, %v4513_v12  ;;  %v1612_v6 = vmul.f32 %v3994_v33, %v1583_v56  ;;  %2532 = vpow2.f32 %v2030_v39  ;;  %v2104_v21 = vsub.f32 0.0, %v2072_v19 }
 0x2b1   : > { %v1845_v48 = vmul.f32 1.0614054, %v4517_v14  ;;  %v1613_v24 = vmul.f32 %v3997_v51, %v1591_v55  ;;  %2534 = vpow2.f32 %v2032_v3  ;;  %v1930_v42 = vadd.f32 -0.28449672, %v1914_v44 }
 0x2b2   : > { %v1860_v40 = vadd.f32 -1.4531521, %v1844_v49  ;;  %2536 = vpow2.f32 %v2034_v25  ;;  %v1585_v29 = vsel %vm1582_vm8, %v4502_v38, %v1571_v36  ;;  %v1931_v49 = vadd.f32 -0.28449672, %v1915_v5 }
 0x2b3   : > { %v1861_v63 = vadd.f32 -1.4531521, %v1845_v48  ;;  %v1409_v57 = vpop.permute.xlu1 %1408 }
 0x2b4   : > { %v4529_v35 = vpop.eup %2522  ;;  %v1876_v7 = vmul.f32 %v4513_v12, %v1860_v40 }
 0x2b5   : > { %v4535_v47 = vpop.eup %2524  ;;  %v1877_v32 = vmul.f32 %v4517_v14, %v1861_v63  ;;  %v1846_v27 = vmul.f32 1.0614054, %v4529_v35 }
 0x2b6   : > { %v1892_v10 = vadd.f32 1.4214138, %v1876_v7  ;;  %v1847_v62 = vmul.f32 1.0614054, %v4535_v47 }
 0x2b7   : > { %v1893_v52 = vadd.f32 1.4214138, %v1877_v32  ;;  %v1862_v20 = vadd.f32 -1.4531521, %v1846_v27  ;;  %v1425_v56 = vpop.permute.xlu1 %1424  ;;  %v1593_v32 = vsel %vm1582_vm8, %v1571_v36, %v4502_v38  ;;  %v1946_v27 = vmul.f32 %v4473_v0, %v1930_v42 }
 0x2b8   : > { %v1908_v39 = vmul.f32 %v4513_v12, %v1892_v10  ;;  %v1863_v55 = vadd.f32 -1.4531521, %v1847_v62  ;;  %v1441_v48 = vsel %vm1440_vm5, %v1409_v57, %v1425_v56  ;;  %v1449_v3 = vsel %vm1440_vm5, %v1425_v56, %v1409_v57 }
 0x2b9   : > { %v1909_v40 = vmul.f32 %v4517_v14, %v1893_v52  ;;  %v1878_v25 = vmul.f32 %v4529_v35, %v1862_v20  ;;  %v1470_v44 = vmul.f32 %v3578_v11, %v1441_v48  ;;  %v1471_v63 = vmul.f32 %v3581_v4, %v1449_v3 }
 0x2ba   : > { %v1924_v7 = vadd.f32 -0.28449672, %v1908_v39  ;;  %v1879_v5 = vmul.f32 %v4535_v47, %v1863_v55  ;;  %v1616_v11 = vmul.f32 %v3994_v33, %v1585_v29  ;;  %v1947_v36 = vmul.f32 %v4479_v30, %v1931_v49  ;;  %v2527_v42 = vpop.eup %2526 }
 0x2bb   : > { %v1925_v10 = vadd.f32 -0.28449672, %v1909_v40  ;;  %v1894_v62 = vadd.f32 1.4214138, %v1878_v25  ;;  %v1518_v57 = vmul.f32 %v4229_v8, %v1470_v44  ;;  %v1519_v52 = vmul.f32 %v4229_v8, %v1471_v63  ;;  %v1630_v20 = vpop.permute.xlu1 %1629  ;;  %v2529_v44 = vpop.eup %2528 }
 0x2bc   : > { %v1895_v56 = vadd.f32 1.4214138, %v1879_v5  ;;  %v1660_v4 = vmul.f32 %v1630_v20, %v1612_v6  ;;  %v1661_v39 = vmul.f32 %v1630_v20, %v1613_v24  ;;  %v1940_v3 = vmul.f32 %v4513_v12, %v1924_v7  ;;  %v2531_v5 = vpop.eup %2530 }
 0x2bd   : > { %v1910_v55 = vmul.f32 %v4529_v35, %v1894_v62  ;;  %v1534_v48 = vadd.f32 %v1518_v57, %v4255_v1  ;;  %v1535_v38 = vadd.f32 %v1519_v52, %v4257_v58  ;;  %v1941_v40 = vmul.f32 %v4517_v14, %v1925_v10  ;;  %v1703_v62 = vpop.permute.xlu0 %1702 }
 0x2be   : > { %v1911_v8 = vmul.f32 %v4535_v47, %v1895_v56  ;;  %v1962_v25 = vadd.f32 0.2548296, %v1946_v27  ;;  %v1617_v6 = vmul.f32 %v3997_v51, %v1593_v32  ;;  %v1664_v58 = vmul.f32 %v4427_v59, %v1616_v11  ;;  %v2533_v27 = vpop.eup %2532 }
 0x2bf   : > { %v1926_v29 = vadd.f32 -0.28449672, %v1910_v55  ;;  %v1676_v24 = vadd.f32 %v1660_v4, %v1534_v48  ;;  %v1677_v63 = vadd.f32 %v1661_v39, %v1535_v38  ;;  %v2105_v49 = vsub.f32 0.0, %v2073_v53  ;;  %v2535_v20 = vpop.eup %2534 }
 0x2c0   : > { %v1927_v1 = vadd.f32 -0.28449672, %v1911_v8  ;;  %v2120_v7 = vsel %vm2088_vm9, %v2072_v19, %v2104_v21  ;;  %v1963_v52 = vadd.f32 0.2548296, %v1947_v36  ;;  %v1956_v56 = vadd.f32 0.2548296, %v1940_v3  ;;  %v2537_v55 = vpop.eup %2536 }
 0x2c1   : > { %v1942_v10 = vmul.f32 %v4529_v35, %v1926_v29  ;;  %v4578_v57 = vadd.f32 %v1703_v62, %v1676_v24  ;;  %v4580_v32 = vadd.f32 %v1703_v62, %v1677_v63  ;;  %v1957_v11 = vadd.f32 0.2548296, %v1941_v40 }
 0x2c2   : > { %v1943_v4 = vmul.f32 %v4535_v47, %v1927_v1  ;;  %v1978_v39 = vmul.f32 %v4473_v0, %v1962_v25  ;;  %v1665_v46 = vmul.f32 %v4427_v59, %v1617_v6  ;;  %v2152_v38 = vadd.f32 1.0, %v2120_v7  ;;  %v1713_v25 = vpop.permute.xlu1 %1712 }
 0x2c3   : > { %v1958_v22 = vadd.f32 0.2548296, %v1942_v10  ;;  %v4586_v19 = vmul.f32 0.70710677, %v4578_v57  ;;  %v4589_v21 = vmul.f32 0.70710677, %v4580_v32  ;;  %v2121_v59 = vsel %vm2089_vm10, %v2073_v53, %v2105_v49 }
 0x2c4   : > { %v1959_v48 = vadd.f32 0.2548296, %v1943_v4  ;;  %v1973_v40 = vmul.f32 %v4517_v14, %v1957_v11  ;;  %v1979_v43 = vmul.f32 %v4479_v30, %v1963_v52  ;;  %v2058_v29 = vmul.f32 %v2527_v42, %v1978_v39 }
 0x2c5   : > { %v1974_v36 = vmul.f32 %v4529_v35, %v1958_v22  ;;  %v4594_v3 = vand.u32 2147483647, %v4586_v19  ;;  %v4597_v0 = vand.u32 2147483647, %v4589_v21  ;;  %v1972_v6 = vmul.f32 %v4513_v12, %v1956_v56 }
 0x2c6   : > { %v1975_v8 = vmul.f32 %v4535_v47, %v1959_v48  ;;  %v1680_v24 = vadd.f32 %v1664_v58, %v4434_v13  ;;  %v1681_v63 = vadd.f32 %v1665_v46, %v4437_v60  ;;  %v2136_v1 = vmul.f32 0.5, %v4201_v16  ;;  %v1718_v11 = vpop.permute.xlu1 %1717 }
 0x2c7   : > { %v1788_v35 = vmul.f32 0.3275911, %v4594_v3  ;;  %v1789_v53 = vmul.f32 0.3275911, %v4597_v0  ;;  %v2153_v14 = vadd.f32 1.0, %v2121_v59  ;;  %v2054_v62 = vmul.f32 %v2535_v20, %v1974_v36 }
 0x2c8   : > { %v2055_v37 = vmul.f32 %v2537_v55, %v1975_v8  ;;  %v4610_v49 = vadd.f32 %v1713_v25, %v1680_v24  ;;  %v4612_v30 = vadd.f32 %v1713_v25, %v1681_v63  ;;  %v2137_v12 = vmul.f32 0.5, %v4220_v28 }
 0x2c9   : > { %v1804_v47 = vadd.f32 1.0, %v1788_v35  ;;  %v2053_v42 = vmul.f32 %v2533_v27, %v1973_v40  ;;  %v2059_v7 = vmul.f32 %v2529_v44, %v1979_v43  ;;  %v2074_v10 = vsub.f32 1.0, %v2058_v29 }
 0x2ca   : > { %v2138_v13 = vmul.f32 0.5, %v4399_v61  ;;  %v2139_v60 = vmul.f32 0.5, %v4402_v34  ;;  %v2052_v16 = vmul.f32 %v2531_v5, %v1972_v6  ;;  %v4617_v58 = vmul.f32 %v2152_v38, %v2136_v1  ;;  %v1553_v25 = vpop.permute.xlu1 %1552 }
 0x2cb   : > { %v2071_v52 = vsub.f32 1.0, %v2055_v37  ;;  %v1805_v20 = vadd.f32 1.0, %v1789_v53  ;;  %v4620_v56 = vmul.f32 %v2153_v14, %v2137_v12  ;;  %v2070_v4 = vsub.f32 1.0, %v2054_v62 }
 0x2cc   : > { %2538 = vrcp.f32 %v1804_v47  ;;  %v4623_v28 = vmul.f32 0.70710677, %v4610_v49  ;;  %v4626_v44 = vmul.f32 0.70710677, %v4612_v30  ;;  %v2069_v61 = vsub.f32 1.0, %v2053_v42 }
 0x2cd   : > { %v2075_v34 = vsub.f32 1.0, %v2059_v7  ;;  %v2106_v5 = vsub.f32 0.0, %v2074_v10  ;;  %v2068_v27 = vsub.f32 1.0, %v2052_v16  ;;  %v2103_v22 = vsub.f32 0.0, %v2071_v52  ;;  %v5195_v16 = vld [vmem:[#allocation36_spill] sm:$0xff] }
 0x2ce   : > { %v4631_v39 = vand.u32 2147483647, %v4623_v28  ;;  %v4634_v55 = vand.u32 2147483647, %v4626_v44  ;;  %2540 = vrcp.f32 %v1805_v20  ;;  %v2102_v46 = vsub.f32 0.0, %v2070_v4 }
 0x2cf   : > { %v2101_v36 = vsub.f32 0.0, %v2069_v61  ;;  %v2107_v59 = vsub.f32 0.0, %v2075_v34  ;;  %v2122_v40 = vsel %vm2090_vm11, %v2074_v10, %v2106_v5  ;;  %v4644_v8 = vadd.f32 %v1718_v11, %v4353_v45  ;;  %v1569_v10 = vpop.permute.xlu1 %1568 }
 0x2d0   : > { %v1792_v48 = vmul.f32 0.3275911, %v4631_v39  ;;  %v1793_v38 = vmul.f32 0.3275911, %v4634_v55  ;;  %v2100_v43 = vsub.f32 0.0, %v2068_v27  ;;  %v2154_v35 = vadd.f32 1.0, %v2122_v40 }
 0x2d1   : > { %v2119_v24 = vsel %vm2087_vm0, %v2071_v52, %v2103_v22  ;;  %v2123_v17 = vsel %vm2091_vm12, %v2075_v34, %v2107_v59  ;;  %v4649_v63 = vadd.f32 %v1718_v11, %v4356_v23  ;;  %v4652_v1 = vmul.f32 0.70710677, %v4644_v8  ;;  %v5197_v22 = vld [vmem:[#allocation73_spill] sm:$0xff] }
 0x2d2   : > { %v1808_v29 = vadd.f32 1.0, %v1792_v48  ;;  %v1809_v6 = vadd.f32 1.0, %v1793_v38  ;;  %v2118_v31 = vsel %vm2086_vm15, %v2070_v4, %v2102_v46  ;;  %v2155_v45 = vadd.f32 1.0, %v2123_v17 }
 0x2d3   : > { %v2170_v37 = vmul.f32 %v2154_v35, %v2138_v13  ;;  %v2117_v53 = vsel %vm2085_vm14, %v2069_v61, %v2101_v36  ;;  %v4659_v14 = vmul.f32 0.70710677, %v4649_v63  ;;  %v1778_v41 = vand.u32 2147483647, %v4652_v1 }
 0x2d4   : > { %2542 = vrcp.f32 %v1808_v29  ;;  %v2116_v23 = vsel %vm2084_vm13, %v2068_v27, %v2100_v43  ;;  %v2151_v62 = vadd.f32 1.0, %v2119_v24  ;;  %v2171_v47 = vmul.f32 %v2155_v45, %v2139_v60 }
 0x2d5   : > { %2544 = vrcp.f32 %v1809_v6  ;;  %v2182_v15 = vpack.c.bf16 %v2170_v37, %v4617_v58  ;;  %v2150_v12 = vadd.f32 1.0, %v2118_v31  ;;  %v1779_v42 = vand.u32 2147483647, %v4659_v14  ;;  %v5196_v58 = vld [vmem:[#allocation69_spill] sm:$0xff]  ;;  %v5198_v31 = vld [vmem:[#allocation28_spill] sm:$0xff] }
 0x2d6   : > { %v1794_v7 = vmul.f32 0.3275911, %v1778_v41  ;;  %v2149_v50 = vadd.f32 1.0, %v2117_v53  ;;  %v2134_v13 = vmul.f32 0.5, %v4460_v54  ;;  %v2135_v52 = vmul.f32 0.5, %v5195_v16 }
 0x2d7   : > { %v2183_v20 = vpack.c.bf16 %v2171_v47, %v4620_v56  ;;  %v2148_v9 = vadd.f32 1.0, %v2116_v23  ;;  %v1984_v4 = vsub.f32 0.0, %v4631_v39  ;;  %v1795_v60 = vmul.f32 0.3275911, %v1779_v42 }
 0x2d8   : > { %v1810_v61 = vadd.f32 1.0, %v1794_v7  ;;  %v2133_v34 = vmul.f32 0.5, %v5196_v58  ;;  %v2167_v5 = vmul.f32 %v2151_v62, %v2135_v52  ;;  %v1985_v27 = vsub.f32 0.0, %v4634_v55 }
 0x2d9   : > { %v4669_v11 = vpop.eup %2538  ;;  %2233 = vmatprep.subr.bf16.mxu1 %v2183_v20  ;;  %v1584_v54 = vsel %vm1582_vm8, %v1553_v25, %v1569_v10  ;;  %v2132_v46 = vmul.f32 0.5, %v5197_v22  ;;  %v2166_v48 = vmul.f32 %v2150_v12, %v2134_v13  ;;  %v1811_v56 = vadd.f32 1.0, %v1795_v60 }
 0x2da   : > { %2234 = vmatpush1.bf16.msra.mxu1 %v2182_v15  ;;  %2546 = vrcp.f32 %v1810_v61  ;;  %v2165_v36 = vmul.f32 %v2149_v50, %v2133_v34  ;;  %v1836_v59 = vmul.f32 1.0614054, %v4669_v11  ;;  %v1592_v40 = vsel %vm1582_vm8, %v1569_v10, %v1553_v25 }
 0x2db   : > { %v4677_v38 = vpop.eup %2540  ;;  %v1614_v43 = vmul.f32 %v3994_v33, %v1584_v54  ;;  %v2164_v29 = vmul.f32 %v2148_v9, %v2132_v46  ;;  %v2000_v6 = vmul.f32 %v1984_v4, %v4631_v39  ;;  %2548 = vrcp.f32 %v1811_v56 }
 0x2dc   : > { %v1615_v35 = vmul.f32 %v3997_v51, %v1592_v40  ;;  %v2001_v24 = vmul.f32 %v1985_v27, %v4634_v55  ;;  %v1986_v17 = vsub.f32 0.0, %v1778_v41  ;;  %v2181_v37 = vpack.c.bf16 %v2167_v5, %v2165_v36  ;;  %v1708_v55 = vpop.permute.xlu1 %1707 }
 0x2dd   : > { %v1662_v45 = vmul.f32 %v5198_v31, %v1614_v43  ;;  %v1837_v53 = vmul.f32 1.0614054, %v4677_v38  ;;  %v1987_v23 = vsub.f32 0.0, %v1779_v42  ;;  %v2180_v25 = vpack.c.bf16 %v2166_v48, %v2164_v29 }
 0x2de   : > { %v1663_v26 = vmul.f32 %v5198_v31, %v1615_v35  ;;  %v1852_v62 = vadd.f32 -1.4531521, %v1836_v59  ;;  %2235 = vmatprep.subr.bf16.mxu1 %v2181_v37  ;;  %v2020_v47 = vmul.f32 1.442695, %v2000_v6  ;;  %v2022_v7 = vmul.f32 1.442695, %v2001_v24 }
 0x2df   : > { %v1678_v33 = vadd.f32 %v1662_v45, %v4507_v18  ;;  %2236 = vmatpush1.bf16.msra.mxu1 %v2180_v25  ;;  %v2002_v10 = vmul.f32 %v1986_v17, %v1778_v41  ;;  %v1853_v13 = vadd.f32 -1.4531521, %v1837_v53  ;;  %v2003_v18 = vmul.f32 %v1987_v23, %v1779_v42 }
 0x2e0   : > { %v1679_v51 = vadd.f32 %v1663_v26, %v4509_v2  ;;  %v1868_v20 = vmul.f32 %v4669_v11, %v1852_v62  ;;  %v1980_v2 = vsub.f32 0.0, %v4594_v3  ;;  %v1981_v60 = vsub.f32 0.0, %v4597_v0 }
 0x2e1   : > { %v4690_v39 = vpop.eup %2542  ;;  %v4696_v50 = vadd.f32 %v1708_v55, %v1678_v33  ;;  %2550 = vpow2.f32 %v2020_v47  ;;  %v2024_v42 = vmul.f32 1.442695, %v2002_v10  ;;  %v1869_v5 = vmul.f32 %v4677_v38, %v1853_v13 }
 0x2e2   : > { %v4693_v15 = vpop.eup %2544  ;;  %v1840_v12 = vmul.f32 1.0614054, %v4690_v39  ;;  %v4699_v52 = vadd.f32 %v1708_v55, %v1679_v51  ;;  %2552 = vpow2.f32 %v2022_v7  ;;  %v2026_v54 = vmul.f32 1.442695, %v2003_v18 }
 0x2e3   : > { %v1841_v16 = vmul.f32 1.0614054, %v4693_v15  ;;  %v4704_v4 = vmul.f32 0.70710677, %v4696_v50  ;;  %v1884_v48 = vadd.f32 1.4214138, %v1868_v20  ;;  %v1996_v6 = vmul.f32 %v1980_v2, %v4594_v3 }
 0x2e4   : > { %v1856_v9 = vadd.f32 -1.4531521, %v1840_v12  ;;  %v4708_v41 = vmul.f32 0.70710677, %v4699_v52  ;;  %2554 = vpow2.f32 %v2024_v42  ;;  %v1885_v17 = vadd.f32 1.4214138, %v1869_v5 }
 0x2e5   : > { %v1857_v61 = vadd.f32 -1.4531521, %v1841_v16  ;;  %v1774_v34 = vand.u32 2147483647, %v4704_v4  ;;  %v1900_v53 = vmul.f32 %v4669_v11, %v1884_v48  ;;  %v1997_v3 = vmul.f32 %v1981_v60, %v4597_v0 }
 0x2e6   : > { %v1872_v58 = vmul.f32 %v4690_v39, %v1856_v9  ;;  %v4715_v22 = vand.u32 2147483647, %v4708_v41  ;;  %v2012_v47 = vmul.f32 1.442695, %v1996_v6  ;;  %v1901_v55 = vmul.f32 %v4677_v38, %v1885_v17 }
 0x2e7   : > { %v1873_v27 = vmul.f32 %v4693_v15, %v1857_v61  ;;  %v4717_v46 = vpop.eup %2546  ;;  %v1790_v36 = vmul.f32 0.3275911, %v1774_v34  ;;  %v1916_v13 = vadd.f32 -0.28449672, %v1900_v53  ;;  %v1982_v2 = vsub.f32 0.0, %v1774_v34 }
 0x2e8   : > { %v1888_v56 = vadd.f32 1.4214138, %v1872_v58  ;;  %v1842_v40 = vmul.f32 1.0614054, %v4717_v46  ;;  %v1791_v43 = vmul.f32 0.3275911, %v4715_v22  ;;  %v4721_v29 = vpop.eup %2548 }
 0x2e9   : > { %v1889_v59 = vadd.f32 1.4214138, %v1873_v27  ;;  %v1806_v24 = vadd.f32 1.0, %v1790_v36  ;;  %v1843_v45 = vmul.f32 1.0614054, %v4721_v29  ;;  %v1932_v36 = vmul.f32 %v4669_v11, %v1916_v13 }
 0x2ea   : > { %v1904_v35 = vmul.f32 %v4690_v39, %v1888_v56  ;;  %v1858_v37 = vadd.f32 -1.4531521, %v1842_v40  ;;  %v1807_v26 = vadd.f32 1.0, %v1791_v43  ;;  %v2014_v61 = vmul.f32 1.442695, %v1997_v3 }
 0x2eb   : > { %v1905_v31 = vmul.f32 %v4693_v15, %v1889_v59  ;;  %2556 = vrcp.f32 %v1806_v24  ;;  %v1859_v62 = vadd.f32 -1.4531521, %v1843_v45  ;;  %v1917_v42 = vadd.f32 -0.28449672, %v1901_v55 }
 0x2ec   : > { %v1920_v23 = vadd.f32 -0.28449672, %v1904_v35  ;;  %v1874_v33 = vmul.f32 %v4717_v46, %v1858_v37  ;;  %2558 = vpow2.f32 %v2026_v54  ;;  %v1983_v56 = vsub.f32 0.0, %v4715_v22 }
 0x2ed   : > { %v1921_v25 = vadd.f32 -0.28449672, %v1905_v31  ;;  %2560 = vrcp.f32 %v1807_v26  ;;  %v1875_v7 = vmul.f32 %v4721_v29, %v1859_v62  ;;  %v1998_v43 = vmul.f32 %v1982_v2, %v1774_v34 }
 0x2ee   : > { %v1936_v51 = vmul.f32 %v4690_v39, %v1920_v23  ;;  %v1890_v10 = vadd.f32 1.4214138, %v1874_v33  ;;  %v2551_v9 = vpop.eup %2550  ;;  %2562 = vpow2.f32 %v2012_v47  ;;  %v1933_v24 = vmul.f32 %v4677_v38, %v1917_v42 }
 0x2ef   : > { %v1937_v12 = vmul.f32 %v4693_v15, %v1921_v25  ;;  %v1891_v20 = vadd.f32 1.4214138, %v1875_v7  ;;  %v2553_v58 = vpop.eup %2552  ;;  %2564 = vpow2.f32 %v2014_v61  ;;  %v2128_v31 = vmul.f32 0.5, %v4610_v49 }
 0x2f0   : > { %v1952_v16 = vadd.f32 0.2548296, %v1936_v51  ;;  %v1906_v60 = vmul.f32 %v4717_v46, %v1890_v10  ;;  %v1999_v37 = vmul.f32 %v1983_v56, %v4715_v22  ;;  %v1948_v23 = vadd.f32 0.2548296, %v1932_v36 }
 0x2f1   : > { %v1953_v18 = vadd.f32 0.2548296, %v1937_v12  ;;  %v1907_v27 = vmul.f32 %v4721_v29, %v1891_v20  ;;  %v2555_v35 = vpop.eup %2554  ;;  %v2016_v34 = vmul.f32 1.442695, %v1998_v43  ;;  %vm2080_vm1 = vcmp.ge.f32.partialorder %v4623_v28, 0.0 }
 0x2f2   : > { %v1968_v0 = vmul.f32 %v4690_v39, %v1952_v16  ;;  %v1922_v48 = vadd.f32 -0.28449672, %v1906_v60  ;;  %v1949_v51 = vadd.f32 0.2548296, %v1933_v24  ;;  %vm2081_vm2 = vcmp.ge.f32.partialorder %v4626_v44, 0.0 }
 0x2f3   : > { %v1969_v5 = vmul.f32 %v4693_v15, %v1953_v18  ;;  %v1923_v40 = vadd.f32 -0.28449672, %v1907_v27  ;;  %v2018_v10 = vmul.f32 1.442695, %v1999_v37  ;;  %v1964_v13 = vmul.f32 %v4669_v11, %v1948_v23 }
 0x2f4   : > { %v2048_v54 = vmul.f32 %v2551_v9, %v1968_v0  ;;  %v1938_v6 = vmul.f32 %v4717_v46, %v1922_v48  ;;  %v2129_v16 = vmul.f32 0.5, %v4612_v30  ;;  %2566 = vpow2.f32 %v2016_v34 }
 0x2f5   : > { %v2049_v59 = vmul.f32 %v2553_v58, %v1969_v5  ;;  %v1939_v15 = vmul.f32 %v4721_v29, %v1923_v40  ;;  %v1965_v61 = vmul.f32 %v4677_v38, %v1949_v51  ;;  %vm2082_vm3 = vcmp.ge.f32.partialorder %v4652_v1, 0.0 }
 0x2f6   : > { %v2064_v39 = vsub.f32 1.0, %v2048_v54  ;;  %v1954_v45 = vadd.f32 0.2548296, %v1938_v6  ;;  %2568 = vpow2.f32 %v2018_v10  ;;  %vm2083_vm4 = vcmp.ge.f32.partialorder %v4659_v14, 0.0 }
 0x2f7   : > { %v2065_v17 = vsub.f32 1.0, %v2049_v59  ;;  %v1955_v26 = vadd.f32 0.2548296, %v1939_v15  ;;  %v2130_v36 = vmul.f32 0.5, %v4644_v8  ;;  %v2131_v1 = vmul.f32 0.5, %v4649_v63 }
 0x2f8   : > { %v4745_v53 = vpop.eup %2556  ;;  %v2096_v62 = vsub.f32 0.0, %v2064_v39  ;;  %v1970_v33 = vmul.f32 %v4717_v46, %v1954_v45  ;;  %vm2076_vm5 = vcmp.ge.f32.partialorder %v4586_v19, 0.0  ;;  %vm2077_vm6 = vcmp.ge.f32.partialorder %v4589_v21, 0.0 }
 0x2f9   : > { %v2559_v25 = vpop.eup %2558  ;;  %v1838_v3 = vmul.f32 1.0614054, %v4745_v53  ;;  %v2097_v49 = vsub.f32 0.0, %v2065_v17  ;;  %v1971_v22 = vmul.f32 %v4721_v29, %v1955_v26  ;;  %vm2078_vm7 = vcmp.ge.f32.partialorder %v4704_v4, 0.0 }
 0x2fa   : > { %v2561_v47 = vpop.eup %2560  ;;  %v2050_v55 = vmul.f32 %v2555_v35, %v1970_v33  ;;  %v2112_v46 = vsel %vm2080_vm1, %v2064_v39, %v2096_v62  ;;  %vm2079_vm8 = vcmp.ge.f32.partialorder %v4708_v41, 0.0  ;;  %v2126_v19 = vmul.f32 0.5, %v4696_v50  ;;  %v2504_v50 = vld [vmem:[%s4841_s5] sm:$0xff]   ;;  %v2191_v41 = vpop.permute.xlu1 %2190 }
 0x2fb   : > { %v1839_v12 = vmul.f32 1.0614054, %v2561_v47  ;;  %v1854_v7 = vadd.f32 -1.4531521, %v1838_v3  ;;  %v2051_v18 = vmul.f32 %v2559_v25, %v1971_v22  ;;  %v2113_v29 = vsel %vm2081_vm2, %v2065_v17, %v2097_v49  ;;  %v2563_v11 = vpop.eup %2562 }
 0x2fc   : > { %v2066_v20 = vsub.f32 1.0, %v2050_v55  ;;  %v2044_v42 = vmul.f32 %v2563_v11, %v1964_v13  ;;  %v2144_v28 = vadd.f32 1.0, %v2112_v46  ;;  %v2145_v27 = vadd.f32 1.0, %v2113_v29  ;;  %v2565_v44 = vpop.eup %2564 }
 0x2fd   : > { %v1855_v2 = vadd.f32 -1.4531521, %v1839_v12  ;;  %v1870_v9 = vmul.f32 %v4745_v53, %v1854_v7  ;;  %v2067_v0 = vsub.f32 1.0, %v2051_v18  ;;  %v2045_v40 = vmul.f32 %v2565_v44, %v1965_v61 }
 0x2fe   : > { %v2098_v60 = vsub.f32 0.0, %v2066_v20  ;;  %v2060_v35 = vsub.f32 1.0, %v2044_v42  ;;  %v2160_v24 = vmul.f32 %v2144_v28, %v2128_v31  ;;  %v2161_v17 = vmul.f32 %v2145_v27, %v2129_v16  ;;  %v2196_v27 = vpop.permute.xlu0 %2195 }
 0x2ff   : > { %v1871_v30 = vmul.f32 %v2561_v47, %v1855_v2  ;;  %v1886_v58 = vadd.f32 1.4214138, %v1870_v9  ;;  %v2099_v5 = vsub.f32 0.0, %v2067_v0  ;;  %v2061_v26 = vsub.f32 1.0, %v2045_v40 }
 0x300   : > { %v2114_v54 = vsel %vm2082_vm3, %v2066_v20, %v2098_v60  ;;  %v2092_v63 = vsub.f32 0.0, %v2060_v35  ;;  %v2125_v9 = vmul.f32 0.5, %v4580_v32  ;;  %v2127_v29 = vmul.f32 0.5, %v4699_v52  ;;  %v2505_v52 = vld [vmem:[%s4841_s5 + $0x8] sm:$0xff]  }
 0x301   : > { %v1887_v48 = vadd.f32 1.4214138, %v1871_v30  ;;  %v1902_v38 = vmul.f32 %v4745_v53, %v1886_v58  ;;  %v2115_v56 = vsel %vm2083_vm4, %v2067_v0, %v2099_v5  ;;  %v2146_v59 = vadd.f32 1.0, %v2114_v54  ;;  %v2567_v62 = vpop.eup %2566 }
 0x302   : > { %v2147_v43 = vadd.f32 1.0, %v2115_v56  ;;  %v2093_v51 = vsub.f32 0.0, %v2061_v26  ;;  %v2108_v55 = vsel %vm2076_vm5, %v2060_v35, %v2092_v63  ;;  %vm2218_vm9 = vcmask 523264   ;;  %v2201_v56 = vpop.permute.xlu1 %2200 }
 0x303   : > { %v1903_v39 = vmul.f32 %v2561_v47, %v1887_v48  ;;  %v1918_v6 = vadd.f32 -0.28449672, %v1902_v38  ;;  %v2162_v14 = vmul.f32 %v2146_v59, %v2130_v36  ;;  %v2569_v22 = vpop.eup %2568  ;;  %v2140_v18 = vadd.f32 1.0, %v2108_v55 }
 0x304   : > { %v2163_v15 = vmul.f32 %v2147_v43, %v2131_v1  ;;  %v2109_v10 = vsel %vm2077_vm6, %v2061_v26, %v2093_v51  ;;  %v5199_v32 = vmov 0   ;;  %v2206_v43 = vpop.permute.xlu0 %2205 }
 0x305   : > { %v1919_v45 = vadd.f32 -0.28449672, %v1903_v39  ;;  %v1934_v37 = vmul.f32 %v4745_v53, %v1918_v6  ;;  %v2178_v23 = vpack.c.bf16 %v2162_v14, %v2160_v24 }
 0x306   : > { %v2179_v8 = vpack.c.bf16 %v2163_v15, %v2161_v17 }
 0x307   : > { %v1935_v34 = vmul.f32 %v2561_v47, %v1919_v45  ;;  %v1950_v25 = vadd.f32 0.2548296, %v1934_v37 }
 0x308   : > { %2237 = vmatprep.subr.bf16.mxu1 %v2179_v8 }
 0x309   : > { %v1951_v33 = vadd.f32 0.2548296, %v1935_v34  ;;  %v1966_v3 = vmul.f32 %v4745_v53, %v1950_v25  ;;  %2238 = vmatpush1.bf16.msra.mxu1 %v2178_v23  ;;  %v2124_v53 = vmul.f32 0.5, %v4578_v57 }
 0x30b   : > { %v1967_v31 = vmul.f32 %v2561_v47, %v1951_v33  ;;  %v2046_v49 = vmul.f32 %v2567_v62, %v1966_v3  ;;  %v2141_v47 = vadd.f32 1.0, %v2109_v10  ;;  %v2156_v21 = vmul.f32 %v2140_v18, %v2124_v53 }
 0x30d   : > { %v2047_v12 = vmul.f32 %v2569_v22, %v1967_v31  ;;  %v2062_v7 = vsub.f32 1.0, %v2046_v49  ;;  %v2157_v11 = vmul.f32 %v2141_v47, %v2125_v9 }
 0x30f   : > { %v2063_v13 = vsub.f32 1.0, %v2047_v12  ;;  %v2094_v16 = vsub.f32 0.0, %v2062_v7 }
 0x311   : > { %v2095_v46 = vsub.f32 0.0, %v2063_v13  ;;  %v2110_v20 = vsel %vm2078_vm7, %v2062_v7, %v2094_v16 }
 0x312   : > { %v2142_v2 = vadd.f32 1.0, %v2110_v20 }
 0x313   : > { %v2111_v61 = vsel %vm2079_vm8, %v2063_v13, %v2095_v46 }
 0x314   : > { %v2143_v0 = vadd.f32 1.0, %v2111_v61  ;;  %v2158_v4 = vmul.f32 %v2142_v2, %v2126_v19 }
 0x316   : > { %v2159_v57 = vmul.f32 %v2143_v0, %v2127_v29  ;;  %v2176_v60 = vpack.c.bf16 %v2158_v4, %v2156_v21 }
 0x318   : > { %v2177_v30 = vpack.c.bf16 %v2159_v57, %v2157_v11 }
 0x31a   : > { %2239 = vmatprep.subr.bf16.mxu1 %v2177_v30 }
 0x31b   : > { %2240 = vmatpush1.bf16.msra.mxu1 %v2176_v60 }
 0x31e   : > { %2390 = vmatmul.mubr.msk.bf16.vlgmr.msra.gmra.mxu1 %vm2218_vm9, %v2504_v50 }
 0x31f   : > { %2267 = vmatprep.mubr.bf16.mxu1 %v5199_v32 }
 0x326   : > { %2391 = vmatmul.mubr.msk.bf16.gmra.mxu1 %vm2218_vm9, %v2505_v52 }
 0x3de   : > { %v2259_v58 = vpop.f32.mrf.mxu1 }
 0x3df   : > { %v2260_v42 = vadd.f32 %v2259_v58, %v2191_v41 }
 0x3e0   : > { %v2261_v28 = vpop.f32.mrf.mxu1 }
 0x3e1   : > { %2278 = vst [vmem:[%s298_s21] sm:$0xff] %v2260_v42  ;;  %v2262_v5 = vadd.f32 %v2261_v28, %v2191_v41 }
 0x3e2   : > { %v2263_v54 = vpop.f32.mrf.mxu1 }
 0x3e3   : > { %2279 = vst [vmem:[%s298_s21 + $0x8] sm:$0xff] %v2262_v5  ;;  %v2264_v48 = vadd.f32 %v2263_v54, %v2196_v27 }
 0x3e4   : > { %v2265_v38 = vpop.f32.mrf.mxu1 }
 0x3e5   : > { %2280 = vst [vmem:[%s298_s21 + $0x10] sm:$0xff] %v2264_v48  ;;  %v2266_v44 = vadd.f32 %v2265_v38, %v2196_v27 }
 0x3e6   : > { %v2269_v36 = vpop.f32.mrf.mxu1 }
 0x3e7   : > { %2281 = vst [vmem:[%s298_s21 + $0x18] sm:$0xff] %v2266_v44  ;;  %v2270_v1 = vadd.f32 %v2269_v36, %v2201_v56 }
 0x3e8   : > { %v2271_v59 = vpop.f32.mrf.mxu1 }
 0x3e9   : > { %2282 = vst [vmem:[%s298_s21 + $0x20] sm:$0xff] %v2270_v1  ;;  %v2272_v40 = vadd.f32 %v2271_v59, %v2201_v56 }
 0x3ea   : > { %v2273_v39 = vpop.f32.mrf.mxu1 }
 0x3eb   : > { %2283 = vst [vmem:[%s298_s21 + $0x28] sm:$0xff] %v2272_v40  ;;  %v2274_v6 = vadd.f32 %v2273_v39, %v2206_v43 }
 0x3ec   : > { %v2275_v35 = vpop.f32.mrf.mxu1 }
 0x3ed   : > { %2284 = vst [vmem:[%s298_s21 + $0x30] sm:$0xff] %v2274_v6  ;;  %v2276_v24 = vadd.f32 %v2275_v35, %v2206_v43 }
 0x3ef   : > { %2285 = vst [vmem:[%s298_s21 + $0x38] sm:$0xff] %v2276_v24 }
 0x3f0   : > { %2586 = shalt.err (!%p2583_p3)
}
 0x3f1   : > { %s2587_s10 = scalar_lea.hbm %s4789_s26, 1024  ;;  %s2591_s22 = scalar_lea.hbm %s4844_s8, 2048 }
 0x3f2   : > { %p2588_p4 = scmp.ne.s32.totalorder %s4789_s26, %s2587_s10  ;;  %p2592_p9 = scmp.lt.s32.totalorder %s4789_s26, %s4844_s8 }
 0x3f3   : > { %p2593_p10 = scmp.lt.s32.totalorder %s2591_s22, %s2587_s10 }
 0x3f4   : > { %p2589_p7 = pnand %p2588_p4, %p2737_p5 }
 0x3f5   : > { %p2594_p11 = por %p2593_p10, %p2592_p9 }
 0x3f6   : > { %p2590_p8 = pneg %p2589_p7 }
 0x3f8   : > { %p2595_p12 = pnand %p2594_p11, %p2590_p8 }
 0x3fa   : > { %2598 = shalt.err (!%p2595_p12)
}
 0x3fb   : > { %s2653_s13 = smov 256  }
 0x3fc   : > { %2399 = dma.vmem_to_hbm [thread:$0]  (%p2737_p5), %s4791_s17, 1024, %s4789_s26, %s4795_s9, %s2653_s13, %s2653_s13, %s2642_s23  }
 0x3fd PF: > { %p2405_p13 = scmp.ge.s32.totalorder %s2633_s30, 2  ;;  %s2315_s18 = sand.u32 1, %s2621_s27  }
 0x3fe   : > { %s2316_s19 = scalar_lea.sflag [#allocation3], %s2315_s18 }
 0x3ff   : > { %p2402_p0 = pnand %p2405_p13, %p2741_p6 }
 0x401   : > { %p2403_p1 = pneg %p2402_p0 }
 0x403   : > { %2616 = dma.done.wait (%p2403_p1), %s2316_s19, 1024  }
 0x404   : > { %2618 = vsyncadd (%p2403_p1), %s2316_s19, 4294966272  ;;  %p18_p2 = scmp.ge.s32.totalorder %s2724_s11, 4   ;;  %s5200_s27 = smov %s2625_s28 }
 0x405   : > { %s5201_s28 = smov %s2629_s29  ;;  %s5202_s29 = smov %s2735_s14 }
 0x406   : > { %s5203_s30 = smov %s2724_s11  ;;  %20 = sbr.rel (!%p18_p2) target bundleno = 3 (0x3), region = 94 }
 0x40b   :  { %2321 = vsyncpa [#allocation3], 1 }
 0x40c   :  { %2323 = vsyncpa [#allocation3 + $0x1], 1 }

</bundles_post_ra>
